<compile_context>
chip_gen: v7x
topology: tpu7x:2x2x1
jax: 0.10.0
libtpu: 0.0.40
codegen_flags: <defaults>
</compile_context>

<pallas_src>
import jax
import jax.numpy as jnp
from jax.experimental import pallas as pl
from jax.experimental.pallas import tpu as pltpu

# ---- synthetic feature-column configuration (deterministic, in-script) --------------
DENSE_DIMS = (4, 4)          # two DenseFeature columns
D_DENSE = sum(DENSE_DIMS)    # 8
SPARSE_VOCABS = (16, 16)     # two SparseFeature columns
VARLEN_VOCAB = 16            # one VarlenFeature column
MAXLEN = 8                   # varlen sequence length (0 == padding id)
EMBED_DIM = 8                # embed_dim for every sparse/varlen feature

# feature_index (column slices of x)
SPARSE0_COL = D_DENSE             # 8
SPARSE1_COL = D_DENSE + 1         # 9
VARLEN_START = D_DENSE + 2        # 10
F_TOTAL = VARLEN_START + MAXLEN   # 18
N_IDS = 2 + MAXLEN                # 10 integer id columns

IN_FEATURES = D_DENSE + 2 * EMBED_DIM + EMBED_DIM   # compute_in_features() == 32

# stacked selection / table layout (K dimension of the fused matmul)
ROW_DENSE = 0                         # rows  0..7  : dense values vs identity block
ROW_S0 = D_DENSE                      # rows  8..23 : sparse0 one-hot vs emb_s0
ROW_S1 = ROW_S0 + SPARSE_VOCABS[0]    # rows 24..39 : sparse1 one-hot vs emb_s1
ROW_V = ROW_S1 + SPARSE_VOCABS[1]     # rows 40..55 : varlen masked counts vs emb_v
STACK_ROWS = 64                       # 56 used rows, padded

# stacked table column layout (N dimension) -- already in output order, plus count col
COL_DENSE = 0                         # 0..7
COL_E0 = D_DENSE                      # 8..15
COL_E1 = COL_E0 + EMBED_DIM           # 16..23
COL_V = COL_E1 + EMBED_DIM            # 24..31 (sum of valid varlen embeds)
COL_CNT = COL_V + EMBED_DIM           # 32     (valid-token count)
TABLE_COLS = 40                       # padded

TILE_B = 128    # batch rows per grid step (use >=256 on v6e/v7x at production batch)


def feature_kernel(dense_ref, ids_ref, table_ref, out_ref, sel_ref):
    tb = out_ref.shape[0]
    ids = ids_ref[...]                                        # [tb, N_IDS] int32
    iota = jax.lax.broadcasted_iota(jnp.int32, (tb, STACK_ROWS), 1)

    # ---- one fused selection matrix: sparse one-hots + masked varlen counts ---------
    s0 = jnp.clip(ids[:, 0:1], 0, SPARSE_VOCABS[0] - 1)       # clamp (gather semantics)
    s1 = jnp.clip(ids[:, 1:2], 0, SPARSE_VOCABS[1] - 1)
    onehot = (s0 + ROW_S0 == iota).astype(jnp.float32)
    onehot = onehot + (s1 + ROW_S1 == iota).astype(jnp.float32)
    for t in range(MAXLEN):                                   # VPU-only masked one-hots
        vid = ids[:, 2 + t:3 + t]                             # [tb, 1]
        valid = vid > 0                                       # 0 == padding id
        vc = jnp.clip(vid, 0, VARLEN_VOCAB - 1)
        onehot = onehot + jnp.logical_and(vc + ROW_V == iota, valid).astype(jnp.float32)

    # dense values occupy rows 0..7 of the K axis (identity block in the table passes
    # them straight through the same matmul); one-hot blocks never touch those lanes.
    sel_ref[...] = onehot
    sel_ref[:, 0:D_DENSE] = dense_ref[...]

    # ---- single MXU matmul against the block-diagonal stacked table -----------------
    fused = jnp.dot(sel_ref[...], table_ref[...],
                    preferred_element_type=jnp.float32)       # [tb, 40]
    # fused = [dense | emb0 | emb1 | sum_v | cnt | pad] -- already in output order.

    cnt = fused[:, COL_CNT:COL_CNT + 1]                       # valid-token count
    inv = 1.0 / jnp.maximum(cnt, 1.0)                         # exact mean-pool scale
    col = jax.lax.broadcasted_iota(jnp.int32, (tb, IN_FEATURES), 1)
    scale = jnp.where(col >= COL_V, inv, 1.0)                 # scale only pooled cols

    out_ref[...] = fused[:, 0:IN_FEATURES] * scale            # ONE full-row store


def pack_stacked_table(emb_s0, emb_s1, emb_v):
    """Block-diagonal [64, 40] table, packed ONCE at model init (not per forward)."""
    tbl = jnp.zeros((STACK_ROWS, TABLE_COLS), jnp.float32)
    tbl = tbl.at[ROW_DENSE:ROW_DENSE + D_DENSE,
                 COL_DENSE:COL_DENSE + D_DENSE].set(jnp.eye(D_DENSE, dtype=jnp.float32))
    tbl = tbl.at[ROW_S0:ROW_S0 + SPARSE_VOCABS[0], COL_E0:COL_E0 + EMBED_DIM].set(emb_s0)
    tbl = tbl.at[ROW_S1:ROW_S1 + SPARSE_VOCABS[1], COL_E1:COL_E1 + EMBED_DIM].set(emb_s1)
    tbl = tbl.at[ROW_V:ROW_V + VARLEN_VOCAB, COL_V:COL_V + EMBED_DIM].set(emb_v)
    tbl = tbl.at[ROW_V:ROW_V + VARLEN_VOCAB, COL_CNT].set(1.0)   # count column
    return tbl


@jax.jit
def base_model_forward(x, table):
    """x: packed f32 feature rows [B, 18]; table: pre-packed stacked embedding table."""
    batch = x.shape[0]
    tile_b = TILE_B if batch >= TILE_B else batch
    assert batch % tile_b == 0, "demo forward expects batch to be a multiple of TILE_B"

    dense = x[:, 0:D_DENSE]                                   # f32 dense columns
    ids = x[:, D_DENSE:F_TOTAL].astype(jnp.int32)             # single int32 id array

    return pl.pallas_call(
        feature_kernel,
        out_shape=jax.ShapeDtypeStruct((batch, IN_FEATURES), jnp.float32),
        grid_spec=pltpu.PrefetchScalarGridSpec(
            num_scalar_prefetch=0,
            grid=(batch // tile_b,),
            in_specs=[
                pl.BlockSpec((tile_b, D_DENSE), lambda i: (i, 0)),
                pl.BlockSpec((tile_b, N_IDS), lambda i: (i, 0)),
                # constant index_map: table DMA'd once, resident across all grid steps
                pl.BlockSpec((STACK_ROWS, TABLE_COLS), lambda i: (0, 0)),
            ],
            out_specs=pl.BlockSpec((tile_b, IN_FEATURES), lambda i: (i, 0)),
            scratch_shapes=[pltpu.VMEM((tile_b, STACK_ROWS), jnp.float32)],
        ),
        compiler_params=pltpu.CompilerParams(
            dimension_semantics=("parallel",)),               # shards batch over TCs
    )(dense, ids, table)


def reference_forward(x, emb_s0, emb_s1, emb_v):
    dense = x[:, 0:D_DENSE]
    idx0 = x[:, SPARSE0_COL].astype(jnp.int32)
    idx1 = x[:, SPARSE1_COL].astype(jnp.int32)
    emb0 = emb_s0[idx0]
    emb1 = emb_s1[idx1]
    seq = x[:, VARLEN_START:VARLEN_START + MAXLEN].astype(jnp.int32)
    mask = (seq > 0).astype(jnp.float32)[..., None]
    gathered = emb_v[seq] * mask
    pooled = gathered.sum(axis=1) / jnp.maximum(mask.sum(axis=1), 1.0)
    return jnp.concatenate([dense, emb0, emb1, pooled], axis=1)


if __name__ == "__main__":
    B = 256   # 2 grid steps of TILE_B=128 (exercises the batch grid + parallel axis)
    key = jax.random.PRNGKey(0)
    k_dense, k_s0, k_s1, k_vl, k_e0, k_e1, k_ev = jax.random.split(key, 7)

    # deterministic input: dense floats + integer ids stored as floats (PyTorch x.float())
    dense_part = jax.random.normal(k_dense, (B, D_DENSE), jnp.float32)
    sp0 = jax.random.randint(k_s0, (B, 1), 0, SPARSE_VOCABS[0]).astype(jnp.float32)
    sp1 = jax.random.randint(k_s1, (B, 1), 0, SPARSE_VOCABS[1]).astype(jnp.float32)
    vl = jax.random.randint(k_vl, (B, MAXLEN), 0, VARLEN_VOCAB).astype(jnp.float32)
    x = jnp.concatenate([dense_part, sp0, sp1, vl], axis=1)   # [B, 18]

    # embedding tables (BaseModel.__init__ create_embed_dict shapes), packed at init
    emb_s0 = jax.random.normal(k_e0, (SPARSE_VOCABS[0], EMBED_DIM), jnp.float32) * 0.1
    emb_s1 = jax.random.normal(k_e1, (SPARSE_VOCABS[1], EMBED_DIM), jnp.float32) * 0.1
    emb_v = jax.random.normal(k_ev, (VARLEN_VOCAB, EMBED_DIM), jnp.float32) * 0.1
    table = pack_stacked_table(emb_s0, emb_s1, emb_v)         # once, outside forward

    out = jax.block_until_ready(base_model_forward(x, table))
    ref = reference_forward(x, emb_s0, emb_s1, emb_v)

    assert out.shape == (B, IN_FEATURES)
    assert jnp.allclose(out, ref, atol=1e-5, rtol=1e-5), (
        f"max abs err = {jnp.max(jnp.abs(out - ref))}")
    print("KERNEL_OK")
</pallas_src>

<mosaic_0001>
module attributes {stable_mosaic.version = 11 : i64} {
  func.func @feature_kernel(%arg0: i32, %arg1: memref<128x8xf32, #tpu.memory_space<vmem>>, %arg2: memref<128x10xi32, #tpu.memory_space<vmem>>, %arg3: memref<64x40xf32, #tpu.memory_space<vmem>>, %arg4: memref<128x32xf32, #tpu.memory_space<vmem>>, %arg5: memref<128x64xf32, #tpu.memory_space<vmem>>) attributes {dimension_semantics = [#tpu.dimension_semantics<parallel>], iteration_bounds = array<i64: 2>, scalar_prefetch = 0 : i64, scratch_operands = 1 : i64, tpu.core_type = #tpu.core_type<tc>, window_params = [{transform_indices = @transform_0, window_bounds = array<i64: 128, 8>}, {transform_indices = @transform_1, window_bounds = array<i64: 128, 10>}, {pipeline_mode = #tpu.pipeline_mode<synchronous>, transform_indices = @transform_2, window_bounds = array<i64: 64, 40>}, {transform_indices = @transform_3, window_bounds = array<i64: 128, 32>}]} {
    %c0 = arith.constant 0 : index
    %c0_0 = arith.constant 0 : index
    %0 = vector.load %arg2[%c0, %c0_0] : memref<128x10xi32, #tpu.memory_space<vmem>>, vector<128x10xi32>
    %1 = tpu.iota {dimensions = array<i32: 1>} : vector<128x64xi32>
    %2 = vector.extract_strided_slice %0 {offsets = [0, 0], sizes = [128, 1], strides = [1, 1]} : vector<128x10xi32> to vector<128x1xi32>
    %c0_i32 = arith.constant 0 : i32
    %c15_i32 = arith.constant 15 : i32
    %3 = vector.broadcast %c0_i32 : i32 to vector<128x1xi32>
    %4 = arith.maxsi %3, %2 : vector<128x1xi32>
    %5 = vector.broadcast %c15_i32 : i32 to vector<128x1xi32>
    %6 = arith.minsi %5, %4 : vector<128x1xi32>
    %7 = vector.extract_strided_slice %0 {offsets = [0, 1], sizes = [128, 1], strides = [1, 1]} : vector<128x10xi32> to vector<128x1xi32>
    %c0_i32_1 = arith.constant 0 : i32
    %c15_i32_2 = arith.constant 15 : i32
    %8 = vector.broadcast %c0_i32_1 : i32 to vector<128x1xi32>
    %9 = arith.maxsi %8, %7 : vector<128x1xi32>
    %10 = vector.broadcast %c15_i32_2 : i32 to vector<128x1xi32>
    %11 = arith.minsi %10, %9 : vector<128x1xi32>
    %c8_i32 = arith.constant 8 : i32
    %12 = vector.broadcast %c8_i32 : i32 to vector<128x1xi32>
    %13 = arith.addi %6, %12 : vector<128x1xi32>
    %14 = vector.broadcast %13 : vector<128x1xi32> to vector<128x64xi32>
    %15 = arith.cmpi eq, %14, %1 : vector<128x64xi32>
    %16 = arith.extui %15 : vector<128x64xi1> to vector<128x64xi32>
    %17 = arith.sitofp %16 : vector<128x64xi32> to vector<128x64xf32>
    %c24_i32 = arith.constant 24 : i32
    %18 = vector.broadcast %c24_i32 : i32 to vector<128x1xi32>
    %19 = arith.addi %11, %18 : vector<128x1xi32>
    %20 = vector.broadcast %19 : vector<128x1xi32> to vector<128x64xi32>
    %21 = arith.cmpi eq, %20, %1 : vector<128x64xi32>
    %22 = arith.extui %21 : vector<128x64xi1> to vector<128x64xi32>
    %23 = arith.sitofp %22 : vector<128x64xi32> to vector<128x64xf32>
    %24 = arith.addf %17, %23 : vector<128x64xf32>
    %25 = vector.extract_strided_slice %0 {offsets = [0, 2], sizes = [128, 1], strides = [1, 1]} : vector<128x10xi32> to vector<128x1xi32>
    %c0_i32_3 = arith.constant 0 : i32
    %26 = vector.broadcast %c0_i32_3 : i32 to vector<128x1xi32>
    %27 = arith.cmpi sgt, %25, %26 : vector<128x1xi32>
    %c0_i32_4 = arith.constant 0 : i32
    %c15_i32_5 = arith.constant 15 : i32
    %28 = vector.broadcast %c0_i32_4 : i32 to vector<128x1xi32>
    %29 = arith.maxsi %28, %25 : vector<128x1xi32>
    %30 = vector.broadcast %c15_i32_5 : i32 to vector<128x1xi32>
    %31 = arith.minsi %30, %29 : vector<128x1xi32>
    %c40_i32 = arith.constant 40 : i32
    %32 = vector.broadcast %c40_i32 : i32 to vector<128x1xi32>
    %33 = arith.addi %31, %32 : vector<128x1xi32>
    %34 = vector.broadcast %33 : vector<128x1xi32> to vector<128x64xi32>
    %35 = arith.cmpi eq, %34, %1 : vector<128x64xi32>
    %36 = vector.broadcast %27 : vector<128x1xi1> to vector<128x64xi1>
    %37 = arith.andi %35, %36 : vector<128x64xi1>
    %38 = arith.extui %37 : vector<128x64xi1> to vector<128x64xi32>
    %39 = arith.sitofp %38 : vector<128x64xi32> to vector<128x64xf32>
    %40 = arith.addf %24, %39 : vector<128x64xf32>
    %41 = vector.extract_strided_slice %0 {offsets = [0, 3], sizes = [128, 1], strides = [1, 1]} : vector<128x10xi32> to vector<128x1xi32>
    %c0_i32_6 = arith.constant 0 : i32
    %42 = vector.broadcast %c0_i32_6 : i32 to vector<128x1xi32>
    %43 = arith.cmpi sgt, %41, %42 : vector<128x1xi32>
    %c0_i32_7 = arith.constant 0 : i32
    %c15_i32_8 = arith.constant 15 : i32
    %44 = vector.broadcast %c0_i32_7 : i32 to vector<128x1xi32>
    %45 = arith.maxsi %44, %41 : vector<128x1xi32>
    %46 = vector.broadcast %c15_i32_8 : i32 to vector<128x1xi32>
    %47 = arith.minsi %46, %45 : vector<128x1xi32>
    %c40_i32_9 = arith.constant 40 : i32
    %48 = vector.broadcast %c40_i32_9 : i32 to vector<128x1xi32>
    %49 = arith.addi %47, %48 : vector<128x1xi32>
    %50 = vector.broadcast %49 : vector<128x1xi32> to vector<128x64xi32>
    %51 = arith.cmpi eq, %50, %1 : vector<128x64xi32>
    %52 = vector.broadcast %43 : vector<128x1xi1> to vector<128x64xi1>
    %53 = arith.andi %51, %52 : vector<128x64xi1>
    %54 = arith.extui %53 : vector<128x64xi1> to vector<128x64xi32>
    %55 = arith.sitofp %54 : vector<128x64xi32> to vector<128x64xf32>
    %56 = arith.addf %40, %55 : vector<128x64xf32>
    %57 = vector.extract_strided_slice %0 {offsets = [0, 4], sizes = [128, 1], strides = [1, 1]} : vector<128x10xi32> to vector<128x1xi32>
    %c0_i32_10 = arith.constant 0 : i32
    %58 = vector.broadcast %c0_i32_10 : i32 to vector<128x1xi32>
    %59 = arith.cmpi sgt, %57, %58 : vector<128x1xi32>
    %c0_i32_11 = arith.constant 0 : i32
    %c15_i32_12 = arith.constant 15 : i32
    %60 = vector.broadcast %c0_i32_11 : i32 to vector<128x1xi32>
    %61 = arith.maxsi %60, %57 : vector<128x1xi32>
    %62 = vector.broadcast %c15_i32_12 : i32 to vector<128x1xi32>
    %63 = arith.minsi %62, %61 : vector<128x1xi32>
    %c40_i32_13 = arith.constant 40 : i32
    %64 = vector.broadcast %c40_i32_13 : i32 to vector<128x1xi32>
    %65 = arith.addi %63, %64 : vector<128x1xi32>
    %66 = vector.broadcast %65 : vector<128x1xi32> to vector<128x64xi32>
    %67 = arith.cmpi eq, %66, %1 : vector<128x64xi32>
    %68 = vector.broadcast %59 : vector<128x1xi1> to vector<128x64xi1>
    %69 = arith.andi %67, %68 : vector<128x64xi1>
    %70 = arith.extui %69 : vector<128x64xi1> to vector<128x64xi32>
    %71 = arith.sitofp %70 : vector<128x64xi32> to vector<128x64xf32>
    %72 = arith.addf %56, %71 : vector<128x64xf32>
    %73 = vector.extract_strided_slice %0 {offsets = [0, 5], sizes = [128, 1], strides = [1, 1]} : vector<128x10xi32> to vector<128x1xi32>
    %c0_i32_14 = arith.constant 0 : i32
    %74 = vector.broadcast %c0_i32_14 : i32 to vector<128x1xi32>
    %75 = arith.cmpi sgt, %73, %74 : vector<128x1xi32>
    %c0_i32_15 = arith.constant 0 : i32
    %c15_i32_16 = arith.constant 15 : i32
    %76 = vector.broadcast %c0_i32_15 : i32 to vector<128x1xi32>
    %77 = arith.maxsi %76, %73 : vector<128x1xi32>
    %78 = vector.broadcast %c15_i32_16 : i32 to vector<128x1xi32>
    %79 = arith.minsi %78, %77 : vector<128x1xi32>
    %c40_i32_17 = arith.constant 40 : i32
    %80 = vector.broadcast %c40_i32_17 : i32 to vector<128x1xi32>
    %81 = arith.addi %79, %80 : vector<128x1xi32>
    %82 = vector.broadcast %81 : vector<128x1xi32> to vector<128x64xi32>
    %83 = arith.cmpi eq, %82, %1 : vector<128x64xi32>
    %84 = vector.broadcast %75 : vector<128x1xi1> to vector<128x64xi1>
    %85 = arith.andi %83, %84 : vector<128x64xi1>
    %86 = arith.extui %85 : vector<128x64xi1> to vector<128x64xi32>
    %87 = arith.sitofp %86 : vector<128x64xi32> to vector<128x64xf32>
    %88 = arith.addf %72, %87 : vector<128x64xf32>
    %89 = vector.extract_strided_slice %0 {offsets = [0, 6], sizes = [128, 1], strides = [1, 1]} : vector<128x10xi32> to vector<128x1xi32>
    %c0_i32_18 = arith.constant 0 : i32
    %90 = vector.broadcast %c0_i32_18 : i32 to vector<128x1xi32>
    %91 = arith.cmpi sgt, %89, %90 : vector<128x1xi32>
    %c0_i32_19 = arith.constant 0 : i32
    %c15_i32_20 = arith.constant 15 : i32
    %92 = vector.broadcast %c0_i32_19 : i32 to vector<128x1xi32>
    %93 = arith.maxsi %92, %89 : vector<128x1xi32>
    %94 = vector.broadcast %c15_i32_20 : i32 to vector<128x1xi32>
    %95 = arith.minsi %94, %93 : vector<128x1xi32>
    %c40_i32_21 = arith.constant 40 : i32
    %96 = vector.broadcast %c40_i32_21 : i32 to vector<128x1xi32>
    %97 = arith.addi %95, %96 : vector<128x1xi32>
    %98 = vector.broadcast %97 : vector<128x1xi32> to vector<128x64xi32>
    %99 = arith.cmpi eq, %98, %1 : vector<128x64xi32>
    %100 = vector.broadcast %91 : vector<128x1xi1> to vector<128x64xi1>
    %101 = arith.andi %99, %100 : vector<128x64xi1>
    %102 = arith.extui %101 : vector<128x64xi1> to vector<128x64xi32>
    %103 = arith.sitofp %102 : vector<128x64xi32> to vector<128x64xf32>
    %104 = arith.addf %88, %103 : vector<128x64xf32>
    %105 = vector.extract_strided_slice %0 {offsets = [0, 7], sizes = [128, 1], strides = [1, 1]} : vector<128x10xi32> to vector<128x1xi32>
    %c0_i32_22 = arith.constant 0 : i32
    %106 = vector.broadcast %c0_i32_22 : i32 to vector<128x1xi32>
    %107 = arith.cmpi sgt, %105, %106 : vector<128x1xi32>
    %c0_i32_23 = arith.constant 0 : i32
    %c15_i32_24 = arith.constant 15 : i32
    %108 = vector.broadcast %c0_i32_23 : i32 to vector<128x1xi32>
    %109 = arith.maxsi %108, %105 : vector<128x1xi32>
    %110 = vector.broadcast %c15_i32_24 : i32 to vector<128x1xi32>
    %111 = arith.minsi %110, %109 : vector<128x1xi32>
    %c40_i32_25 = arith.constant 40 : i32
    %112 = vector.broadcast %c40_i32_25 : i32 to vector<128x1xi32>
    %113 = arith.addi %111, %112 : vector<128x1xi32>
    %114 = vector.broadcast %113 : vector<128x1xi32> to vector<128x64xi32>
    %115 = arith.cmpi eq, %114, %1 : vector<128x64xi32>
    %116 = vector.broadcast %107 : vector<128x1xi1> to vector<128x64xi1>
    %117 = arith.andi %115, %116 : vector<128x64xi1>
    %118 = arith.extui %117 : vector<128x64xi1> to vector<128x64xi32>
    %119 = arith.sitofp %118 : vector<128x64xi32> to vector<128x64xf32>
    %120 = arith.addf %104, %119 : vector<128x64xf32>
    %121 = vector.extract_strided_slice %0 {offsets = [0, 8], sizes = [128, 1], strides = [1, 1]} : vector<128x10xi32> to vector<128x1xi32>
    %c0_i32_26 = arith.constant 0 : i32
    %122 = vector.broadcast %c0_i32_26 : i32 to vector<128x1xi32>
    %123 = arith.cmpi sgt, %121, %122 : vector<128x1xi32>
    %c0_i32_27 = arith.constant 0 : i32
    %c15_i32_28 = arith.constant 15 : i32
    %124 = vector.broadcast %c0_i32_27 : i32 to vector<128x1xi32>
    %125 = arith.maxsi %124, %121 : vector<128x1xi32>
    %126 = vector.broadcast %c15_i32_28 : i32 to vector<128x1xi32>
    %127 = arith.minsi %126, %125 : vector<128x1xi32>
    %c40_i32_29 = arith.constant 40 : i32
    %128 = vector.broadcast %c40_i32_29 : i32 to vector<128x1xi32>
    %129 = arith.addi %127, %128 : vector<128x1xi32>
    %130 = vector.broadcast %129 : vector<128x1xi32> to vector<128x64xi32>
    %131 = arith.cmpi eq, %130, %1 : vector<128x64xi32>
    %132 = vector.broadcast %123 : vector<128x1xi1> to vector<128x64xi1>
    %133 = arith.andi %131, %132 : vector<128x64xi1>
    %134 = arith.extui %133 : vector<128x64xi1> to vector<128x64xi32>
    %135 = arith.sitofp %134 : vector<128x64xi32> to vector<128x64xf32>
    %136 = arith.addf %120, %135 : vector<128x64xf32>
    %137 = vector.extract_strided_slice %0 {offsets = [0, 9], sizes = [128, 1], strides = [1, 1]} : vector<128x10xi32> to vector<128x1xi32>
    %c0_i32_30 = arith.constant 0 : i32
    %138 = vector.broadcast %c0_i32_30 : i32 to vector<128x1xi32>
    %139 = arith.cmpi sgt, %137, %138 : vector<128x1xi32>
    %c0_i32_31 = arith.constant 0 : i32
    %c15_i32_32 = arith.constant 15 : i32
    %140 = vector.broadcast %c0_i32_31 : i32 to vector<128x1xi32>
    %141 = arith.maxsi %140, %137 : vector<128x1xi32>
    %142 = vector.broadcast %c15_i32_32 : i32 to vector<128x1xi32>
    %143 = arith.minsi %142, %141 : vector<128x1xi32>
    %c40_i32_33 = arith.constant 40 : i32
    %144 = vector.broadcast %c40_i32_33 : i32 to vector<128x1xi32>
    %145 = arith.addi %143, %144 : vector<128x1xi32>
    %146 = vector.broadcast %145 : vector<128x1xi32> to vector<128x64xi32>
    %147 = arith.cmpi eq, %146, %1 : vector<128x64xi32>
    %148 = vector.broadcast %139 : vector<128x1xi1> to vector<128x64xi1>
    %149 = arith.andi %147, %148 : vector<128x64xi1>
    %150 = arith.extui %149 : vector<128x64xi1> to vector<128x64xi32>
    %151 = arith.sitofp %150 : vector<128x64xi32> to vector<128x64xf32>
    %152 = arith.addf %136, %151 : vector<128x64xf32>
    %c0_34 = arith.constant 0 : index
    %c0_35 = arith.constant 0 : index
    %153 = vector.load %arg5[%c0_34, %c0_35] : memref<128x64xf32, #tpu.memory_space<vmem>>, vector<128x64xf32>
    tpu.vector_store %arg5[%c0_34, %c0_35], %152 {strides = array<i32>} : memref<128x64xf32, #tpu.memory_space<vmem>>, vector<128x64xf32>,
    %c0_36 = arith.constant 0 : index
    %c0_37 = arith.constant 0 : index
    %154 = vector.load %arg1[%c0_36, %c0_37] : memref<128x8xf32, #tpu.memory_space<vmem>>, vector<128x8xf32>
    %c0_38 = arith.constant 0 : index
    %c0_39 = arith.constant 0 : index
    %155 = vector.load %arg5[%c0_38, %c0_39] : memref<128x64xf32, #tpu.memory_space<vmem>>, vector<128x8xf32>
    tpu.vector_store %arg5[%c0_38, %c0_39], %154 {strides = array<i32>} : memref<128x64xf32, #tpu.memory_space<vmem>>, vector<128x8xf32>,
    %c0_40 = arith.constant 0 : index
    %c0_41 = arith.constant 0 : index
    %156 = vector.load %arg5[%c0_40, %c0_41] : memref<128x64xf32, #tpu.memory_space<vmem>>, vector<128x64xf32>
    %c0_42 = arith.constant 0 : index
    %c0_43 = arith.constant 0 : index
    %157 = vector.load %arg3[%c0_42, %c0_43] : memref<64x40xf32, #tpu.memory_space<vmem>>, vector<64x40xf32>
    %cst = arith.constant dense<0.000000e+00> : vector<128x40xf32>
    %158 = tpu.matmul %156, %157, %cst {dimension_numbers = #tpu.dot_dimension_numbers<[1], [0], [0], [1], [0, 0, 1, 1], [], []>} : vector<128x64xf32>, vector<64x40xf32>, vector<128x40xf32> -> vector<128x40xf32>
    %159 = vector.extract_strided_slice %158 {offsets = [0, 32], sizes = [128, 1], strides = [1, 1]} : vector<128x40xf32> to vector<128x1xf32>
    %cst_44 = arith.constant 1.000000e+00 : f32
    %160 = vector.broadcast %cst_44 : f32 to vector<128x1xf32>
    %161 = arith.maximumf %159, %160 : vector<128x1xf32>
    %cst_45 = arith.constant 1.000000e+00 : f32
    %162 = vector.broadcast %cst_45 : f32 to vector<128x1xf32>
    %163 = arith.divf %162, %161 : vector<128x1xf32>
    %164 = tpu.iota {dimensions = array<i32: 1>} : vector<128x32xi32>
    %c24_i32_46 = arith.constant 24 : i32
    %165 = vector.broadcast %c24_i32_46 : i32 to vector<128x32xi32>
    %166 = arith.cmpi sge, %164, %165 : vector<128x32xi32>
    %cst_47 = arith.constant 1.000000e+00 : f32
    %167 = vector.shape_cast %163 : vector<128x1xf32> to vector<128x1xf32>
    %168 = vector.broadcast %167 : vector<128x1xf32> to vector<128x32xf32>
    %169 = vector.broadcast %cst_47 : f32 to vector<128x32xf32>
    %170 = arith.select %166, %168, %169 : vector<128x32xi1>, vector<128x32xf32>
    %171 = vector.extract_strided_slice %158 {offsets = [0, 0], sizes = [128, 32], strides = [1, 1]} : vector<128x40xf32> to vector<128x32xf32>
    %172 = arith.mulf %171, %170 : vector<128x32xf32>
    %c0_48 = arith.constant 0 : index
    %c0_49 = arith.constant 0 : index
    %173 = vector.load %arg4[%c0_48, %c0_49] : memref<128x32xf32, #tpu.memory_space<vmem>>, vector<128x32xf32>
    tpu.vector_store %arg4[%c0_48, %c0_49], %172 {strides = array<i32>} : memref<128x32xf32, #tpu.memory_space<vmem>>, vector<128x32xf32>,
    return
  }
  func.func @transform_0(%arg0: i32) -> (i32, i32) {
    %c0_i32 = arith.constant 0 : i32
    %c0_i32_0 = arith.constant 0 : i32
    return %arg0, %c0_i32 : i32, i32
  }
  func.func @transform_1(%arg0: i32) -> (i32, i32) {
    %c0_i32 = arith.constant 0 : i32
    %c0_i32_0 = arith.constant 0 : i32
    return %arg0, %c0_i32 : i32, i32
  }
  func.func @transform_2(%arg0: i32) -> (i32, i32) {
    %c0_i32 = arith.constant 0 : i32
    %c0_i32_0 = arith.constant 0 : i32
    %c0_i32_1 = arith.constant 0 : i32
    return %c0_i32, %c0_i32_0 : i32, i32
  }
  func.func @transform_3(%arg0: i32) -> (i32, i32) {
    %c0_i32 = arith.constant 0 : i32
    %c0_i32_0 = arith.constant 0 : i32
    return %arg0, %c0_i32 : i32, i32
  }
}

</mosaic_0001>

<bundles_post_ra>
// kernel: base_model_forward.1
= control target key start
LH: loop header
LB: loop body
LE: loop exit
PB: predicated region body
PF: predicated region fallthrough
CT: control target
= control target key end

     0   :  { %s3021_s12 = smov 0   ;;  %s5558_s0 = inlined_call_operand.vmem [shape: f32[256,8], index: 0, kind: input, shape index: {}]   ;;  %s5559_s1 = inlined_call_operand.vmem [shape: s32[256,10], index: 1, kind: input, shape index: {}]   ;;  %s5560_s2 = inlined_call_operand.vmem [shape: f32[64,40], index: 2, kind: input, shape index: {}]   ;;  %s5561_s3 = inlined_call_operand.vmem [shape: f32[256,32], index: 3, kind: output, shape index: {}]  }
   0x1 LB: > { %s2615_s13 = sadd.s32 4294967295, %s2987_s12   ;;  %p2619_p0 = scmp.ge.s32.totalorder %s2987_s12, 1  ;;  %s2987_s12 = sphi %s3021_s12, %s13_s12  }
   0x2   : > { %p149_p1 = scmp.lt.s32.totalorder %s2987_s12, 3 }
   0x4   : > { %p150_p2 = pnand %p2619_p0, %p149_p1 }
   0x6   : > { %153 = sbr.rel (%p150_p2) target bundleno = 1175 (0x497), region = 32 }
   0xd   : > { %s2620_s14 = sshll.u32 %s2615_s13, 4  ;;  %v2989_v0 = vmov 0  }
   0xe   : > { %2913 = vset.pattern.permute.xlu1 %v2989_v0  ;;  %2912 = vset.pattern.permute.xlu0 %v2989_v0  ;;  %p179_p3 = scmp.lt.s32.totalorder %s2620_s14, 31 }
  0x10   : > { %s6254_s14 = smov (!%p179_p3, %s2620_s14), 31 }
  0x11   : > { %s3031_s15 = sshll.u32 %s6254_s14, 3 }
  0x12   : > { %s3037_s18 = scalar_lea.vmem %s5559_s1, %s3031_s15  ;;  %s4308_s10 = scalar_lea.vmem %s5558_s0, %s3031_s15 }
  0x13   : > { %v198_v1 = vld [vmem:[%s3037_s18 + $0x10] sm:$0xff]  ;;  %v196_v2 = vld [vmem:[%s3037_s18] sm:$0xff]  ;;  %v199_v3 = vld [vmem:[%s3037_s18 + $0x18] sm:$0xff]  ;;  %s5473_s14 = scalar_lea.vmem %s5561_s3, %s3031_s15 }
  0x14   : > { %vm218_vm0 = vcmp.gt.s32.totalorder %v198_v1, 0  ;;  %vm214_vm1 = vcmp.gt.s32.totalorder %v196_v2, 0  ;;  %vm220_vm2 = vcmp.gt.s32.totalorder %v199_v3, 0  ;;  %v197_v4 = vld [vmem:[%s3037_s18 + $0x8] sm:$0xff]  ;;  %v200_v16 = vld [vmem:[%s3037_s18 + $0x20] sm:$0xff]  ;;  %v203_v22 = vld [vmem:[%s3037_s18 + $0x38] sm:$0xff] }
  0x15   : > { %v219_v5 = vsel %vm218_vm0, %v198_v1, 0  ;;  %v3044_v6 = vsel %vm218_vm0, 1, %v2989_v0  ;;  %v215_v7 = vsel %vm214_vm1, %v196_v2, 0  ;;  %v3047_v8 = vsel %vm214_vm1, 1, %v2989_v0  ;;  %v201_v11 = vld [vmem:[%s3037_s18 + $0x28] sm:$0xff]  ;;  %v202_v25 = vld [vmem:[%s3037_s18 + $0x30] sm:$0xff] }
  0x16   : > { %vm250_vm3 = vcmp.lt.s32.totalorder %v219_v5, 15  ;;  %vm246_vm4 = vcmp.lt.s32.totalorder %v215_v7, 15  ;;  %v221_v9 = vsel %vm220_vm2, %v199_v3, 0  ;;  %v3050_v10 = vsel %vm220_vm2, 1, %v2989_v0  ;;  %v205_v26 = vld [vmem:[%s3037_s18 + $0x48] sm:$0xff]  ;;  %v204_v39 = vld [vmem:[%s3037_s18 + $0x40] sm:$0xff] }
  0x17   : > { %v3053_v12 = vsel %vm250_vm3, %v219_v5, 15  ;;  %v3055_v13 = vsel %vm246_vm4, %v215_v7, 15  ;;  %vm252_vm5 = vcmp.lt.s32.totalorder %v221_v9, 15  ;;  %vm216_vm6 = vcmp.gt.s32.totalorder %v197_v4, 0  ;;  %v207_v40 = vld [vmem:[%s3037_s18 + $0x58] sm:$0xff]  ;;  %v206_v43 = vld [vmem:[%s3037_s18 + $0x50] sm:$0xff] }
  0x18   : > { %v280_v14 = vadd.s32 8, %v3053_v12  ;;  %v278_v15 = vadd.s32 8, %v3055_v13  ;;  %v3060_v17 = vsel %vm252_vm5, %v221_v9, 15  ;;  %v217_v18 = vsel %vm216_vm6, %v197_v4, 0  ;;  %v209_v44 = vld [vmem:[%s3037_s18 + $0x68] sm:$0xff]  ;;  %v208_v56 = vld [vmem:[%s3037_s18 + $0x60] sm:$0xff] }
  0x19   : > { %v3063_v19 = vsel %vm216_vm6, 1, %v2989_v0  ;;  %vm224_vm7 = vcmp.gt.s32.totalorder %v201_v11, 0  ;;  %v281_v20 = vadd.s32 8, %v3060_v17  ;;  %vm248_vm8 = vcmp.lt.s32.totalorder %v217_v18, 15  ;;  %v211_v63 = vld [vmem:[%s3037_s18 + $0x78] sm:$0xff]  ;;  %v210_v1 = vld [vmem:[%s3037_s18 + $0x70] sm:$0xff] }
  0x1a   : > { %301 = vperm.xlu1 %2913, %v280_v14   ;;  %295 = vperm.xlu0 %2912, %v278_v15   ;;  %v225_v21 = vsel %vm224_vm7, %v201_v11, 0  ;;  %v3067_v23 = vsel %vm248_vm8, %v217_v18, 15  ;;  %v3070_v24 = vsel %vm224_vm7, 1, %v2989_v0  ;;  %vm222_vm10 = vcmp.gt.s32.totalorder %v200_v16, 0 }
  0x1b   : > { %vm256_vm9 = vcmp.lt.s32.totalorder %v225_v21, 15  ;;  %v279_v27 = vadd.s32 8, %v3067_v23  ;;  %v223_v29 = vsel %vm222_vm10, %v200_v16, 0  ;;  %v3079_v31 = vsel %vm222_vm10, 1, %v2989_v0 }
  0x1c   : > { %v3075_v28 = vsel %vm256_vm9, %v225_v21, 15  ;;  %vm254_vm11 = vcmp.lt.s32.totalorder %v223_v29, 15  ;;  %vm228_vm12 = vcmp.gt.s32.totalorder %v203_v22, 0  ;;  %vm226_vm13 = vcmp.gt.s32.totalorder %v202_v25, 0 }
  0x1d   : > { %v283_v30 = vadd.s32 8, %v3075_v28  ;;  %v3081_v32 = vsel %vm254_vm11, %v223_v29, 15  ;;  %vm232_vm14 = vcmp.gt.s32.totalorder %v205_v26, 0  ;;  %v229_v34 = vsel %vm228_vm12, %v203_v22, 0 }
  0x1e   : > { %304 = vperm.xlu1 %2913, %v281_v20   ;;  %298 = vperm.xlu0 %2912, %v279_v27   ;;  %v282_v33 = vadd.s32 8, %v3081_v32  ;;  %v3085_v35 = vsel %vm228_vm12, 1, %v2989_v0  ;;  %vm260_vm15 = vcmp.lt.s32.totalorder %v229_v34, 15  ;;  %v227_v36 = vsel %vm226_vm13, %v202_v25, 0 }
  0x1f   : > { %v3088_v37 = vsel %vm226_vm13, 1, %v2989_v0  ;;  %v233_v38 = vsel %vm232_vm14, %v205_v26, 0  ;;  %v3092_v41 = vsel %vm260_vm15, %v229_v34, 15  ;;  %vm258_vm0 = vcmp.lt.s32.totalorder %v227_v36, 15 }
  0x20   : > { %vm264_vm1 = vcmp.lt.s32.totalorder %v233_v38, 15  ;;  %v3095_v42 = vsel %vm232_vm14, 1, %v2989_v0  ;;  %v285_v45 = vadd.s32 8, %v3092_v41  ;;  %v3100_v46 = vsel %vm258_vm0, %v227_v36, 15 }
  0x21   : > { %v3102_v47 = vsel %vm264_vm1, %v233_v38, 15  ;;  %v284_v48 = vadd.s32 8, %v3100_v46  ;;  %vm230_vm2 = vcmp.gt.s32.totalorder %v204_v39, 0  ;;  %vm236_vm3 = vcmp.gt.s32.totalorder %v207_v40, 0 }
  0x22   : > { %310 = vperm.xlu1 %2913, %v283_v30   ;;  %307 = vperm.xlu0 %2912, %v282_v33   ;;  %v287_v49 = vadd.s32 8, %v3102_v47  ;;  %vm234_vm4 = vcmp.gt.s32.totalorder %v206_v43, 0  ;;  %vm240_vm5 = vcmp.gt.s32.totalorder %v209_v44, 0  ;;  %v231_v50 = vsel %vm230_vm2, %v204_v39, 0 }
  0x23   : > { %v3107_v51 = vsel %vm230_vm2, 1, %v2989_v0  ;;  %v237_v52 = vsel %vm236_vm3, %v207_v40, 0  ;;  %v3110_v53 = vsel %vm236_vm3, 1, %v2989_v0  ;;  %vm262_vm6 = vcmp.lt.s32.totalorder %v231_v50, 15 }
  0x24   : > { %vm268_vm7 = vcmp.lt.s32.totalorder %v237_v52, 15  ;;  %v235_v54 = vsel %vm234_vm4, %v206_v43, 0  ;;  %v3113_v55 = vsel %vm234_vm4, 1, %v2989_v0  ;;  %v3116_v57 = vsel %vm262_vm6, %v231_v50, 15 }
  0x25   : > { %v3118_v58 = vsel %vm268_vm7, %v237_v52, 15  ;;  %vm266_vm8 = vcmp.lt.s32.totalorder %v235_v54, 15  ;;  %v241_v59 = vsel %vm240_vm5, %v209_v44, 0  ;;  %v286_v60 = vadd.s32 8, %v3116_v57 }
  0x26   : > { %316 = vperm.xlu1 %2913, %v285_v45   ;;  %313 = vperm.xlu0 %2912, %v284_v48   ;;  %v3122_v61 = vsel %vm266_vm8, %v235_v54, 15  ;;  %vm272_vm9 = vcmp.lt.s32.totalorder %v241_v59, 15  ;;  %v3126_v62 = vsel %vm240_vm5, 1, %v2989_v0  ;;  %vm238_vm10 = vcmp.gt.s32.totalorder %v208_v56, 0 }
  0x27   : > { %v289_v2 = vadd.s32 8, %v3118_v58  ;;  %v288_v3 = vadd.s32 8, %v3122_v61  ;;  %v3132_v4 = vsel %vm272_vm9, %v241_v59, 15  ;;  %v239_v5 = vsel %vm238_vm10, %v208_v56, 0 }
  0x28   : > { %vm270_vm11 = vcmp.lt.s32.totalorder %v239_v5, 15  ;;  %v3135_v7 = vsel %vm238_vm10, 1, %v2989_v0  ;;  %vm244_vm12 = vcmp.gt.s32.totalorder %v211_v63, 0  ;;  %vm242_vm13 = vcmp.gt.s32.totalorder %v210_v1, 0 }
  0x29   : > { %v3137_v9 = vsel %vm270_vm11, %v239_v5, 15  ;;  %v291_v11 = vadd.s32 8, %v3132_v4  ;;  %v245_v14 = vsel %vm244_vm12, %v211_v63, 0  ;;  %v3141_v15 = vsel %vm244_vm12, 1, %v2989_v0 }
  0x2a   : > { %322 = vperm.xlu1 %2913, %v287_v49   ;;  %319 = vperm.xlu0 %2912, %v286_v60   ;;  %v290_v16 = vadd.s32 8, %v3137_v9  ;;  %vm276_vm14 = vcmp.lt.s32.totalorder %v245_v14, 15  ;;  %v243_v18 = vsel %vm242_vm13, %v210_v1, 0  ;;  %v3145_v20 = vsel %vm242_vm13, 1, %v2989_v0 }
  0x2b   : > { %5670 = vst [vmem:[#allocation3_spill] sm:$0xff] %v3145_v20  ;;  %v3147_v21 = vsel %vm276_vm14, %v245_v14, 15  ;;  %vm274_vm15 = vcmp.lt.s32.totalorder %v243_v18, 15  ;;  %v391_v27 = vadd.s32 24, %v3067_v23  ;;  %v390_v29 = vadd.s32 24, %v3055_v13 }
  0x2c   : > { %v3149_v22 = vsel %vm274_vm15, %v243_v18, 15  ;;  %v293_v25 = vadd.s32 8, %v3147_v21  ;;  %v2990_v30 = vmov 1   ;;  %v392_v0 = vadd.s32 24, %v3053_v12 }
  0x2d   : > { %v292_v26 = vadd.s32 8, %v3149_v22  ;;  %v393_v33 = vadd.s32 24, %v3060_v17  ;;  %v394_v34 = vadd.s32 24, %v3081_v32  ;;  %v395_v36 = vadd.s32 24, %v3075_v28 }
  0x2e   : > { %328 = vperm.xlu1 %2913, %v289_v2   ;;  %325 = vperm.xlu0 %2912, %v288_v3   ;;  %v396_v38 = vadd.s32 24, %v3100_v46  ;;  %v397_v39 = vadd.s32 24, %v3092_v41  ;;  %v398_v40 = vadd.s32 24, %v3116_v57  ;;  %v399_v43 = vadd.s32 24, %v3102_v47 }
  0x2f   : > { %v400_v44 = vadd.s32 24, %v3122_v61  ;;  %v401_v45 = vadd.s32 24, %v3118_v58  ;;  %v402_v48 = vadd.s32 24, %v3137_v9  ;;  %v403_v49 = vadd.s32 24, %v3132_v4 }
  0x30   : > { %v404_v50 = vadd.s32 24, %v3149_v22  ;;  %v405_v52 = vadd.s32 24, %v3147_v21  ;;  %v3170_v54 = vadd.s32 40, %v3055_v13  ;;  %v3173_v56 = vadd.s32 40, %v3067_v23 }
  0x31   : > { %v2991_v59 = vmov 2   ;;  %v3176_v60 = vadd.s32 40, %v3053_v12  ;;  %v3179_v63 = vadd.s32 40, %v3081_v32  ;;  %v3184_v1 = vadd.s32 40, %v3060_v17 }
  0x32   : > { %334 = vperm.xlu1 %2913, %v291_v11   ;;  %331 = vperm.xlu0 %2912, %v290_v16   ;;  %v3187_v13 = vadd.s32 40, %v3100_v46  ;;  %v3192_v12 = vadd.s32 40, %v3075_v28  ;;  %v3195_v23 = vadd.s32 40, %v3116_v57  ;;  %v3200_v17 = vadd.s32 40, %v3092_v41 }
  0x33   : > { %v3203_v32 = vadd.s32 40, %v3122_v61  ;;  %v3208_v28 = vadd.s32 40, %v3102_v47  ;;  %v3211_v46 = vadd.s32 40, %v3137_v9  ;;  %v3216_v41 = vadd.s32 40, %v3118_v58 }
  0x34   : > { %5671 = vst [vmem:[#allocation4_spill] sm:$0xff] %v3187_v13  ;;  %v3219_v57 = vadd.s32 40, %v3149_v22  ;;  %v3224_v47 = vadd.s32 40, %v3132_v4  ;;  %v3229_v61 = vadd.s32 40, %v3147_v21  ;;  %v2992_v58 = vmov 3  }
  0x36   : > { %340 = vperm.xlu1 %2913, %v293_v25   ;;  %337 = vperm.xlu0 %2912, %v292_v26  }
  0x3a   : > { %2915 = vset.pattern.permute.xlu1 %v2990_v30  ;;  %2914 = vset.pattern.permute.xlu0 %v2990_v30 }
  0x3b   : > { %410 = vperm.xlu1 %2915, %v391_v27   ;;  %407 = vperm.xlu0 %2914, %v390_v29  }
  0x3f   : > { %413 = vperm.xlu1 %2915, %v392_v0   ;;  %416 = vperm.xlu0 %2914, %v393_v33  }
  0x43   : > { %419 = vperm.xlu1 %2915, %v394_v34   ;;  %422 = vperm.xlu0 %2914, %v395_v36  }
  0x47   : > { %425 = vperm.xlu1 %2915, %v396_v38   ;;  %428 = vperm.xlu0 %2914, %v397_v39  }
  0x4b   : > { %431 = vperm.xlu1 %2915, %v398_v40   ;;  %434 = vperm.xlu0 %2914, %v399_v43  }
  0x4f   : > { %437 = vperm.xlu1 %2915, %v400_v44   ;;  %440 = vperm.xlu0 %2914, %v401_v45  }
  0x53   : > { %443 = vperm.xlu1 %2915, %v402_v48   ;;  %446 = vperm.xlu0 %2914, %v403_v49  }
  0x57   : > { %449 = vperm.xlu1 %2915, %v404_v50   ;;  %452 = vperm.xlu0 %2914, %v405_v52  }
  0x5b   : > { %2916 = vset.pattern.permute.xlu1 %v2991_v59  ;;  %2917 = vset.pattern.permute.xlu0 %v2991_v59 }
  0x5c   : > { %551 = vperm.xlu1 %2916, %v3170_v54   ;;  %554 = vperm.xlu0 %2917, %v3173_v56  }
  0x60   : > { %557 = vperm.xlu1 %2916, %v3176_v60   ;;  %563 = vperm.xlu0 %2917, %v3179_v63  }
  0x64   : > { %560 = vperm.xlu1 %2916, %v3184_v1   ;;  %569 = vperm.xlu0 %2917, %v3187_v13  }
  0x68   : > { %566 = vperm.xlu1 %2916, %v3192_v12   ;;  %575 = vperm.xlu0 %2917, %v3195_v23  }
  0x6c   : > { %572 = vperm.xlu1 %2916, %v3200_v17   ;;  %581 = vperm.xlu0 %2917, %v3203_v32  }
  0x70   : > { %578 = vperm.xlu1 %2916, %v3208_v28   ;;  %587 = vperm.xlu0 %2917, %v3211_v46  }
  0x74   : > { %584 = vperm.xlu1 %2916, %v3216_v41   ;;  %593 = vperm.xlu0 %2917, %v3219_v57  }
  0x78   : > { %590 = vperm.xlu1 %2916, %v3224_v47   ;;  %631 = vperm.xlu0 %2917, %v3047_v8  }
  0x7c   : > { %596 = vperm.xlu1 %2916, %v3229_v61   ;;  %637 = vperm.xlu0 %2917, %v3044_v6  }
  0x80   : > { %634 = vperm.xlu1 %2916, %v3063_v19   ;;  %643 = vperm.xlu0 %2917, %v3079_v31  }
  0x84   : > { %640 = vperm.xlu1 %2916, %v3050_v10   ;;  %649 = vperm.xlu0 %2917, %v3088_v37  }
  0x88   : > { %646 = vperm.xlu1 %2916, %v3070_v24   ;;  %655 = vperm.xlu0 %2917, %v3107_v51  }
  0x8c   : > { %652 = vperm.xlu1 %2916, %v3085_v35   ;;  %661 = vperm.xlu0 %2917, %v3113_v55  }
  0x90   : > { %658 = vperm.xlu1 %2916, %v3095_v42   ;;  %667 = vperm.xlu0 %2917, %v3135_v7  }
  0x94   : > { %664 = vperm.xlu1 %2916, %v3110_v53   ;;  %673 = vperm.xlu0 %2917, %v3145_v20  }
  0x98   : > { %670 = vperm.xlu1 %2916, %v3126_v62   ;;  %2918 = vset.pattern.permute.xlu0 %v2992_v58 }
  0x99   : > { %v3248_v2 = vpop.permute.xlu1 %301  ;;  %759 = vperm.xlu0 %2918, %v3170_v54   ;;  %v3251_v3 = vpop.permute.xlu0 %295 }
  0x9a   : > { %5672 = vst [vmem:[#allocation5_spill] sm:$0xff] %v3248_v2 }
  0x9c   : > { %676 = vperm.xlu1 %2916, %v3141_v15  }
  0x9d   : > { %v3254_v4 = vpop.permute.xlu1 %304  ;;  %768 = vperm.xlu0 %2918, %v3184_v1   ;;  %v3257_v5 = vpop.permute.xlu0 %298 }
  0xa0   : > { %2919 = vset.pattern.permute.xlu1 %v2992_v58 }
  0xa1   : > { %v3259_v9 = vpop.permute.xlu1 %310  ;;  %762 = vperm.xlu1 %2919, %v3173_v56   ;;  %774 = vperm.xlu0 %2918, %v3192_v12   ;;  %v3263_v11 = vpop.permute.xlu0 %307 }
  0xa2   : > { %5673 = vst [vmem:[#allocation6_spill] sm:$0xff] %v3259_v9  ;;  %5674 = vst [vmem:[#allocation7_spill] sm:$0xff] %v3263_v11 }
  0xa5   : > { %v3265_v14 = vpop.permute.xlu1 %316  ;;  %765 = vperm.xlu1 %2919, %v3176_v60   ;;  %780 = vperm.xlu0 %2918, %v3200_v17   ;;  %v3269_v16 = vpop.permute.xlu0 %313 }
  0xa6   : > { %5675 = vst [vmem:[#allocation8_spill] sm:$0xff] %v3265_v14  ;;  %5676 = vst [vmem:[#allocation9_spill] sm:$0xff] %v3269_v16 }
  0xa9   : > { %v3271_v18 = vpop.permute.xlu1 %322  ;;  %771 = vperm.xlu1 %2919, %v3179_v63   ;;  %786 = vperm.xlu0 %2918, %v3208_v28   ;;  %v3275_v21 = vpop.permute.xlu0 %319 }
  0xad   : > { %v3277_v22 = vpop.permute.xlu1 %328  ;;  %777 = vperm.xlu1 %2919, %v3187_v13   ;;  %792 = vperm.xlu0 %2918, %v3216_v41   ;;  %v3281_v25 = vpop.permute.xlu0 %325 }
  0xae   : > { %5677 = vst [vmem:[#allocation10_spill] sm:$0xff] %v3277_v22 }
  0xb1   : > { %v3283_v26 = vpop.permute.xlu1 %334  ;;  %783 = vperm.xlu1 %2919, %v3195_v23   ;;  %798 = vperm.xlu0 %2918, %v3224_v47   ;;  %v3287_v27 = vpop.permute.xlu0 %331 }
  0xb2   : > { %5678 = vst [vmem:[#allocation11_spill] sm:$0xff] %v3283_v26  ;;  %5679 = vst [vmem:[#allocation12_spill] sm:$0xff] %v3287_v27 }
  0xb5   : > { %v3289_v29 = vpop.permute.xlu1 %340  ;;  %789 = vperm.xlu1 %2919, %v3203_v32   ;;  %804 = vperm.xlu0 %2918, %v3229_v61   ;;  %v3293_v30 = vpop.permute.xlu0 %337 }
  0xb6   : > { %5680 = vst [vmem:[#allocation13_spill] sm:$0xff] %v3289_v29  ;;  %v2993_v29 = vmov 4  }
  0xb9   : > { %795 = vperm.xlu1 %2919, %v3211_v46   ;;  %826 = vperm.xlu0 %2918, %v3063_v19  }
  0xba   : > { %v3297_v0 = vpop.permute.xlu1 %410  ;;  %v3299_v33 = vpop.permute.xlu0 %407 }
  0xbd   : > { %801 = vperm.xlu1 %2919, %v3219_v57   ;;  %832 = vperm.xlu0 %2918, %v3050_v10  }
  0xbe   : > { %v3303_v34 = vpop.permute.xlu1 %413  ;;  %v3305_v36 = vpop.permute.xlu0 %416 }
  0xbf   : > { %5681 = vst [vmem:[#allocation14_spill] sm:$0xff] %v3303_v34  ;;  %5682 = vst [vmem:[#allocation15_spill] sm:$0xff] %v3305_v36 }
  0xc1   : > { %823 = vperm.xlu1 %2919, %v3047_v8   ;;  %838 = vperm.xlu0 %2918, %v3070_v24  }
  0xc2   : > { %v3309_v38 = vpop.permute.xlu1 %419  ;;  %v3311_v39 = vpop.permute.xlu0 %422 }
  0xc3   : > { %5683 = vst [vmem:[#allocation16_spill] sm:$0xff] %v3309_v38  ;;  %5684 = vst [vmem:[#allocation17_spill] sm:$0xff] %v3311_v39 }
  0xc5   : > { %829 = vperm.xlu1 %2919, %v3044_v6   ;;  %844 = vperm.xlu0 %2918, %v3085_v35  }
  0xc6   : > { %v3315_v40 = vpop.permute.xlu1 %425  ;;  %v3317_v43 = vpop.permute.xlu0 %428 }
  0xc7   : > { %5685 = vst [vmem:[#allocation18_spill] sm:$0xff] %v3315_v40  ;;  %5686 = vst [vmem:[#allocation19_spill] sm:$0xff] %v3317_v43 }
  0xc9   : > { %835 = vperm.xlu1 %2919, %v3079_v31   ;;  %850 = vperm.xlu0 %2918, %v3095_v42  }
  0xca   : > { %v3321_v44 = vpop.permute.xlu1 %431  ;;  %v3323_v45 = vpop.permute.xlu0 %434 }
  0xcb   : > { %5687 = vst [vmem:[#allocation20_spill] sm:$0xff] %v3323_v45 }
  0xcd   : > { %841 = vperm.xlu1 %2919, %v3088_v37   ;;  %856 = vperm.xlu0 %2918, %v3110_v53  }
  0xce   : > { %v3327_v48 = vpop.permute.xlu1 %437  ;;  %v3329_v49 = vpop.permute.xlu0 %440 }
  0xcf   : > { %5688 = vst [vmem:[#allocation21_spill] sm:$0xff] %v3327_v48  ;;  %5689 = vst [vmem:[#allocation22_spill] sm:$0xff] %v3329_v49 }
  0xd1   : > { %847 = vperm.xlu1 %2919, %v3107_v51   ;;  %862 = vperm.xlu0 %2918, %v3126_v62  }
  0xd2   : > { %v3333_v50 = vpop.permute.xlu1 %443  ;;  %v3335_v52 = vpop.permute.xlu0 %446 }
  0xd3   : > { %5690 = vst [vmem:[#allocation23_spill] sm:$0xff] %v3333_v50  ;;  %5691 = vst [vmem:[#allocation24_spill] sm:$0xff] %v3335_v52 }
  0xd5   : > { %853 = vperm.xlu1 %2919, %v3113_v55   ;;  %868 = vperm.xlu0 %2918, %v3141_v15  }
  0xd6   : > { %v3339_v59 = vpop.permute.xlu1 %449  ;;  %v3341_v58 = vpop.permute.xlu0 %452 }
  0xd7   : > { %5692 = vst [vmem:[#allocation25_spill] sm:$0xff] %v3341_v58 }
  0xd9   : > { %859 = vperm.xlu1 %2919, %v3135_v7   ;;  %2921 = vset.pattern.permute.xlu0 %v2993_v29 }
  0xda   : > { %954 = vperm.xlu0 %2921, %v3173_v56  }
  0xdb   : > { %v3345_v40 = vpop.permute.xlu1 %551  ;;  %v3347_v16 = vpop.permute.xlu0 %554 }
  0xdc   : > { %5693 = vst [vmem:[#allocation26_spill] sm:$0xff] %v3345_v40  ;;  %5694 = vst [vmem:[#allocation27_spill] sm:$0xff] %v3347_v16 }
  0xdd   : > { %865 = vperm.xlu1 %2919, %v3145_v20  }
  0xde   : > { %963 = vperm.xlu0 %2921, %v3179_v63  }
  0xdf   : > { %v3351_v43 = vpop.permute.xlu1 %557  ;;  %v3353_v14 = vpop.permute.xlu0 %563 }
  0xe0   : > { %5695 = vst [vmem:[#allocation28_spill] sm:$0xff] %v3351_v43  ;;  %5696 = vst [vmem:[#allocation29_spill] sm:$0xff] %v3353_v14 }
  0xe1   : > { %2920 = vset.pattern.permute.xlu1 %v2993_v29 }
  0xe2   : > { %951 = vperm.xlu1 %2920, %v3170_v54   ;;  %969 = vperm.xlu0 %2921, %v3187_v13  }
  0xe3   : > { %v3357_v58 = vpop.permute.xlu1 %560  ;;  %v3359_v39 = vpop.permute.xlu0 %569 }
  0xe4   : > { %5697 = vst [vmem:[#allocation30_spill] sm:$0xff] %v3357_v58  ;;  %5698 = vst [vmem:[#allocation31_spill] sm:$0xff] %v3359_v39 }
  0xe6   : > { %957 = vperm.xlu1 %2920, %v3176_v60   ;;  %975 = vperm.xlu0 %2921, %v3195_v23  }
  0xe7   : > { %v3363_v9 = vpop.permute.xlu1 %566  ;;  %v3365_v50 = vpop.permute.xlu0 %575 }
  0xe8   : > { %5699 = vst [vmem:[#allocation32_spill] sm:$0xff] %v3363_v9 }
  0xea   : > { %960 = vperm.xlu1 %2920, %v3184_v1   ;;  %981 = vperm.xlu0 %2921, %v3203_v32  }
  0xeb   : > { %v3369_v29 = vpop.permute.xlu1 %572  ;;  %v3371_v14 = vpop.permute.xlu0 %581 }
  0xec   : > { %5700 = vst [vmem:[#allocation33_spill] sm:$0xff] %v3369_v29  ;;  %5701 = vst [vmem:[#allocation34_spill] sm:$0xff] %v3371_v14 }
  0xee   : > { %966 = vperm.xlu1 %2920, %v3192_v12   ;;  %987 = vperm.xlu0 %2921, %v3211_v46  }
  0xef   : > { %v3375_v39 = vpop.permute.xlu1 %578  ;;  %v3377_v49 = vpop.permute.xlu0 %587 }
  0xf0   : > { %5702 = vst [vmem:[#allocation35_spill] sm:$0xff] %v3375_v39  ;;  %5703 = vst [vmem:[#allocation36_spill] sm:$0xff] %v3377_v49 }
  0xf2   : > { %972 = vperm.xlu1 %2920, %v3200_v17   ;;  %993 = vperm.xlu0 %2921, %v3219_v57  }
  0xf3   : > { %v3381_v9 = vpop.permute.xlu1 %584  ;;  %v3383_v52 = vpop.permute.xlu0 %593 }
  0xf4   : > { %5704 = vst [vmem:[#allocation37_spill] sm:$0xff] %v3381_v9 }
  0xf6   : > { %978 = vperm.xlu1 %2920, %v3208_v28   ;;  %1015 = vperm.xlu0 %2921, %v3047_v8  }
  0xf7   : > { %v3387_v29 = vpop.permute.xlu1 %590  ;;  %v3389_v27 = vpop.permute.xlu0 %631 }
  0xf8   : > { %5705 = vst [vmem:[#allocation38_spill] sm:$0xff] %v3387_v29 }
  0xfa   : > { %984 = vperm.xlu1 %2920, %v3216_v41   ;;  %1021 = vperm.xlu0 %2921, %v3044_v6  }
  0xfb   : > { %v3393_v49 = vpop.permute.xlu1 %596  ;;  %v3395_v38 = vpop.permute.xlu0 %637 }
  0xfc   : > { %5706 = vst [vmem:[#allocation39_spill] sm:$0xff] %v3393_v49  ;;  %5707 = vst [vmem:[#allocation40_spill] sm:$0xff] %v3395_v38 }
  0xfe   : > { %990 = vperm.xlu1 %2920, %v3224_v47   ;;  %1027 = vperm.xlu0 %2921, %v3079_v31  }
  0xff   : > { %v3399_v9 = vpop.permute.xlu1 %634  ;;  %v3401_v26 = vpop.permute.xlu0 %643 }
 0x100   : > { %5708 = vst [vmem:[#allocation41_spill] sm:$0xff] %v3399_v9  ;;  %5709 = vst [vmem:[#allocation42_spill] sm:$0xff] %v3401_v26 }
 0x102   : > { %996 = vperm.xlu1 %2920, %v3229_v61   ;;  %1033 = vperm.xlu0 %2921, %v3088_v37  }
 0x103   : > { %v3405_v29 = vpop.permute.xlu1 %640  ;;  %v3407_v22 = vpop.permute.xlu0 %649 }
 0x104   : > { %5710 = vst [vmem:[#allocation43_spill] sm:$0xff] %v3407_v22 }
 0x106   : > { %1018 = vperm.xlu1 %2920, %v3063_v19   ;;  %1039 = vperm.xlu0 %2921, %v3107_v51  }
 0x107   : > { %v3411_v49 = vpop.permute.xlu1 %646  ;;  %v3413_v11 = vpop.permute.xlu0 %655 }
 0x108   : > { %5711 = vst [vmem:[#allocation44_spill] sm:$0xff] %v3411_v49 }
 0x10a   : > { %1024 = vperm.xlu1 %2920, %v3050_v10   ;;  %1045 = vperm.xlu0 %2921, %v3113_v55  }
 0x10b   : > { %v3417_v26 = vpop.permute.xlu1 %652  ;;  %v3419_v2 = vpop.permute.xlu0 %661 }
 0x10c   : > { %5712 = vst [vmem:[#allocation45_spill] sm:$0xff] %v3417_v26  ;;  %5713 = vst [vmem:[#allocation46_spill] sm:$0xff] %v3419_v2  ;;  %v2994_v26 = vmov 5  }
 0x10e   : > { %1030 = vperm.xlu1 %2920, %v3070_v24   ;;  %1051 = vperm.xlu0 %2921, %v3135_v7  }
 0x10f   : > { %v3423_v22 = vpop.permute.xlu1 %658  ;;  %v3425_v43 = vpop.permute.xlu0 %667 }
 0x110   : > { %5714 = vst [vmem:[#allocation47_spill] sm:$0xff] %v3423_v22  ;;  %5715 = vst [vmem:[#allocation48_spill] sm:$0xff] %v3425_v43 }
 0x112   : > { %1036 = vperm.xlu1 %2920, %v3085_v35   ;;  %1057 = vperm.xlu0 %2921, %v3145_v20  }
 0x113   : > { %v3429_v49 = vpop.permute.xlu1 %664  ;;  %v3431_v34 = vpop.permute.xlu0 %673 }
 0x114   : > { %5716 = vst [vmem:[#allocation49_spill] sm:$0xff] %v3429_v49  ;;  %vm692_vm5 = vcmp.eq.s32.totalorder %v3431_v34, 1 }
 0x116   : > { %1042 = vperm.xlu1 %2920, %v3095_v42   ;;  %2922 = vset.pattern.permute.xlu0 %v2994_v26 }
 0x117   : > { %v3434_v38 = vpop.permute.xlu1 %670  ;;  %1143 = vperm.xlu0 %2922, %v3170_v54  }
 0x118   : > { %5717 = vst [vmem:[#allocation50_spill] sm:$0xff] %v3434_v38  ;;  %v3437_v2 = vpop.permute.xlu0 %759 }
 0x119   : > { %5718 = vst [vmem:[#allocation51_spill] sm:$0xff] %v3437_v2 }
 0x11a   : > { %1048 = vperm.xlu1 %2920, %v3110_v53  }
 0x11b   : > { %v3440_v43 = vpop.permute.xlu1 %676  ;;  %1152 = vperm.xlu0 %2922, %v3184_v1  }
 0x11c   : > { %5719 = vst [vmem:[#allocation52_spill] sm:$0xff] %v3440_v43  ;;  %v3443_v9 = vpop.permute.xlu0 %768 }
 0x11d   : > { %5720 = vst [vmem:[#allocation53_spill] sm:$0xff] %v3443_v9 }
 0x11e   : > { %1054 = vperm.xlu1 %2920, %v3126_v62  }
 0x11f   : > { %1158 = vperm.xlu0 %2922, %v3192_v12  }
 0x120   : > { %v3447_v49 = vpop.permute.xlu1 %762  ;;  %v3449_v14 = vpop.permute.xlu0 %774 }
 0x121   : > { %5721 = vst [vmem:[#allocation54_spill] sm:$0xff] %v3447_v49  ;;  %5722 = vst [vmem:[#allocation55_spill] sm:$0xff] %v3449_v14 }
 0x122   : > { %1060 = vperm.xlu1 %2920, %v3141_v15  }
 0x123   : > { %1164 = vperm.xlu0 %2922, %v3200_v17  }
 0x124   : > { %v3453_v38 = vpop.permute.xlu1 %765  ;;  %v3455_v2 = vpop.permute.xlu0 %780 }
 0x125   : > { %5723 = vst [vmem:[#allocation56_spill] sm:$0xff] %v3453_v38  ;;  %5724 = vst [vmem:[#allocation57_spill] sm:$0xff] %v3455_v2 }
 0x126   : > { %2923 = vset.pattern.permute.xlu1 %v2994_v26 }
 0x127   : > { %1146 = vperm.xlu1 %2923, %v3173_v56   ;;  %1170 = vperm.xlu0 %2922, %v3208_v28  }
 0x128   : > { %v3459_v43 = vpop.permute.xlu1 %771  ;;  %v3461_v16 = vpop.permute.xlu0 %786 }
 0x129   : > { %5725 = vst [vmem:[#allocation58_spill] sm:$0xff] %v3459_v43  ;;  %5726 = vst [vmem:[#allocation59_spill] sm:$0xff] %v3461_v16 }
 0x12b   : > { %1149 = vperm.xlu1 %2923, %v3176_v60   ;;  %1176 = vperm.xlu0 %2922, %v3216_v41  }
 0x12c   : > { %v3465_v14 = vpop.permute.xlu1 %777  ;;  %v3467_v49 = vpop.permute.xlu0 %792 }
 0x12d   : > { %5727 = vst [vmem:[#allocation60_spill] sm:$0xff] %v3465_v14  ;;  %5728 = vst [vmem:[#allocation61_spill] sm:$0xff] %v3467_v49 }
 0x12f   : > { %1155 = vperm.xlu1 %2923, %v3179_v63   ;;  %1182 = vperm.xlu0 %2922, %v3224_v47  }
 0x130   : > { %v3471_v26 = vpop.permute.xlu1 %783  ;;  %v3473_v2 = vpop.permute.xlu0 %798 }
 0x131   : > { %5729 = vst [vmem:[#allocation62_spill] sm:$0xff] %v3471_v26  ;;  %5730 = vst [vmem:[#allocation63_spill] sm:$0xff] %v3473_v2 }
 0x133   : > { %1161 = vperm.xlu1 %2923, %v3187_v13   ;;  %1188 = vperm.xlu0 %2922, %v3229_v61  }
 0x134   : > { %v3477_v43 = vpop.permute.xlu1 %789  ;;  %v3479_v38 = vpop.permute.xlu0 %804 }
 0x135   : > { %5731 = vst [vmem:[#allocation64_spill] sm:$0xff] %v3477_v43  ;;  %5732 = vst [vmem:[#allocation65_spill] sm:$0xff] %v3479_v38 }
 0x137   : > { %1167 = vperm.xlu1 %2923, %v3195_v23   ;;  %1210 = vperm.xlu0 %2922, %v3063_v19  }
 0x138   : > { %v3483_v14 = vpop.permute.xlu1 %795  ;;  %v3485_v49 = vpop.permute.xlu0 %826 }
 0x139   : > { %5733 = vst [vmem:[#allocation66_spill] sm:$0xff] %v3483_v14  ;;  %5734 = vst [vmem:[#allocation67_spill] sm:$0xff] %v3485_v49 }
 0x13b   : > { %1173 = vperm.xlu1 %2923, %v3203_v32   ;;  %1216 = vperm.xlu0 %2922, %v3050_v10  }
 0x13c   : > { %v3489_v2 = vpop.permute.xlu1 %801  ;;  %v3491_v16 = vpop.permute.xlu0 %832 }
 0x13d   : > { %5735 = vst [vmem:[#allocation68_spill] sm:$0xff] %v3491_v16 }
 0x13f   : > { %1179 = vperm.xlu1 %2923, %v3211_v46   ;;  %1222 = vperm.xlu0 %2922, %v3070_v24  }
 0x140   : > { %v3495_v38 = vpop.permute.xlu1 %823  ;;  %v3497_v43 = vpop.permute.xlu0 %838 }
 0x141   : > { %5736 = vst [vmem:[#allocation69_spill] sm:$0xff] %v3495_v38  ;;  %5737 = vst [vmem:[#allocation70_spill] sm:$0xff] %v3497_v43 }
 0x143   : > { %1185 = vperm.xlu1 %2923, %v3219_v57   ;;  %1228 = vperm.xlu0 %2922, %v3085_v35  }
 0x144   : > { %v3501_v14 = vpop.permute.xlu1 %829  ;;  %v3503_v49 = vpop.permute.xlu0 %844 }
 0x145   : > { %5738 = vst [vmem:[#allocation71_spill] sm:$0xff] %v3501_v14  ;;  %5739 = vst [vmem:[#allocation72_spill] sm:$0xff] %v3503_v49 }
 0x147   : > { %1207 = vperm.xlu1 %2923, %v3047_v8   ;;  %1234 = vperm.xlu0 %2922, %v3095_v42  }
 0x148   : > { %v3507_v16 = vpop.permute.xlu1 %835  ;;  %v3509_v9 = vpop.permute.xlu0 %850 }
 0x149   : > { %5740 = vst [vmem:[#allocation73_spill] sm:$0xff] %v3507_v16  ;;  %5741 = vst [vmem:[#allocation74_spill] sm:$0xff] %v3509_v9 }
 0x14b   : > { %1213 = vperm.xlu1 %2923, %v3044_v6   ;;  %1240 = vperm.xlu0 %2922, %v3110_v53  }
 0x14c   : > { %v3513_v43 = vpop.permute.xlu1 %841  ;;  %v3515_v38 = vpop.permute.xlu0 %856 }
 0x14d   : > { %5742 = vst [vmem:[#allocation75_spill] sm:$0xff] %v3513_v43  ;;  %5743 = vst [vmem:[#allocation76_spill] sm:$0xff] %v3515_v38  ;;  %v2995_v43 = vmov 6  }
 0x14f   : > { %1219 = vperm.xlu1 %2923, %v3079_v31   ;;  %1246 = vperm.xlu0 %2922, %v3126_v62  }
 0x150   : > { %v3519_v49 = vpop.permute.xlu1 %847  ;;  %v3521_v14 = vpop.permute.xlu0 %862 }
 0x151   : > { %5744 = vst [vmem:[#allocation77_spill] sm:$0xff] %v3521_v14 }
 0x153   : > { %1225 = vperm.xlu1 %2923, %v3088_v37   ;;  %1252 = vperm.xlu0 %2922, %v3141_v15  }
 0x154   : > { %v3525_v16 = vpop.permute.xlu1 %853  ;;  %v3527_v9 = vpop.permute.xlu0 %868 }
 0x155   : > { %5745 = vst [vmem:[#allocation78_spill] sm:$0xff] %v3525_v16  ;;  %5746 = vst [vmem:[#allocation79_spill] sm:$0xff] %v3527_v9 }
 0x157   : > { %1231 = vperm.xlu1 %2923, %v3107_v51   ;;  %2925 = vset.pattern.permute.xlu0 %v2995_v43 }
 0x158   : > { %v3530_v38 = vpop.permute.xlu1 %859  ;;  %1338 = vperm.xlu0 %2925, %v3173_v56  }
 0x159   : > { %5747 = vst [vmem:[#allocation80_spill] sm:$0xff] %v3530_v38  ;;  %v3533_v48 = vpop.permute.xlu0 %954 }
 0x15a   : > { %5748 = vst [vmem:[#allocation81_spill] sm:$0xff] %v3533_v48 }
 0x15b   : > { %1237 = vperm.xlu1 %2923, %v3113_v55  }
 0x15c   : > { %v3536_v14 = vpop.permute.xlu1 %865  ;;  %1347 = vperm.xlu0 %2925, %v3179_v63  }
 0x15d   : > { %v3539_v39 = vpop.permute.xlu0 %963  ;;  %vm884_vm7 = vcmp.eq.s32.totalorder %v3536_v14, 1 }
 0x15e   : > { %5749 = vst [vmem:[#allocation82_spill] sm:$0xff] %v3539_v39 }
 0x15f   : > { %1243 = vperm.xlu1 %2923, %v3135_v7  }
 0x160   : > { %1353 = vperm.xlu0 %2925, %v3187_v13  }
 0x161   : > { %v3543_v9 = vpop.permute.xlu1 %951  ;;  %v3545_v16 = vpop.permute.xlu0 %969 }
 0x162   : > { %5750 = vst [vmem:[#allocation83_spill] sm:$0xff] %v3543_v9  ;;  %5751 = vst [vmem:[#allocation84_spill] sm:$0xff] %v3545_v16 }
 0x163   : > { %1249 = vperm.xlu1 %2923, %v3145_v20  }
 0x164   : > { %1359 = vperm.xlu0 %2925, %v3195_v23  }
 0x165   : > { %v3549_v38 = vpop.permute.xlu1 %957  ;;  %v3551_v48 = vpop.permute.xlu0 %975 }
 0x166   : > { %5752 = vst [vmem:[#allocation85_spill] sm:$0xff] %v3549_v38  ;;  %5753 = vst [vmem:[#allocation86_spill] sm:$0xff] %v3551_v48 }
 0x167   : > { %2924 = vset.pattern.permute.xlu1 %v2995_v43 }
 0x168   : > { %1335 = vperm.xlu1 %2924, %v3170_v54   ;;  %1365 = vperm.xlu0 %2925, %v3203_v32  }
 0x169   : > { %v3555_v39 = vpop.permute.xlu1 %960  ;;  %v3557_v45 = vpop.permute.xlu0 %981 }
 0x16a   : > { %5754 = vst [vmem:[#allocation87_spill] sm:$0xff] %v3555_v39  ;;  %5755 = vst [vmem:[#allocation88_spill] sm:$0xff] %v3557_v45 }
 0x16c   : > { %1341 = vperm.xlu1 %2924, %v3176_v60   ;;  %1371 = vperm.xlu0 %2925, %v3211_v46  }
 0x16d   : > { %v3561_v16 = vpop.permute.xlu1 %966  ;;  %v3563_v9 = vpop.permute.xlu0 %987 }
 0x16e   : > { %5756 = vst [vmem:[#allocation89_spill] sm:$0xff] %v3561_v16  ;;  %5757 = vst [vmem:[#allocation90_spill] sm:$0xff] %v3563_v9 }
 0x170   : > { %1344 = vperm.xlu1 %2924, %v3184_v1   ;;  %1377 = vperm.xlu0 %2925, %v3219_v57  }
 0x171   : > { %v3567_v43 = vpop.permute.xlu1 %972  ;;  %v3569_v38 = vpop.permute.xlu0 %993 }
 0x172   : > { %5758 = vst [vmem:[#allocation91_spill] sm:$0xff] %v3567_v43 }
 0x174   : > { %1350 = vperm.xlu1 %2924, %v3192_v12   ;;  %1399 = vperm.xlu0 %2925, %v3047_v8  }
 0x175   : > { %v3573_v45 = vpop.permute.xlu1 %978  ;;  %v3575_v39 = vpop.permute.xlu0 %1015 }
 0x176   : > { %5759 = vst [vmem:[#allocation92_spill] sm:$0xff] %v3573_v45  ;;  %5760 = vst [vmem:[#allocation93_spill] sm:$0xff] %v3575_v39 }
 0x178   : > { %1356 = vperm.xlu1 %2924, %v3200_v17   ;;  %1405 = vperm.xlu0 %2925, %v3044_v6  }
 0x179   : > { %v3579_v16 = vpop.permute.xlu1 %984  ;;  %v3581_v9 = vpop.permute.xlu0 %1021 }
 0x17a   : > { %5761 = vst [vmem:[#allocation94_spill] sm:$0xff] %v3579_v16  ;;  %5762 = vst [vmem:[#allocation95_spill] sm:$0xff] %v3581_v9 }
 0x17c   : > { %1362 = vperm.xlu1 %2924, %v3208_v28   ;;  %1411 = vperm.xlu0 %2925, %v3079_v31  }
 0x17d   : > { %v3585_v43 = vpop.permute.xlu1 %990  ;;  %v3587_v36 = vpop.permute.xlu0 %1027 }
 0x17e   : > { %5763 = vst [vmem:[#allocation96_spill] sm:$0xff] %v3585_v43  ;;  %5764 = vst [vmem:[#allocation97_spill] sm:$0xff] %v3587_v36 }
 0x180   : > { %1368 = vperm.xlu1 %2924, %v3216_v41   ;;  %1417 = vperm.xlu0 %2925, %v3088_v37  }
 0x181   : > { %v3591_v39 = vpop.permute.xlu1 %996  ;;  %v3593_v45 = vpop.permute.xlu0 %1033 }
 0x182   : > { %5765 = vst [vmem:[#allocation98_spill] sm:$0xff] %v3591_v39  ;;  %5766 = vst [vmem:[#allocation99_spill] sm:$0xff] %v3593_v45 }
 0x184   : > { %1374 = vperm.xlu1 %2924, %v3224_v47   ;;  %1423 = vperm.xlu0 %2925, %v3107_v51  }
 0x185   : > { %v3597_v16 = vpop.permute.xlu1 %1018  ;;  %v3599_v9 = vpop.permute.xlu0 %1039 }
 0x186   : > { %5767 = vst [vmem:[#allocation100_spill] sm:$0xff] %v3597_v16  ;;  %5768 = vst [vmem:[#allocation101_spill] sm:$0xff] %v3599_v9 }
 0x188   : > { %1380 = vperm.xlu1 %2924, %v3229_v61   ;;  %1429 = vperm.xlu0 %2925, %v3113_v55  }
 0x189   : > { %v3603_v36 = vpop.permute.xlu1 %1024  ;;  %v3605_v43 = vpop.permute.xlu0 %1045 }
 0x18a   : > { %5769 = vst [vmem:[#allocation102_spill] sm:$0xff] %v3603_v36  ;;  %5770 = vst [vmem:[#allocation103_spill] sm:$0xff] %v3605_v43  ;;  %v5616_v36 = vmov 7  }
 0x18c   : > { %1402 = vperm.xlu1 %2924, %v3063_v19   ;;  %1435 = vperm.xlu0 %2925, %v3135_v7  }
 0x18d   : > { %v3609_v39 = vpop.permute.xlu1 %1030  ;;  %v3611_v45 = vpop.permute.xlu0 %1051 }
 0x18e   : > { %5771 = vst [vmem:[#allocation104_spill] sm:$0xff] %v3609_v39  ;;  %5772 = vst [vmem:[#allocation105_spill] sm:$0xff] %v3611_v45 }
 0x190   : > { %1408 = vperm.xlu1 %2924, %v3050_v10   ;;  %1441 = vperm.xlu0 %2925, %v3145_v20  }
 0x191   : > { %v3615_v16 = vpop.permute.xlu1 %1036  ;;  %v3617_v22 = vpop.permute.xlu0 %1057 }
 0x192   : > { %5773 = vst [vmem:[#allocation106_spill] sm:$0xff] %v3615_v16  ;;  %vm1076_vm13 = vcmp.eq.s32.totalorder %v3617_v22, 1 }
 0x194   : > { %1414 = vperm.xlu1 %2924, %v3070_v24   ;;  %2926 = vset.pattern.permute.xlu0 %v5616_v36 }
 0x195   : > { %v3621_v43 = vpop.permute.xlu1 %1042  ;;  %1527 = vperm.xlu0 %2926, %v3170_v54  }
 0x196   : > { %5774 = vst [vmem:[#allocation107_spill] sm:$0xff] %v3621_v43  ;;  %v3624_v39 = vpop.permute.xlu0 %1143 }
 0x197   : > { %5775 = vst [vmem:[#allocation108_spill] sm:$0xff] %v3624_v39 }
 0x198   : > { %1420 = vperm.xlu1 %2924, %v3085_v35  }
 0x199   : > { %v3627_v45 = vpop.permute.xlu1 %1048  ;;  %1536 = vperm.xlu0 %2926, %v3184_v1  }
 0x19a   : > { %5776 = vst [vmem:[#allocation109_spill] sm:$0xff] %v3627_v45  ;;  %v3630_v16 = vpop.permute.xlu0 %1152 }
 0x19b   : > { %5777 = vst [vmem:[#allocation110_spill] sm:$0xff] %v3630_v16 }
 0x19c   : > { %1426 = vperm.xlu1 %2924, %v3095_v42  }
 0x19d   : > { %v3633_v58 = vpop.permute.xlu1 %1054  ;;  %1542 = vperm.xlu0 %2926, %v3192_v12  }
 0x19e   : > { %5778 = vst [vmem:[#allocation111_spill] sm:$0xff] %v3633_v58  ;;  %v3636_v36 = vpop.permute.xlu0 %1158 }
 0x19f   : > { %5779 = vst [vmem:[#allocation112_spill] sm:$0xff] %v3636_v36 }
 0x1a0   : > { %1432 = vperm.xlu1 %2924, %v3110_v53  }
 0x1a1   : > { %v3639_v43 = vpop.permute.xlu1 %1060  ;;  %1548 = vperm.xlu0 %2926, %v3200_v17  }
 0x1a2   : > { %5780 = vst [vmem:[#allocation113_spill] sm:$0xff] %v3639_v43  ;;  %v3642_v39 = vpop.permute.xlu0 %1164  ;;  %v5786_v43 = vmov 7  }
 0x1a3   : > { %5781 = vst [vmem:[#allocation114_spill] sm:$0xff] %v3642_v39 }
 0x1a4   : > { %1438 = vperm.xlu1 %2924, %v3126_v62  }
 0x1a5   : > { %1554 = vperm.xlu0 %2926, %v3208_v28  }
 0x1a6   : > { %v3646_v45 = vpop.permute.xlu1 %1146  ;;  %v3648_v16 = vpop.permute.xlu0 %1170 }
 0x1a7   : > { %5782 = vst [vmem:[#allocation115_spill] sm:$0xff] %v3646_v45  ;;  %5783 = vst [vmem:[#allocation116_spill] sm:$0xff] %v3648_v16 }
 0x1a8   : > { %1444 = vperm.xlu1 %2924, %v3141_v15  }
 0x1a9   : > { %1560 = vperm.xlu0 %2926, %v3216_v41  }
 0x1aa   : > { %v3652_v36 = vpop.permute.xlu1 %1149  ;;  %v3654_v58 = vpop.permute.xlu0 %1176 }
 0x1ab   : > { %5784 = vst [vmem:[#allocation117_spill] sm:$0xff] %v3652_v36  ;;  %5785 = vst [vmem:[#allocation118_spill] sm:$0xff] %v3654_v58 }
 0x1ac   : > { %2927 = vset.pattern.permute.xlu1 %v5786_v43 }
 0x1ad   : > { %1530 = vperm.xlu1 %2927, %v3173_v56   ;;  %1566 = vperm.xlu0 %2926, %v3224_v47  }
 0x1ae   : > { %v3659_v39 = vpop.permute.xlu1 %1155  ;;  %v3661_v9 = vpop.permute.xlu0 %1182 }
 0x1af   : > { %5787 = vst [vmem:[#allocation119_spill] sm:$0xff] %v3659_v39  ;;  %5788 = vst [vmem:[#allocation120_spill] sm:$0xff] %v3661_v9 }
 0x1b1   : > { %1533 = vperm.xlu1 %2927, %v3176_v60   ;;  %1591 = vperm.xlu0 %2926, %v3047_v8  }
 0x1b2   : > { %v3665_v45 = vpop.permute.xlu1 %1161  ;;  %v3667_v16 = vpop.permute.xlu0 %1188 }
 0x1b3   : > { %5789 = vst [vmem:[#allocation121_spill] sm:$0xff] %v3665_v45  ;;  %5790 = vst [vmem:[#allocation122_spill] sm:$0xff] %v3667_v16 }
 0x1b5   : > { %1539 = vperm.xlu1 %2927, %v3179_v63   ;;  %1594 = vperm.xlu0 %2926, %v3063_v19  }
 0x1b6   : > { %v3671_v58 = vpop.permute.xlu1 %1167  ;;  %v3673_v36 = vpop.permute.xlu0 %1210 }
 0x1b7   : > { %5791 = vst [vmem:[#allocation123_spill] sm:$0xff] %v3671_v58  ;;  %5792 = vst [vmem:[#allocation124_spill] sm:$0xff] %v3673_v36 }
 0x1b9   : > { %1545 = vperm.xlu1 %2927, %v3187_v13   ;;  %1621 = vperm.xlu0 %2926, %v3113_v55  }
 0x1ba   : > { %v3677_v39 = vpop.permute.xlu1 %1173  ;;  %v3679_v9 = vpop.permute.xlu0 %1216 }
 0x1bb   : > { %5793 = vst [vmem:[#allocation125_spill] sm:$0xff] %v3677_v39  ;;  %5794 = vst [vmem:[#allocation126_spill] sm:$0xff] %v3679_v9 }
 0x1bd   : > { %1551 = vperm.xlu1 %2927, %v3195_v23   ;;  %1624 = vperm.xlu0 %2926, %v3110_v53  }
 0x1be   : > { %v3683_v16 = vpop.permute.xlu1 %1179  ;;  %v3685_v45 = vpop.permute.xlu0 %1222 }
 0x1bf   : > { %5795 = vst [vmem:[#allocation127_spill] sm:$0xff] %v3683_v16  ;;  %5796 = vst [vmem:[#allocation128_spill] sm:$0xff] %v3685_v45 }
 0x1c1   : > { %1557 = vperm.xlu1 %2927, %v3203_v32   ;;  %1603 = vperm.xlu0 %2926, %v3079_v31  }
 0x1c2   : > { %v3689_v36 = vpop.permute.xlu1 %1185  ;;  %v3691_v58 = vpop.permute.xlu0 %1228 }
 0x1c3   : > { %5797 = vst [vmem:[#allocation129_spill] sm:$0xff] %v3691_v58 }
 0x1c5   : > { %1563 = vperm.xlu1 %2927, %v3211_v46   ;;  %1606 = vperm.xlu0 %2926, %v3070_v24  }
 0x1c6   : > { %v3695_v39 = vpop.permute.xlu1 %1207  ;;  %v3697_v9 = vpop.permute.xlu0 %1234 }
 0x1c7   : > { %5798 = vst [vmem:[#allocation130_spill] sm:$0xff] %v3695_v39  ;;  %5799 = vst [vmem:[#allocation131_spill] sm:$0xff] %v3697_v9  ;;  %v5637_v39 = vmov 8  }
 0x1c9   : > { %1569 = vperm.xlu1 %2927, %v3219_v57   ;;  %1633 = vperm.xlu0 %2926, %v3145_v20  }
 0x1ca   : > { %v3701_v45 = vpop.permute.xlu1 %1213  ;;  %v3703_v16 = vpop.permute.xlu0 %1240 }
 0x1cb   : > { %5800 = vst [vmem:[#allocation132_spill] sm:$0xff] %v3701_v45  ;;  %5801 = vst [vmem:[#allocation133_spill] sm:$0xff] %v3703_v16 }
 0x1cd   : > { %1615 = vperm.xlu1 %2927, %v3107_v51   ;;  %1612 = vperm.xlu0 %2926, %v3085_v35  }
 0x1ce   : > { %v3707_v58 = vpop.permute.xlu1 %1219  ;;  %v3709_v48 = vpop.permute.xlu0 %1246 }
 0x1cf   : > { %5802 = vst [vmem:[#allocation134_spill] sm:$0xff] %v3707_v58  ;;  %5803 = vst [vmem:[#allocation135_spill] sm:$0xff] %v3709_v48 }
 0x1d1   : > { %1618 = vperm.xlu1 %2927, %v3095_v42   ;;  %2942 = vset.pattern.permute.xlu0 %v5637_v39 }
 0x1d2   : > { %v3713_v9 = vpop.permute.xlu1 %1225  ;;  %1719 = vperm.xlu0 %2942, %v3170_v54   ;;  %v3716_v45 = vpop.permute.xlu0 %1252 }
 0x1d3   : > { %5804 = vst [vmem:[#allocation136_spill] sm:$0xff] %v3713_v9  ;;  %5805 = vst [vmem:[#allocation137_spill] sm:$0xff] %v3716_v45 }
 0x1d5   : > { %2928 = vset.pattern.permute.xlu1 %v5637_v39 }
 0x1d6   : > { %1743 = vperm.xlu1 %2928, %v3195_v23   ;;  %v3720_v16 = vpop.permute.xlu1 %1231  ;;  %1807 = vperm.xlu0 %2942, %v3107_v51  }
 0x1d7   : > { %5806 = vst [vmem:[#allocation138_spill] sm:$0xff] %v3720_v16  ;;  %v3723_v58 = vpop.permute.xlu0 %1338 }
 0x1d8   : > { %5807 = vst [vmem:[#allocation139_spill] sm:$0xff] %v3723_v58 }
 0x1da   : > { %1783 = vperm.xlu1 %2928, %v3047_v8   ;;  %v3726_v48 = vpop.permute.xlu1 %1237  ;;  %1746 = vperm.xlu0 %2942, %v3208_v28  }
 0x1db   : > { %5808 = vst [vmem:[#allocation140_spill] sm:$0xff] %v3726_v48  ;;  %v3729_v9 = vpop.permute.xlu0 %1347 }
 0x1dc   : > { %5809 = vst [vmem:[#allocation141_spill] sm:$0xff] %v3729_v9 }
 0x1de   : > { %1722 = vperm.xlu1 %2928, %v3173_v56   ;;  %v3732_v45 = vpop.permute.xlu1 %1243  ;;  %1810 = vperm.xlu0 %2942, %v3095_v42  }
 0x1df   : > { %5810 = vst [vmem:[#allocation142_spill] sm:$0xff] %v3732_v45  ;;  %v3735_v39 = vpop.permute.xlu0 %1353 }
 0x1e0   : > { %5811 = vst [vmem:[#allocation143_spill] sm:$0xff] %v3735_v39  ;;  %v5647_v39 = vmov 9  }
 0x1e2   : > { %1786 = vperm.xlu1 %2928, %v3063_v19   ;;  %v3738_v16 = vpop.permute.xlu1 %1249  ;;  %1749 = vperm.xlu0 %2942, %v3203_v32  }
 0x1e3   : > { %v3741_v58 = vpop.permute.xlu0 %1359 }
 0x1e4   : > { %5812 = vst [vmem:[#allocation144_spill] sm:$0xff] %v3741_v58 }
 0x1e6   : > { %2929 = vset.pattern.permute.xlu1 %v5786_v43  ;;  %1728 = vperm.xlu0 %2942, %v3184_v1  }
 0x1e7   : > { %1597 = vperm.xlu1 %2929, %v3044_v6   ;;  %v3746_v9 = vpop.permute.xlu1 %1335  ;;  %v3748_v45 = vpop.permute.xlu0 %1365 }
 0x1e8   : > { %5813 = vst [vmem:[#allocation145_spill] sm:$0xff] %v3746_v9  ;;  %5814 = vst [vmem:[#allocation146_spill] sm:$0xff] %v3748_v45 }
 0x1ea   : > { %1792 = vperm.xlu0 %2942, %v3050_v10  }
 0x1eb   : > { %2930 = vset.pattern.permute.xlu1 %v5647_v39  ;;  %v3752_v48 = vpop.permute.xlu1 %1341  ;;  %v3754_v26 = vpop.permute.xlu0 %1371 }
 0x1ec   : > { %5815 = vst [vmem:[#allocation147_spill] sm:$0xff] %v3752_v48  ;;  %5816 = vst [vmem:[#allocation148_spill] sm:$0xff] %v3754_v26  ;;  %1911 = vperm.xlu1 %2930, %v3170_v54  }
 0x1ee   : > { %1731 = vperm.xlu0 %2942, %v3179_v63  }
 0x1ef   : > { %v3758_v58 = vpop.permute.xlu1 %1344  ;;  %v3760_v40 = vpop.permute.xlu0 %1377 }
 0x1f0   : > { %1935 = vperm.xlu1 %2930, %v3195_v23  }
 0x1f2   : > { %1819 = vperm.xlu0 %2942, %v3135_v7  }
 0x1f3   : > { %v3764_v45 = vpop.permute.xlu1 %1350  ;;  %v3766_v9 = vpop.permute.xlu0 %1399 }
 0x1f4   : > { %5817 = vst [vmem:[#allocation149_spill] sm:$0xff] %v3764_v45  ;;  %5818 = vst [vmem:[#allocation150_spill] sm:$0xff] %v3766_v9  ;;  %1999 = vperm.xlu1 %2930, %v3107_v51   ;;  %v5822_v45 = vmov 9  }
 0x1f6   : > { %1758 = vperm.xlu0 %2942, %v3224_v47  }
 0x1f7   : > { %v3770_v39 = vpop.permute.xlu1 %1356  ;;  %v3772_v54 = vpop.permute.xlu0 %1405 }
 0x1f8   : > { %5819 = vst [vmem:[#allocation151_spill] sm:$0xff] %v3770_v39  ;;  %5820 = vst [vmem:[#allocation152_spill] sm:$0xff] %v3772_v54  ;;  %2931 = vset.pattern.permute.xlu1 %v5786_v43 }
 0x1f9   : > { %1600 = vperm.xlu1 %2931, %v3050_v10  }
 0x1fa   : > { %1822 = vperm.xlu0 %2942, %v3126_v62  }
 0x1fb   : > { %v3777_v23 = vpop.permute.xlu1 %1362  ;;  %v3779_v26 = vpop.permute.xlu0 %1411 }
 0x1fc   : > { %5821 = vst [vmem:[#allocation153_spill] sm:$0xff] %v3779_v26 }
 0x1fd   : > { %2932 = vset.pattern.permute.xlu1 %v5822_v45 }
 0x1fe   : > { %1914 = vperm.xlu1 %2932, %v3173_v56   ;;  %1737 = vperm.xlu0 %2942, %v3187_v13   ;;  %v5828_v13 = vmov 8  }
 0x1ff   : > { %v3784_v51 = vpop.permute.xlu1 %1368  ;;  %v3786_v39 = vpop.permute.xlu0 %1417 }
 0x200   : > { %5823 = vst [vmem:[#allocation154_spill] sm:$0xff] %v3784_v51  ;;  %5824 = vst [vmem:[#allocation155_spill] sm:$0xff] %v3786_v39  ;;  %v2168_v51 = vld [vmem:[%s5560_s2] sm:$0xff] }
 0x202   : > { %1938 = vperm.xlu1 %2932, %v3208_v28   ;;  %1825 = vperm.xlu0 %2942, %v3145_v20  }
 0x203   : > { %v3790_v48 = vpop.permute.xlu1 %1374  ;;  %v3792_v54 = vpop.permute.xlu0 %1423 }
 0x204   : > { %5825 = vst [vmem:[#allocation156_spill] sm:$0xff] %v3790_v48  ;;  %v2169_v48 = vld [vmem:[%s5560_s2 + $0x8] sm:$0xff] }
 0x205   : > { %v2868_v20 = vpack.c.bf16 %v2169_v48, %v2168_v51  ;;  %v2173_v51 = vld [vmem:[%s5560_s2 + $0x28] sm:$0xff] }
 0x206   : > { %2002 = vperm.xlu1 %2932, %v3095_v42   ;;  %1764 = vperm.xlu0 %2942, %v3229_v61  }
 0x207   : > { %v3796_v26 = vpop.permute.xlu1 %1380  ;;  %v3798_v56 = vpop.permute.xlu0 %1429  ;;  %2869 = vmatprep.subr.bf16.mxu0 %v2868_v20  ;;  %2884 = vmatprep.subr.bf16.mxu1 %v2868_v20 }
 0x208   : > { %5826 = vst [vmem:[#allocation157_spill] sm:$0xff] %v3796_v26  ;;  %5827 = vst [vmem:[#allocation158_spill] sm:$0xff] %v3798_v56  ;;  %v2171_v56 = vld [vmem:[%s5560_s2 + $0x18] sm:$0xff]  ;;  %2871 = vmatpush3.bf16.msra.mxu0 %v2868_v20  ;;  %2888 = vmatpush3.bf16.msra.mxu1 %v2868_v20 }
 0x20a   : > { %2933 = vset.pattern.permute.xlu1 %v5828_v13  ;;  %1828 = vperm.xlu0 %2942, %v3141_v15  }
 0x20b   : > { %1725 = vperm.xlu1 %2933, %v3176_v60   ;;  %v3803_v28 = vpop.permute.xlu1 %1402  ;;  %v3805_v39 = vpop.permute.xlu0 %1435 }
 0x20c   : > { %5829 = vst [vmem:[#allocation159_spill] sm:$0xff] %v3803_v28  ;;  %5830 = vst [vmem:[#allocation160_spill] sm:$0xff] %v3805_v39 }
 0x20e   : > { %2945 = vset.pattern.permute.xlu0 %v5822_v45 }
 0x20f   : > { %1789 = vperm.xlu1 %2933, %v3044_v6   ;;  %v3809_v42 = vpop.permute.xlu1 %1408  ;;  %1975 = vperm.xlu0 %2945, %v3047_v8   ;;  %v3812_v26 = vpop.permute.xlu0 %1441  ;;  %v2170_v8 = vld [vmem:[%s5560_s2 + $0x10] sm:$0xff] }
 0x210   : > { %v2872_v9 = vpack.c.bf16 %v2171_v56, %v2170_v8  ;;  %v2175_v8 = vld [vmem:[%s5560_s2 + $0x38] sm:$0xff] }
 0x212   : > { %2873 = vmatprep.subr.bf16.mxu0 %v2872_v9  ;;  %2885 = vmatprep.subr.bf16.mxu1 %v2872_v9 }
 0x213   : > { %1813 = vperm.xlu1 %2933, %v3113_v55   ;;  %v3821_v39 = vpop.permute.xlu1 %1414  ;;  %1978 = vperm.xlu0 %2945, %v3063_v19   ;;  %v2172_v19 = vld [vmem:[%s5560_s2 + $0x20] sm:$0xff] }
 0x214   : > { %5831 = vst [vmem:[#allocation161_spill] sm:$0xff] %v3821_v39  ;;  %v1528_v28 = vpop.permute.xlu0 %1527  ;;  %2875 = vmatpush3.bf16.msra.mxu0 %v2872_v9  ;;  %v2876_v20 = vpack.c.bf16 %v2173_v51, %v2172_v19  ;;  %2889 = vmatpush3.bf16.msra.mxu1 %v2872_v9 }
 0x216   : > { %2877 = vmatprep.subr.bf16.mxu0 %v2876_v20  ;;  %2886 = vmatprep.subr.bf16.mxu1 %v2876_v20 }
 0x217   : > { %1752 = vperm.xlu1 %2933, %v3216_v41   ;;  %v3831_v48 = vpop.permute.xlu1 %1420  ;;  %1941 = vperm.xlu0 %2945, %v3203_v32   ;;  %v2174_v32 = vld [vmem:[%s5560_s2 + $0x30] sm:$0xff] }
 0x218   : > { %5832 = vst [vmem:[#allocation162_spill] sm:$0xff] %v3831_v48  ;;  %v3840_v39 = vpop.permute.xlu0 %1536  ;;  %2879 = vmatpush3.bf16.msra.mxu0 %v2876_v20  ;;  %v2880_v9 = vpack.c.bf16 %v2175_v8, %v2174_v32  ;;  %2890 = vmatpush3.bf16.msra.mxu1 %v2876_v20 }
 0x21a   : > { %2881 = vmatprep.subr.bf16.mxu0 %v2880_v9  ;;  %2887 = vmatprep.subr.bf16.mxu1 %v2880_v9 }
 0x21b   : > { %1816 = vperm.xlu1 %2933, %v3110_v53   ;;  %v3843_v56 = vpop.permute.xlu1 %1426  ;;  %1944 = vperm.xlu0 %2945, %v3216_v41  }
 0x21c   : > { %v3852_v48 = vpop.permute.xlu0 %1542  ;;  %2883 = vmatpush3.bf16.msra.mxu0 %v2880_v9  ;;  %2891 = vmatpush3.bf16.msra.mxu1 %v2880_v9 }
 0x21f   : > { %2934 = vset.pattern.permute.xlu1 %v5786_v43  ;;  %v3855_v19 = vpop.permute.xlu1 %1432  ;;  %1987 = vperm.xlu0 %2945, %v3079_v31  }
 0x220   : > { %5833 = vst [vmem:[#allocation163_spill] sm:$0xff] %v3855_v19  ;;  %1627 = vperm.xlu1 %2934, %v3135_v7   ;;  %v3859_v41 = vpop.permute.xlu0 %1548  ;;  %v212_v19 = vlaneseq }
 0x223   : > { %v3861_v51 = vpop.permute.xlu1 %1438  ;;  %1950 = vperm.xlu0 %2945, %v3224_v47   ;;  %v3877_v47 = vand.u32 127, %v212_v19 }
 0x224   : > { %5834 = vst [vmem:[#allocation164_spill] sm:$0xff] %v3861_v51  ;;  %2935 = vset.pattern.permute.xlu1 %v5822_v45  ;;  %v3865_v20 = vpop.permute.xlu0 %1554 }
 0x225   : > { %1917 = vperm.xlu1 %2935, %v3176_v60   ;;  %vm1574_vm0 = vcmp.eq.s32.totalorder %v1528_v28, %v3877_v47  ;;  %vm356_vm3 = vcmp.eq.s32.totalorder %v3293_v30, %v3877_v47  ;;  %vm612_vm4 = vcmp.eq.s32.totalorder %v3383_v52, %v3877_v47  ;;  %vm468_vm6 = vcmp.eq.s32.totalorder %v3339_v59, %v3877_v47 }
 0x226   : > { %vm708_vm9 = vmand %vm612_vm4, %vm692_vm5  ;;  %vm820_vm10 = vcmp.eq.s32.totalorder %v3489_v2, %v3877_v47  ;;  %vm1012_vm12 = vcmp.eq.s32.totalorder %v3569_v38, %v3877_v47  ;;  %vm1396_vm4 = vcmp.eq.s32.totalorder %v3760_v40, %v3877_v47  ;;  %vm1460_vm5 = vcmp.eq.s32.totalorder %v3812_v26, 1 }
 0x227   : > { %v3868_v32 = vpop.permute.xlu1 %1444  ;;  %1953 = vperm.xlu0 %2945, %v3219_v57   ;;  %vm900_vm11 = vmand %vm820_vm10, %vm884_vm7  ;;  %vm1579_vm7 = vcmp.eq.s32.totalorder %v3852_v48, %v3877_v47 }
 0x228   : > { %5835 = vst [vmem:[#allocation165_spill] sm:$0xff] %v3868_v32  ;;  %v1561_v8 = vpop.permute.xlu0 %1560 }
 0x229   : > { %1981 = vperm.xlu1 %2935, %v3044_v6   ;;  %vm1585_vm8 = vcmp.eq.s32.totalorder %v1561_v8, %v3877_v47 }
 0x22b   : > { %1932 = vperm.xlu0 %2945, %v3200_v17  }
 0x22c   : > { %v3873_v9 = vpop.permute.xlu1 %1530  ;;  %v3875_v51 = vpop.permute.xlu0 %1566 }
 0x22d   : > { %5836 = vst [vmem:[#allocation166_spill] sm:$0xff] %v3875_v51  ;;  %2005 = vperm.xlu1 %2935, %v3113_v55  }
 0x22f   : > { %1996 = vperm.xlu0 %2945, %v3085_v35  }
 0x230   : > { %v3882_v60 = vpop.permute.xlu1 %1533  ;;  %v1592_v32 = vpop.permute.xlu0 %1591 }
 0x231   : > { %5837 = vst [vmem:[#allocation167_spill] sm:$0xff] %v3882_v60  ;;  %vm1638_vm1 = vcmp.eq.s32.totalorder %v1592_v32, 1  ;;  %2936 = vset.pattern.permute.xlu1 %v5786_v43 }
 0x232   : > { %vm3885_vm2 = vmand %vm1574_vm0, %vm1638_vm1  ;;  %1630 = vperm.xlu1 %2936, %v3126_v62   ;;  %vm1268_vm0 = vcmp.eq.s32.totalorder %v3738_v16, 1 }
 0x233   : > { %vm1092_vm1 = vmand %vm1012_vm12, %vm1076_vm13 }
 0x234   : > { %v3890_v19 = vpop.permute.xlu1 %1539  ;;  %v3892_v51 = vpop.permute.xlu0 %1594 }
 0x235   : > { %5840 = vst [vmem:[#allocation168_spill] sm:$0xff] %v3890_v19 }
 0x236   : > { %2937 = vset.pattern.permute.xlu1 %v5822_v45 }
 0x237   : > { %1920 = vperm.xlu1 %2937, %v3184_v1   ;;  %v5662_v1 = vmov 0.0  }
 0x238   : > { %v3896_v55 = vpop.permute.xlu1 %1545  ;;  %v3898_v28 = vpop.permute.xlu0 %1621  ;;  %v2640_v32 = vsel %vm356_vm3, 1.0, %v5662_v1  ;;  %v2656_v34 = vsel %vm468_vm6, 1.0, %v5662_v1  ;;  %v2672_v14 = vsel %vm708_vm9, 1.0, %v5662_v1  ;;  %v2688_v38 = vsel %vm900_vm11, 1.0, %v5662_v1 }
 0x239   : > { %5841 = vst [vmem:[#allocation169_spill] sm:$0xff] %v3896_v55  ;;  %v516_v2 = vadd.f32 %v2656_v34, %v2640_v32  ;;  %vm1204_vm3 = vcmp.eq.s32.totalorder %v3689_v36, %v3877_v47 }
 0x23a   : > { %vm1284_vm6 = vmand %vm1204_vm3, %vm1268_vm0  ;;  %vm342_vm3 = vcmp.eq.s32.totalorder %v3251_v3, %v3877_v47 }
 0x23b   : > { %1984 = vperm.xlu1 %2937, %v3050_v10   ;;  %v5842_v10 = vmov 0  ;;  %v756_v22 = vadd.f32 %v2672_v14, %v516_v2  ;;  %v2720_v40 = vsel %vm1284_vm6, 1.0, %v5662_v1  ;;  %vm351_vm6 = vcmp.eq.s32.totalorder %v3271_v18, %v3877_v47 }
 0x23c   : > { %v3913_v30 = vpop.permute.xlu1 %1551  ;;  %v1625_v52 = vpop.permute.xlu0 %1624 }
 0x23d   : > { %vm1649_vm14 = vcmp.eq.s32.totalorder %v1625_v52, 1  ;;  %v948_v16 = vadd.f32 %v2688_v38, %v756_v22  ;;  %v5847_v52 = vmov 0 }
 0x23e   : > { %vm3919_vm15 = vmand %vm1585_vm8, %vm1649_vm14  ;;  %vm1581_vm14 = vcmp.eq.s32.totalorder %v3859_v41, %v3877_v47 }
 0x23f   : > { %v5843_v10 = vsel %vm3919_vm15, 4294967295, %v5842_v10  ;;  %2008 = vperm.xlu1 %2937, %v3110_v53   ;;  %v2704_v53 = vsel %vm1092_vm1, 1.0, %v5662_v1  ;;  %vm1476_vm8 = vmand %vm1396_vm4, %vm1460_vm5  ;;  %vm345_vm4 = vcmp.eq.s32.totalorder %v3254_v4, %v3877_v47  ;;  %vm343_vm5 = vcmp.eq.s32.totalorder %v3257_v5, %v3877_v47 }
 0x240   : > { %5844 = vst [vmem:[#allocation170_spill] sm:$0xff] %v5843_v10  ;;  %v3926_v59 = vpop.permute.xlu1 %1557  ;;  %v3928_v8 = vpop.permute.xlu0 %1603  ;;  %v1140_v26 = vadd.f32 %v2704_v53, %v948_v16  ;;  %v2736_v34 = vsel %vm1476_vm8, 1.0, %v5662_v1  ;;  %vm455_vm8 = vcmp.eq.s32.totalorder %v3297_v0, %v3877_v47  ;;  %v2627_v3 = vsel %vm343_vm5, 1.0, %v5662_v1  ;;  %v5884_v10 = vld [vmem:[#allocation68_spill] sm:$0xff] }
 0x241   : > { %5845 = vst [vmem:[#allocation171_spill] sm:$0xff] %v3928_v8  ;;  %v4010_v4 = vsel %vm351_vm6, 1.0, %v5662_v1  ;;  %v2643_v0 = vsel %vm455_vm8, 1.0, %v5662_v1 }
 0x242   : > { %v1332_v48 = vadd.f32 %v2720_v40, %v1140_v26  ;;  %v4051_v55 = vadd.f32 %v2643_v0, %v2627_v3  ;;  %v5867_v0 = vld [vmem:[#allocation15_spill] sm:$0xff] }
 0x243   : > { %2938 = vset.pattern.permute.xlu1 %v5828_v13 }
 0x244   : > { %1755 = vperm.xlu1 %2938, %v3211_v46   ;;  %v3941_v32 = vpop.permute.xlu1 %1563  ;;  %v1607_v36 = vpop.permute.xlu0 %1606  ;;  %v1524_v38 = vadd.f32 %v2736_v34, %v1332_v48 }
 0x245   : > { %5846 = vst [vmem:[#allocation172_spill] sm:$0xff] %v3941_v32  ;;  %vm1643_vm9 = vcmp.eq.s32.totalorder %v1607_v36, 1  ;;  %v5872_v32 = vld [vmem:[#allocation35_spill] sm:$0xff] }
 0x246   : > { %vm3944_vm10 = vmand %vm1579_vm7, %vm1643_vm9  ;;  %vm350_vm7 = vcmp.eq.s32.totalorder %v3275_v21, %v3877_v47  ;;  %vm352_vm9 = vcmp.eq.s32.totalorder %v3281_v25, %v3877_v47  ;;  %v5856_v21 = vld [vmem:[#allocation26_spill] sm:$0xff] }
 0x247   : > { %v5848_v52 = vsel %vm3944_vm10, 4294967295, %v5847_v52  ;;  %vm598_vm6 = vcmp.eq.s32.totalorder %v5856_v21, %v3877_v47  ;;  %v5857_v25 = vld [vmem:[#allocation62_spill] sm:$0xff]  ;;  %v5864_v21 = vld [vmem:[#allocation47_spill] sm:$0xff] }
 0x248   : > { %5849 = vst [vmem:[#allocation173_spill] sm:$0xff] %v5848_v52  ;;  %1795 = vperm.xlu1 %2938, %v3079_v31   ;;  %v1570_v14 = vpop.permute.xlu1 %1569  ;;  %v1634_v2 = vpop.permute.xlu0 %1633  ;;  %v5851_v31 = vmov 0  ;;  %v5871_v52 = vld [vmem:[#allocation138_spill] sm:$0xff] }
 0x249   : > { %vm1588_vm11 = vcmp.eq.s32.totalorder %v1570_v14, %v3877_v47  ;;  %vm1652_vm12 = vcmp.eq.s32.totalorder %v1634_v2, 1 }
 0x24a   : > { %vm1668_vm13 = vmand %vm1588_vm11, %vm1652_vm12  ;;  %vm462_vm11 = vcmp.eq.s32.totalorder %v3321_v44, %v3877_v47  ;;  %vm606_vm12 = vcmp.eq.s32.totalorder %v3365_v50, %v3877_v47  ;;  %v5858_v44 = vld [vmem:[#allocation86_spill] sm:$0xff] }
 0x24b   : > { %v2752_v22 = vsel %vm1668_vm13, 1.0, %v5662_v1  ;;  %vm686_vm13 = vcmp.eq.s32.totalorder %v3413_v11, 1  ;;  %v5860_v11 = vmov 0.0   ;;  %v5861_v50 = vld [vmem:[#allocation30_spill] sm:$0xff] }
 0x24c   : > { %v3954_v53 = vadd.f32 %v2752_v22, %v1524_v38  ;;  %1734 = vperm.xlu1 %2938, %v3192_v12   ;;  %v3957_v16 = vpop.permute.xlu1 %1615  ;;  %v1613_v36 = vpop.permute.xlu0 %1612  ;;  %v2634_v22 = vsel %vm350_vm7, 1.0, %v5662_v1  ;;  %vm4040_vm5 = vmand %vm606_vm12, %vm686_vm13  ;;  %vm814_vm7 = vcmp.eq.s32.totalorder %v5857_v25, %v3877_v47  ;;  %vm687_vm13 = vcmp.eq.s32.totalorder %v5864_v21, 1  ;;  %v5883_v21 = vld [vmem:[#allocation53_spill] sm:$0xff]  ;;  %v5905_v25 = vld [vmem:[#allocation27_spill] sm:$0xff] }
 0x24d   : > { %vm1645_vm0 = vcmp.eq.s32.totalorder %v1613_v36, 1  ;;  %v2636_v36 = vsel %vm352_vm9, 1.0, %v5662_v1 }
 0x24e   : > { %5850 = vst [vmem:[#allocation174_spill] sm:$0xff] %v3954_v53  ;;  %vm3959_vm1 = vmand %vm1581_vm14, %vm1645_vm0  ;;  %vm454_vm14 = vcmp.eq.s32.totalorder %v3299_v33, %v3877_v47  ;;  %vm678_vm0 = vcmp.eq.s32.totalorder %v3389_v27, 1  ;;  %v2650_v33 = vsel %vm462_vm11, 1.0, %v5662_v1  ;;  %vm601_vm11 = vcmp.eq.s32.totalorder %v5861_v50, %v3877_v47  ;;  %v5868_v50 = vld [vmem:[#allocation20_spill] sm:$0xff] }
 0x24f   : > { %v5852_v31 = vsel %vm3959_vm1, 4294967295, %v5851_v31  ;;  %vm4058_vm12 = vmand %vm598_vm6, %vm678_vm0  ;;  %v510_v8 = vadd.f32 %v2650_v33, %v2634_v22  ;;  %vm607_vm6 = vcmp.eq.s32.totalorder %v5872_v32, %v3877_v47  ;;  %v5881_v22 = vld [vmem:[#allocation123_spill] sm:$0xff] }
 0x250   : > { %5853 = vst [vmem:[#allocation175_spill] sm:$0xff] %v5852_v31  ;;  %1798 = vperm.xlu1 %2938, %v3070_v24   ;;  %v3964_v40 = vpop.permute.xlu1 %1618  ;;  %v2642_v31 = vsel %vm454_vm14, 1.0, %v5860_v11  ;;  %vm4105_vm14 = vmand %vm607_vm6, %vm687_vm13 }
 0x251   : > { %v3966_v26 = vpop.permute.xlu0 %1719 }
 0x254   : > { %2939 = vset.pattern.permute.xlu1 %v5786_v43 }
 0x255   : > { %1609 = vperm.xlu1 %2939, %v3088_v37   ;;  %v3970_v41 = vpop.permute.xlu1 %1743  ;;  %v3972_v34 = vpop.permute.xlu0 %1807 }
 0x259   : > { %2940 = vset.pattern.permute.xlu1 %v5822_v45  ;;  %v3975_v48 = vpop.permute.xlu1 %1783  ;;  %v3977_v14 = vpop.permute.xlu0 %1746 }
 0x25a   : > { %1923 = vperm.xlu1 %2940, %v3179_v63   ;;  %v2626_v63 = vsel %vm342_vm3, 1.0, %v5662_v1  ;;  %vm878_vm3 = vcmp.eq.s32.totalorder %v3519_v49, 1  ;;  %v2666_v49 = vsel %vm4040_vm5, 1.0, %v5860_v11  ;;  %vm5882_vm5 = vcmp.eq.s32.totalorder %v5867_v0, %v3877_v47 }
 0x25b   : > { %vm4065_vm8 = vmand %vm814_vm7, %vm878_vm3  ;;  %v2645_v33 = vsel %vm5882_vm5, 1.0, %v5860_v11  ;;  %vm5885_vm3 = vcmp.eq.s32.totalorder %v5871_v52, 1  ;;  %vm5889_vm5 = vcmp.eq.s32.totalorder %v3792_v54, 1  ;;  %v4145_v0 = vadd.f32 %v2642_v31, %v2626_v63  ;;  %v5917_v31 = vld [vmem:[#allocation54_spill] sm:$0xff] }
 0x25c   : > { %v2682_v32 = vsel %vm4065_vm8, 1.0, %v5860_v11  ;;  %vm5888_vm8 = vcmp.eq.s32.totalorder %v5868_v50, %v3877_v47  ;;  %v2658_v52 = vsel %vm4058_vm12, 1.0, %v5860_v11 }
 0x25d   : > { %v3980_v2 = vpop.permute.xlu1 %1722  ;;  %v3982_v38 = vpop.permute.xlu0 %1810  ;;  %v2651_v60 = vsel %vm5888_vm8, 1.0, %v5860_v11 }
 0x25e   : > { %1947 = vperm.xlu1 %2940, %v3211_v46   ;;  %v4006_v46 = vsel %vm345_vm4, 1.0, %v5662_v1  ;;  %vm681_vm4 = vcmp.eq.s32.totalorder %v3405_v29, 1  ;;  %v5859_v1 = vld [vmem:[#allocation101_spill] sm:$0xff]  ;;  %v5894_v29 = vld [vmem:[#allocation102_spill] sm:$0xff] }
 0x25f   : > { %vm4075_vm0 = vmand %vm601_vm11, %vm681_vm4  ;;  %vm5873_vm7 = vcmp.eq.s32.totalorder %v5859_v1, 1  ;;  %vm5874_vm4 = vcmp.eq.s32.totalorder %v5858_v44, %v3877_v47  ;;  %v750_v44 = vadd.f32 %v2666_v49, %v510_v8 }
 0x260   : > { %vm4093_vm11 = vmand %vm5874_vm4, %vm5873_vm7  ;;  %vm1198_vm7 = vcmp.eq.s32.totalorder %v5881_v22, %v3877_v47 }
 0x261   : > { %v4012_v5 = vpop.permute.xlu1 %1786  ;;  %v4014_v18 = vpop.permute.xlu0 %1749  ;;  %vm4124_vm9 = vmand %vm1198_vm7, %vm5885_vm3  ;;  %v2698_v8 = vsel %vm4093_vm11, 1.0, %v5860_v11  ;;  %v942_v49 = vadd.f32 %v2682_v32, %v750_v44  ;;  %vm1065_vm11 = vcmp.eq.s32.totalorder %v5894_v29, 1  ;;  %v5916_v29 = vld [vmem:[#allocation46_spill] sm:$0xff]  ;;  %v5923_v44 = vld [vmem:[#allocation67_spill] sm:$0xff] }
 0x262   : > { %2011 = vperm.xlu1 %2940, %v3135_v7   ;;  %v5877_v7 = vld [vmem:[#allocation144_spill] sm:$0xff]  ;;  %v2714_v63 = vsel %vm4124_vm9, 1.0, %v5860_v11 }
 0x263   : > { %vm5890_vm13 = vcmp.eq.s32.totalorder %v5877_v7, %v3877_v47  ;;  %v1134_v32 = vadd.f32 %v2698_v8, %v942_v49 }
 0x264   : > { %vm4140_vm6 = vmand %vm5890_vm13, %vm5889_vm5  ;;  %vm5897_vm13 = vcmp.eq.s32.totalorder %v5884_v10, 1  ;;  %vm5898_vm5 = vcmp.eq.s32.totalorder %v5883_v21, %v3877_v47  ;;  %v505_v10 = vadd.f32 %v2645_v33, %v4006_v46  ;;  %v5910_v33 = vld [vmem:[#allocation126_spill] sm:$0xff] }
 0x265   : > { %v1729_v3 = vpop.permute.xlu0 %1728  ;;  %vm4166_vm3 = vmand %vm5898_vm5, %vm5897_vm13  ;;  %vm5902_vm5 = vcmp.eq.s32.totalorder %v3957_v16, 1  ;;  %v2730_v16 = vsel %vm4140_vm6, 1.0, %v5860_v11  ;;  %v1326_v27 = vadd.f32 %v2714_v63, %v1134_v32 }
 0x266   : > { %2941 = vset.pattern.permute.xlu1 %v5786_v43  ;;  %v4084_v19 = vpop.permute.xlu1 %1597  ;;  %v5878_v43 = vld [vmem:[#allocation21_spill] sm:$0xff]  ;;  %vm1769_vm4 = vcmp.eq.s32.totalorder %v1729_v3, %v3877_v47  ;;  %v4180_v3 = vadd.f32 %v2651_v60, %v4010_v4  ;;  %v2661_v60 = vsel %vm4075_vm0, 1.0, %v5860_v11  ;;  %v5908_v4 = vld [vmem:[#allocation34_spill] sm:$0xff]  ;;  %vm5911_vm0 = vcmp.eq.s32.totalorder %v3972_v34, 1 }
 0x267   : > { %1572 = vperm.xlu1 %2941, %v3229_v61   ;;  %vm5893_vm8 = vcmp.eq.s32.totalorder %v5878_v43, %v3877_v47  ;;  %v5901_v43 = vld [vmem:[#allocation87_spill] sm:$0xff]  ;;  %v2677_v34 = vsel %vm4166_vm3, 1.0, %v5860_v11  ;;  %v745_v49 = vadd.f32 %v2661_v60, %v505_v10  ;;  %v1518_v63 = vadd.f32 %v2730_v16, %v1326_v27 }
 0x268   : > { %v2652_v50 = vsel %vm5893_vm8, 1.0, %v5860_v11  ;;  %vm1001_vm13 = vcmp.eq.s32.totalorder %v5901_v43, %v3877_v47  ;;  %v2667_v43 = vsel %vm4105_vm14, 1.0, %v5860_v11  ;;  %vm5920_vm14 = vcmp.eq.s32.totalorder %v5905_v25, %v3877_v47  ;;  %v5930_v27 = vld [vmem:[#allocation107_spill] sm:$0xff] }
 0x269   : > { %v1793_v22 = vpop.permute.xlu0 %1792  ;;  %v4192_v21 = vadd.f32 %v2652_v50, %v2636_v36  ;;  %vm4201_vm8 = vmand %vm1001_vm13, %vm1065_vm11  ;;  %v5909_v36 = vld [vmem:[#allocation110_spill] sm:$0xff]  ;;  %vm5912_vm11 = vcmp.eq.s32.totalorder %v3970_v41, %v3877_v47  ;;  %v5915_v50 = vld [vmem:[#allocation41_spill] sm:$0xff]  ;;  %v937_v60 = vadd.f32 %v2677_v34, %v745_v49 }
 0x26a   : > { %vm1833_vm7 = vcmp.eq.s32.totalorder %v1793_v22, 1  ;;  %vm4218_vm13 = vmand %vm5912_vm11, %vm5911_vm0  ;;  %vm679_vm6 = vcmp.eq.s32.totalorder %v5915_v50, 1  ;;  %vm688_vm0 = vcmp.eq.s32.totalorder %v5916_v29, 1  ;;  %vm1449_vm11 = vcmp.eq.s32.totalorder %v3809_v42, 1  ;;  %v5935_v34 = vld [vmem:[#allocation131_spill] sm:$0xff]  ;;  %v5940_v29 = vld [vmem:[#allocation92_spill] sm:$0xff] }
 0x26b   : > { %vm4154_vm1 = vmand %vm1769_vm4, %vm1833_vm7  ;;  %1636 = vperm.xlu1 %2941, %v3141_v15   ;;  %v4159_v7 = vpop.permute.xlu1 %1911  ;;  %vm1582_vm4 = vcmp.eq.s32.totalorder %v3913_v30, %v3877_v47  ;;  %vm1257_vm7 = vcmp.eq.s32.totalorder %v5910_v33, 1  ;;  %v2693_v32 = vsel %vm4201_vm8, 1.0, %v5860_v11  ;;  %v2762_v1 = vsel %vm4218_vm13, 1.0, %v5860_v11  ;;  %v5925_v33 = vld [vmem:[#allocation74_spill] sm:$0xff]  ;;  %v5964_v49 = vld [vmem:[#allocation83_spill] sm:$0xff] }
 0x26c   : > { %vm4186_vm9 = vmand %vm1582_vm4, %vm5902_vm5  ;;  %vm608_vm4 = vcmp.eq.s32.totalorder %v5908_v4, %v3877_v47  ;;  %vm1193_vm5 = vcmp.eq.s32.totalorder %v5909_v36, %v3877_v47  ;;  %vm871_vm8 = vcmp.eq.s32.totalorder %v5923_v44, 1  ;;  %v5924_v36 = vld [vmem:[#allocation59_spill] sm:$0xff]  ;;  %v1129_v42 = vadd.f32 %v2693_v32, %v937_v60  ;;  %v5934_v4 = vld [vmem:[#allocation116_spill] sm:$0xff] }
 0x26d   : > { %v4190_v30 = vpop.permute.xlu0 %1731  ;;  %v2746_v41 = vsel %vm4186_vm9, 1.0, %v5860_v11  ;;  %vm4251_vm3 = vmand %vm1193_vm5, %vm1257_vm7  ;;  %vm1385_vm7 = vcmp.eq.s32.totalorder %v3758_v58, %v3877_v47  ;;  %vm5931_vm13 = vcmp.eq.s32.totalorder %v5917_v31, %v3877_v47  ;;  %v2127_v32 = vld [vmem:[%s4308_s10 + $0x40] sm:$0xff]  ;;  %v2757_v25 = vsel %vm4154_vm1, 1.0, %v5860_v11 }
 0x26e   : > { %vm4261_vm9 = vmand %vm5920_vm14, %vm679_vm6  ;;  %v1710_v46 = vadd.f32 %v2746_v41, %v1518_v63  ;;  %v2709_v22 = vsel %vm4251_vm3, 1.0, %v5860_v11  ;;  %vm5937_vm3 = vcmp.eq.s32.totalorder %v5924_v36, %v3877_v47  ;;  %v5945_v36 = vld [vmem:[#allocation69_spill] sm:$0xff]  ;;  %vm1391_vm1 = vcmp.eq.s32.totalorder %v3777_v23, %v3877_v47 }
 0x26f   : > { %2943 = vset.pattern.permute.xlu1 %v5822_v45  ;;  %v1936_v8 = vpop.permute.xlu1 %1935  ;;  %vm4273_vm6 = vmand %vm1385_vm7, %vm1449_vm11  ;;  %vm5669_vm11 = vcmask 523264   ;;  %v1321_v60 = vadd.f32 %v2709_v22, %v1129_v42  ;;  %v2659_v22 = vsel %vm4261_vm9, 1.0, %v5860_v11  ;;  %v5991_v23 = vld [vmem:[#allocation145_spill] sm:$0xff] }
 0x270   : > { %1926 = vperm.xlu1 %2943, %v3192_v12   ;;  %vm1966_vm14 = vcmp.eq.s32.totalorder %v1936_v8, %v3877_v47  ;;  %vm4284_vm5 = vmand %vm608_vm4, %vm688_vm0  ;;  %v1902_v8 = vadd.f32 %v2762_v1, %v1710_v46  ;;  %vm1199_vm4 = vcmp.eq.s32.totalorder %v5934_v4, %v3877_v47  ;;  %vm1263_vm0 = vcmp.eq.s32.totalorder %v5935_v34, 1  ;;  %v5958_v4 = vld [vmem:[#allocation93_spill] sm:$0xff] }
 0x271   : > { %v4236_v53 = vpop.permute.xlu0 %1819  ;;  %vm4297_vm10 = vmand %vm5931_vm13, %vm871_vm8  ;;  %vm1007_vm13 = vcmp.eq.s32.totalorder %v5940_v29, %v3877_v47  ;;  %v2725_v63 = vsel %vm4273_vm6, 1.0, %v5860_v11  ;;  %v4329_v12 = vadd.f32 %v2658_v52, %v4145_v0  ;;  %v751_v1 = vadd.f32 %v2667_v43, %v4180_v3  ;;  %v5949_v43 = vld [vmem:[#allocation78_spill] sm:$0xff]  ;;  %v5965_v29 = vld [vmem:[#allocation100_spill] sm:$0xff] }
 0x272   : > { %v1513_v52 = vadd.f32 %v2725_v63, %v1321_v60  ;;  %vm1455_vm6 = vcmp.eq.s32.totalorder %v3843_v56, 1  ;;  %vm880_vm15 = vcmp.eq.s32.totalorder %v5949_v43, 1  ;;  %v2675_v58 = vsel %vm4297_vm10, 1.0, %v5860_v11 }
 0x273   : > { %v2000_v16 = vpop.permute.xlu1 %1999  ;;  %vm5976_vm10 = vcmp.eq.s32.totalorder %v5965_v29, 1  ;;  %v2738_v43 = vsel %vm3885_vm2, 1.0, %v5860_v11 }
 0x274   : > { %vm2030_vm12 = vcmp.eq.s32.totalorder %v2000_v16, 1  ;;  %1990 = vperm.xlu1 %2943, %v3070_v24   ;;  %v5944_v16 = vld [vmem:[#allocation51_spill] sm:$0xff] }
 0x275   : > { %vm2046_vm7 = vmand %vm1966_vm14, %vm2030_vm12  ;;  %v1759_v50 = vpop.permute.xlu0 %1758  ;;  %vm5936_vm12 = vcmp.eq.s32.totalorder %v5925_v33, 1 }
 0x276   : > { %v2778_v41 = vsel %vm2046_vm7, 1.0, %v5860_v11  ;;  %vm4316_vm8 = vmand %vm5937_vm3, %vm5936_vm12  ;;  %vm5941_vm7 = vcmp.eq.s32.totalorder %v5930_v27, 1 }
 0x277   : > { %v2094_v31 = vadd.f32 %v2778_v41, %v1902_v8  ;;  %vm4334_vm12 = vmand %vm1007_vm13, %vm5941_vm7  ;;  %vm5668_vm7 = vcmask 64512   ;;  %v2683_v3 = vsel %vm4316_vm8, 1.0, %v5860_v11  ;;  %vm5950_vm8 = vcmp.eq.s32.totalorder %v1759_v50, %v3877_v47  ;;  %v5957_v8 = vld [vmem:[#allocation64_spill] sm:$0xff]  ;;  %v5963_v41 = vld [vmem:[#allocation81_spill] sm:$0xff] }
 0x278   : > { %2014 = vperm.xlu1 %2943, %v3126_v62   ;;  %v1601_v46 = vpop.permute.xlu1 %1600  ;;  %vm4348_vm13 = vmand %vm1199_vm4, %vm1263_vm0  ;;  %vm5948_vm4 = vcmp.eq.s32.totalorder %v3840_v39, %v3877_v47  ;;  %v2699_v33 = vsel %vm4334_vm12, 1.0, %v5860_v11  ;;  %vm1583_vm12 = vcmp.eq.s32.totalorder %v3865_v20, %v3877_v47  ;;  %v943_v50 = vadd.f32 %v2683_v3, %v751_v1  ;;  %v5968_v1 = vld [vmem:[#allocation88_spill] sm:$0xff]  ;;  %v5981_v3 = vld [vmem:[#allocation130_spill] sm:$0xff] }
 0x279   : > { %2111 = vst.msk [vmem:[#allocation2 + $0x40] sm:$0xff] %vm5669_vm11, %v2094_v31  ;;  %vm1641_vm3 = vcmp.eq.s32.totalorder %v1601_v46, 1  ;;  %v1823_v62 = vpop.permute.xlu0 %1822  ;;  %v2715_v56 = vsel %vm4348_vm13, 1.0, %v5860_v11  ;;  %v5972_v46 = vld [vmem:[#allocation124_spill] sm:$0xff]  ;;  %v5996_v31 = vld [vmem:[#allocation125_spill] sm:$0xff] }
 0x27a   : > { %2144 = vst.msk [vmem:[#allocation2 + $0x40] sm:$0xff] %vm5668_vm7, %v2127_v32  ;;  %vm1657_vm0 = vmand %vm5948_vm4, %vm1641_vm3  ;;  %vm1843_vm14 = vcmp.eq.s32.totalorder %v1823_v62, 1  ;;  %vm5953_vm3 = vcmp.eq.s32.totalorder %v5945_v36, 1  ;;  %vm5954_vm4 = vcmp.eq.s32.totalorder %v5944_v16, %v3877_v47  ;;  %v1135_v63 = vadd.f32 %v2699_v33, %v943_v50  ;;  %v5984_v33 = vld [vmem:[#allocation115_spill] sm:$0xff]  ;;  %v2128_v36 = vld [vmem:[%s4308_s10 + $0x48] sm:$0xff] }
 0x27b   : > { %v2741_v42 = vsel %vm1657_vm0, 1.0, %v5860_v11  ;;  %vm4371_vm7 = vmand %vm5950_vm8, %vm1843_vm14  ;;  %vm1647_vm14 = vcmp.eq.s32.totalorder %v3964_v40, 1  ;;  %vm816_vm0 = vcmp.eq.s32.totalorder %v5957_v8, %v3877_v47  ;;  %vm1062_vm8 = vcmp.eq.s32.totalorder %v5958_v4, 1  ;;  %v5971_v40 = vld [vmem:[#allocation103_spill] sm:$0xff]  ;;  %v5990_v4 = vld [vmem:[#allocation140_spill] sm:$0xff] }
 0x27c   : > { %vm4380_vm11 = vmand %vm5954_vm4, %vm5953_vm3  ;;  %v1705_v54 = vadd.f32 %v2741_v42, %v1513_v52  ;;  %2944 = vset.pattern.permute.xlu1 %v5828_v13  ;;  %vm1839_vm4 = vcmp.eq.s32.totalorder %v3982_v38, 1  ;;  %v2668_v32 = vsel %vm4284_vm5, 1.0, %v5860_v11  ;;  %vm1255_vm5 = vcmp.eq.s32.totalorder %v5972_v46, 1  ;;  %v6027_v46 = vld [vmem:[#allocation5_spill] sm:$0xff] }
 0x27d   : > { %vm4398_vm3 = vmand %vm1391_vm1, %vm1455_vm6  ;;  %1761 = vperm.xlu1 %2944, %v3219_v57   ;;  %v4403_v34 = vpop.permute.xlu1 %1914  ;;  %v4405_v13 = vpop.permute.xlu0 %1737  ;;  %vm1008_vm1 = vcmp.eq.s32.totalorder %v5968_v1, %v3877_v47  ;;  %vm1072_vm6 = vcmp.eq.s32.totalorder %v5971_v40, 1  ;;  %v2674_v60 = vsel %vm4380_vm11, 1.0, %v5860_v11  ;;  %v1327_v16 = vadd.f32 %v2715_v56, %v1135_v63  ;;  %v5995_v63 = vld [vmem:[#allocation159_spill] sm:$0xff] }
 0x27e   : > { %vm4409_vm9 = vmand %vm816_vm0, %vm880_vm15  ;;  %v4419_v57 = vadd.f32 %v2757_v25, %v1705_v54  ;;  %vm998_vm15 = vcmp.eq.s32.totalorder %v5964_v49, %v3877_v47  ;;  %v2731_v20 = vsel %vm4398_vm3, 1.0, %v5860_v11  ;;  %v743_v62 = vadd.f32 %v2659_v22, %v4051_v55  ;;  %v5985_v25 = vld [vmem:[#allocation150_spill] sm:$0xff]  ;;  %v5992_v49 = vld [vmem:[#allocation139_spill] sm:$0xff] }
 0x27f   : > { %vm4431_vm13 = vmand %vm1583_vm12, %vm1647_vm14  ;;  %vm5973_vm12 = vcmp.eq.s32.totalorder %v3977_v14, %v3877_v47  ;;  %vm5977_vm11 = vcmp.eq.s32.totalorder %v5963_v41, %v3877_v47  ;;  %v5980_v14 = vld [vmem:[#allocation108_spill] sm:$0xff]  ;;  %v752_v55 = vadd.f32 %v2668_v32, %v4192_v21  ;;  %v1519_v42 = vadd.f32 %v2731_v20, %v1327_v16 }
 0x280   : > { %vm4442_vm0 = vmand %vm998_vm15, %vm1062_vm8  ;;  %vm1190_vm3 = vcmp.eq.s32.totalorder %v5980_v14, %v3877_v47  ;;  %v2747_v52 = vsel %vm4431_vm13, 1.0, %v5860_v11  ;;  %v935_v39 = vadd.f32 %v2675_v58, %v743_v62  ;;  %v934_v54 = vadd.f32 %v2674_v60, %v4329_v12  ;;  %v6000_v58 = vld [vmem:[#allocation146_spill] sm:$0xff] }
 0x281   : > { %vm4462_vm14 = vmand %vm5973_vm12, %vm1839_vm4  ;;  %1801 = vperm.xlu1 %2944, %v3088_v37   ;;  %v1939_v24 = vpop.permute.xlu1 %1938  ;;  %v4467_v0 = vpop.permute.xlu0 %1825  ;;  %vm1254_vm4 = vcmp.eq.s32.totalorder %v5981_v3, 1  ;;  %vm1191_vm12 = vcmp.eq.s32.totalorder %v5984_v33, %v3877_v47  ;;  %v2684_v21 = vsel %vm4409_vm9, 1.0, %v5860_v11  ;;  %v2690_v50 = vsel %vm4442_vm0, 1.0, %v5860_v11  ;;  %v6001_v60 = vld [vmem:[#allocation158_spill] sm:$0xff] }
 0x282   : > { %vm4475_vm8 = vmand %vm5977_vm11, %vm5976_vm10  ;;  %vm1446_vm10 = vcmp.eq.s32.totalorder %v5985_v25, 1  ;;  %v2763_v8 = vsel %vm4462_vm14, 1.0, %v5860_v11  ;;  %v1711_v10 = vadd.f32 %v2747_v52, %v1519_v42  ;;  %vm1967_vm11 = vcmp.eq.s32.totalorder %v1939_v24, %v3877_v47 }
 0x283   : > { %vm4491_vm15 = vmand %vm1008_vm1, %vm1072_vm6  ;;  %vm1382_vm1 = vcmp.eq.s32.totalorder %v5991_v23, %v3877_v47  ;;  %v944_v32 = vadd.f32 %v2684_v21, %v752_v55  ;;  %v1126_v20 = vadd.f32 %v2690_v50, %v934_v54  ;;  %v2691_v62 = vsel %vm4475_vm8, 1.0, %v5860_v11  ;;  %v6034_v55 = vld [vmem:[#allocation7_spill] sm:$0xff] }
 0x284   : > { %vm4504_vm13 = vmand %vm1191_vm12, %vm1255_vm5  ;;  %vm1392_vm12 = vcmp.eq.s32.totalorder %v6000_v58, %v3877_v47  ;;  %v2700_v38 = vsel %vm4491_vm15, 1.0, %v5860_v11  ;;  %vm1648_vm8 = vcmp.eq.s32.totalorder %v3898_v28, 1  ;;  %v1127_v33 = vadd.f32 %v2691_v62, %v935_v39  ;;  %v6019_v39 = vld [vmem:[#allocation4_spill] sm:$0xff] }
 0x285   : > { %vm4514_vm6 = vmand %vm1190_vm3, %vm1254_vm4  ;;  %1740 = vperm.xlu1 %2944, %v3200_v17   ;;  %v2003_v56 = vpop.permute.xlu1 %2002  ;;  %v1765_v41 = vpop.permute.xlu0 %1764  ;;  %vm1200_vm4 = vcmp.eq.s32.totalorder %v5996_v31, %v3877_v47  ;;  %v1903_v17 = vadd.f32 %v2763_v8, %v1711_v10  ;;  %v6020_v31 = vld [vmem:[#allocation40_spill] sm:$0xff] }
 0x286   : > { %vm4526_vm0 = vmand %vm1382_vm1, %vm1446_vm10  ;;  %vm2031_vm3 = vcmp.eq.s32.totalorder %v2003_v56, 1  ;;  %v2706_v1 = vsel %vm4514_vm6, 1.0, %v5860_v11  ;;  %vm5997_vm10 = vcmp.eq.s32.totalorder %v5990_v4, 1  ;;  %vm1781_vm14 = vcmp.eq.s32.totalorder %v1765_v41, %v3877_v47 }
 0x287   : > { %vm2047_vm9 = vmand %vm1967_vm11, %vm2031_vm3  ;;  %vm1456_vm11 = vcmp.eq.s32.totalorder %v6001_v60, 1  ;;  %vm6002_vm3 = vcmp.eq.s32.totalorder %v5995_v63, 1  ;;  %vm6003_vm6 = vcmp.eq.s32.totalorder %v5992_v49, %v3877_v47  ;;  %v2722_v14 = vsel %vm4526_vm0, 1.0, %v5860_v11  ;;  %v2120_v60 = vld [vmem:[%s4308_s10 + $0x8] sm:$0xff] }
 0x288   : > { %vm4542_vm1 = vmand %vm1200_vm4, %vm5997_vm10  ;;  %v2779_v40 = vsel %vm2047_vm9, 1.0, %v5860_v11  ;;  %vm6006_vm4 = vcmp.eq.s32.totalorder %v3975_v48, 1  ;;  %vm6007_vm10 = vcmp.eq.s32.totalorder %v3966_v26, %v3877_v47  ;;  %v1318_v52 = vadd.f32 %v2706_v1, %v1126_v20  ;;  %v6026_v20 = vld [vmem:[#allocation71_spill] sm:$0xff] }
 0x289   : > { %vm4556_vm5 = vmand %vm6003_vm6, %vm6002_vm3  ;;  %v2095_v16 = vadd.f32 %v2779_v40, %v1903_v17  ;;  %1804 = vperm.xlu1 %2944, %v3085_v35   ;;  %v1829_v24 = vpop.permute.xlu0 %1828  ;;  %vm1584_vm0 = vcmp.eq.s32.totalorder %v3926_v59, %v3877_v47  ;;  %vm6010_vm9 = vcmask 523264   ;;  %v6011_v26 = vmov 0  ;;  %v6025_v40 = vld [vmem:[#allocation28_spill] sm:$0xff] }
 0x28a   : > { %vm4574_vm3 = vmand %vm6007_vm10, %vm6006_vm4  ;;  %v4578_v35 = vpop.permute.xlu1 %1725  ;;  %vm1845_vm6 = vcmp.eq.s32.totalorder %v1829_v24, 1  ;;  %v2707_v48 = vsel %vm4504_vm13, 1.0, %v5860_v11  ;;  %vm6015_vm10 = vcmask 64512   ;;  %v2716_v25 = vsel %vm4542_vm1, 1.0, %v5860_v11  ;;  %v6029_v24 = vld [vmem:[#allocation95_spill] sm:$0xff] }
 0x28b   : > { %2112 = vst.msk [vmem:[#allocation2 + $0x48] sm:$0xff] %vm6010_vm9, %v2095_v16  ;;  %vm4589_vm4 = vmand %vm1781_vm14, %vm1845_vm6  ;;  %vm1575_vm9 = vcmp.eq.s32.totalorder %v3873_v9, %v3877_v47  ;;  %vm1831_vm14 = vcmp.eq.s32.totalorder %v4012_v5, 1  ;;  %v1510_v42 = vadd.f32 %v2722_v14, %v1318_v52  ;;  %vm6016_vm13 = vcmp.eq.s32.totalorder %v3892_v51, 1  ;;  %v6033_v52 = vld [vmem:[#allocation132_spill] sm:$0xff] }
 0x28c   : > { %v6012_v26 = vsel %vm4589_vm4, 4294967295, %v6011_v26  ;;  %vm4601_vm15 = vmand %vm1392_vm12, %vm1456_vm11  ;;  %2145 = vst.msk [vmem:[#allocation2 + $0x48] sm:$0xff] %vm6015_vm10, %v2128_v36  ;;  %v1136_v9 = vadd.f32 %v2700_v38, %v944_v32  ;;  %v2723_v6 = vsel %vm4556_vm5, 1.0, %v5860_v11  ;;  %v2754_v51 = vsel %vm4574_vm3, 1.0, %v5860_v11  ;;  %v6022_v32 = vld [vmem:[#allocation14_spill] sm:$0xff]  ;;  %v6028_v36 = vld [vmem:[#allocation56_spill] sm:$0xff] }
 0x28d   : > { %vm4617_vm12 = vmand %vm1575_vm9, %vm6016_vm13  ;;  %2946 = vset.pattern.permute.xlu1 %v5822_v45  ;;  %vm1767_vm1 = vcmp.eq.s32.totalorder %v3980_v2, %v3877_v47  ;;  %v1319_v22 = vadd.f32 %v2707_v48, %v1127_v33  ;;  %v2732_v28 = vsel %vm4601_vm15, 1.0, %v5860_v11  ;;  %v1702_v8 = vadd.f32 %v2738_v43, %v1510_v42  ;;  %v6032_v38 = vld [vmem:[#allocation85_spill] sm:$0xff]  ;;  %v6036_v33 = vld [vmem:[#allocation152_spill] sm:$0xff] }
 0x28e   : > { %vm1664_vm2 = vmand %vm1584_vm0, %vm1648_vm8  ;;  %1929 = vperm.xlu1 %2946, %v6019_v39   ;;  %v4636_v45 = vpop.permute.xlu1 %1789  ;;  %v1976_v21 = vpop.permute.xlu0 %1975  ;;  %v1328_v59 = vadd.f32 %v2716_v25, %v1136_v9  ;;  %v2739_v2 = vsel %vm4617_vm12, 1.0, %v5860_v11  ;;  %vm1958_vm3 = vcmp.eq.s32.totalorder %v4159_v7, %v3877_v47  ;;  %vm1776_vm6 = vcmp.eq.s32.totalorder %v4014_v18, %v3877_v47  ;;  %v2119_v7 = vld [vmem:[%s4308_s10] sm:$0xff]  ;;  %v6037_v42 = vld [vmem:[#allocation10_spill] sm:$0xff] }
 0x28f   : > { %vm1847_vm5 = vmand %vm1767_vm1, %vm1831_vm14  ;;  %vm2022_vm11 = vcmp.eq.s32.totalorder %v1976_v21, 1  ;;  %v1511_v50 = vadd.f32 %v2723_v6, %v1319_v22  ;;  %v2748_v12 = vsel %vm1664_vm2, 1.0, %v5860_v11  ;;  %v1894_v4 = vadd.f32 %v2754_v51, %v1702_v8  ;;  %v6024_v18 = vld [vmem:[#allocation3_spill] sm:$0xff]  ;;  %v6041_v22 = vld [vmem:[#allocation16_spill] sm:$0xff] }
 0x290   : > { %vm2038_vm8 = vmand %vm1958_vm3, %vm2022_vm11  ;;  %v1520_v5 = vadd.f32 %v2732_v28, %v1328_v59  ;;  %v2755_v23 = vsel %vm1847_vm5, 1.0, %v5860_v11  ;;  %vm1959_vm9 = vcmp.eq.s32.totalorder %v4403_v34, %v3877_v47  ;;  %vm680_vm10 = vcmp.eq.s32.totalorder %v6020_v31, 1  ;;  %v6039_v9 = vld [vmem:[#allocation11_spill] sm:$0xff] }
 0x291   : > { %v2770_v10 = vsel %vm2038_vm8, 1.0, %v5860_v11  ;;  %v1703_v49 = vadd.f32 %v2739_v2, %v1511_v50  ;;  %vm6021_vm13 = vcmask 523264   ;;  %vm456_vm2 = vcmp.eq.s32.totalorder %v6022_v32, %v3877_v47  ;;  %v6040_v51 = vld [vmem:[#allocation147_spill] sm:$0xff] }
 0x292   : > { %1993 = vperm.xlu1 %2946, %v3088_v37   ;;  %v1814_v56 = vpop.permute.xlu1 %1813  ;;  %v1979_v41 = vpop.permute.xlu0 %1978  ;;  %v2086_v29 = vadd.f32 %v2770_v10, %v1894_v4  ;;  %v1712_v63 = vadd.f32 %v2748_v12, %v1520_v5  ;;  %vm6023_vm1 = vcmask 64512   ;;  %vm600_vm5 = vcmp.eq.s32.totalorder %v6025_v40, %v3877_v47  ;;  %v6045_v50 = vld [vmem:[#allocation167_spill] sm:$0xff]  ;;  %v6046_v5 = vld [vmem:[#allocation12_spill] sm:$0xff] }
 0x293   : > { %vm1840_vm0 = vcmp.eq.s32.totalorder %v1814_v56, 1  ;;  %vm2023_vm15 = vcmp.eq.s32.totalorder %v1979_v41, 1  ;;  %v1895_v17 = vadd.f32 %v2755_v23, %v1703_v49  ;;  %vm872_vm11 = vcmp.eq.s32.totalorder %v6026_v20, 1  ;;  %v6047_v23 = vld [vmem:[#allocation38_spill] sm:$0xff]  ;;  %v6051_v49 = vld [vmem:[#allocation24_spill] sm:$0xff]  ;;  %v6055_v31 = vld [vmem:[#allocation63_spill] sm:$0xff] }
 0x294   : > { %vm1856_vm14 = vmand %vm1776_vm6, %vm1840_vm0  ;;  %2103 = vst.msk [vmem:[#allocation2] sm:$0xff] %vm6021_vm13, %v2086_v29  ;;  %vm344_vm3 = vcmp.eq.s32.totalorder %v6027_v46, %v3877_v47  ;;  %v2644_v16 = vsel %vm456_vm2, 1.0, %v5860_v11  ;;  %vm808_vm8 = vcmp.eq.s32.totalorder %v6028_v36, %v3877_v47  ;;  %vm1064_vm0 = vcmp.eq.s32.totalorder %v6029_v24, 1  ;;  %v6060_v40 = vld [vmem:[#allocation36_spill] sm:$0xff]  ;;  %v6063_v46 = vld [vmem:[#allocation111_spill] sm:$0xff] }
 0x295   : > { %v2764_v37 = vsel %vm1856_vm14, 1.0, %v5860_v11  ;;  %vm2039_vm12 = vmand %vm1959_vm9, %vm2023_vm15  ;;  %2136 = vst.msk [vmem:[#allocation2] sm:$0xff] %vm6023_vm1, %v2119_v7  ;;  %v2628_v14 = vsel %vm344_vm3, 1.0, %v5860_v11  ;;  %vm346_vm2 = vcmp.eq.s32.totalorder %v6034_v55, %v3877_v47  ;;  %v2160_v7 = vld [vmem:[#allocation2 + $0x40] sm:$0xff]  ;;  %v6061_v20 = vld [vmem:[#allocation48_spill] sm:$0xff] }
 0x296   : > { %v4666_v1 = vadd.f32 %v2764_v37, %v1712_v63  ;;  %v2771_v34 = vsel %vm2039_vm12, 1.0, %v5860_v11  ;;  %2017 = vperm.xlu1 %2946, %v6024_v18   ;;  %v4670_v44 = vpop.permute.xlu1 %1752  ;;  %vm696_vm6 = vmand %vm600_vm5, %vm680_vm10  ;;  %vm1000_vm10 = vcmp.eq.s32.totalorder %v6032_v38, %v3877_v47  ;;  %v504_v48 = vadd.f32 %v2644_v16, %v2628_v14  ;;  %v6054_v63 = vld [vmem:[#allocation22_spill] sm:$0xff]  ;;  %v6064_v24 = vld [vmem:[#allocation23_spill] sm:$0xff] }
 0x297   : > { %v2087_v58 = vadd.f32 %v2771_v34, %v1895_v17  ;;  %vm6030_vm15 = vmmov %vm6021_vm13  ;;  %v2660_v3 = vsel %vm696_vm6, 1.0, %v5860_v11  ;;  %vm1256_vm13 = vcmp.eq.s32.totalorder %v6033_v52, 1  ;;  %vm1448_vm5 = vcmp.eq.s32.totalorder %v6036_v33, 1  ;;  %v6056_v17 = vld [vmem:[#allocation77_spill] sm:$0xff]  ;;  %v6067_v52 = vld [vmem:[#allocation96_spill] sm:$0xff]  ;;  %v1942_v33 = vpop.permute.xlu0 %1941 }
 0x298   : > { %vm888_vm9 = vmand %vm808_vm8, %vm872_vm11  ;;  %vm353_vm11 = vcmp.eq.s32.totalorder %v6037_v42, %v3877_v47  ;;  %v744_v54 = vadd.f32 %v2660_v3, %v504_v48  ;;  %vm355_vm8 = vcmp.eq.s32.totalorder %v6039_v9, %v3877_v47  ;;  %v2630_v21 = vsel %vm346_vm2, 1.0, %v5860_v11  ;;  %v6068_v48 = vld [vmem:[#allocation120_spill] sm:$0xff]  ;;  %v6069_v55 = vld [vmem:[#allocation135_spill] sm:$0xff] }
 0x299   : > { %2104 = vst.msk [vmem:[#allocation2 + $0x8] sm:$0xff] %vm6030_vm15, %v2087_v58  ;;  %vm6031_vm14 = vmmov %vm6023_vm1  ;;  %v2676_v43 = vsel %vm888_vm9, 1.0, %v5860_v11  ;;  %vm458_vm9 = vcmp.eq.s32.totalorder %v6041_v22, %v3877_v47  ;;  %v4726_v59 = vsel %vm353_vm11, 1.0, %v5860_v11  ;;  %v2639_v4 = vsel %vm355_vm8, 1.0, %v5860_v11  ;;  %v6070_v42 = vld [vmem:[#allocation49_spill] sm:$0xff] }
 0x29a   : > { %2137 = vst.msk [vmem:[#allocation2 + $0x8] sm:$0xff] %vm6031_vm14, %v2120_v60  ;;  %1956 = vperm.xlu1 %2946, %v3229_v61   ;;  %v4687_v62 = vpop.permute.xlu1 %1816  ;;  %vm1080_vm12 = vmand %vm1000_vm10, %vm1064_vm0  ;;  %v6035_v61 = vld [vmem:[#allocation117_spill] sm:$0xff]  ;;  %vm1384_vm0 = vcmp.eq.s32.totalorder %v6040_v51, %v3877_v47  ;;  %v936_v28 = vadd.f32 %v2676_v43, %v744_v54  ;;  %vm354_vm2 = vcmp.eq.s32.totalorder %v6046_v5, %v3877_v47  ;;  %v2646_v41 = vsel %vm458_vm9, 1.0, %v5860_v11  ;;  %v6074_v51 = vld [vmem:[#allocation164_spill] sm:$0xff] }
 0x29b   : > { %vm1192_vm1 = vcmp.eq.s32.totalorder %v6035_v61, %v3877_v47  ;;  %vm6038_vm6 = vmmov %vm6030_vm15  ;;  %v2692_v6 = vsel %vm1080_vm12, 1.0, %v5860_v11  ;;  %vm1640_vm15 = vcmp.eq.s32.totalorder %v4084_v19, 1  ;;  %vm1832_vm12 = vcmp.eq.s32.totalorder %v4636_v45, 1  ;;  %v6073_v9 = vld [vmem:[#allocation29_spill] sm:$0xff] }
 0x29c   : > { %v2152_v25 = vld [vmem:[#allocation2] sm:$0xff]  ;;  %vm1272_vm3 = vmand %vm1192_vm1, %vm1256_vm13  ;;  %vm1576_vm13 = vcmp.eq.s32.totalorder %v6045_v50, %v3877_v47  ;;  %vm611_vm1 = vcmp.eq.s32.totalorder %v6047_v23, %v3877_v47  ;;  %v1128_v10 = vadd.f32 %v2692_v6, %v936_v28  ;;  %vm1768_vm8 = vcmp.eq.s32.totalorder %v4578_v35, %v3877_v47  ;;  %v2161_v35 = vld [vmem:[#allocation2 + $0x48] sm:$0xff] }
 0x29d   : > { %2844 = vmatprep.mubr.msk.f32.mxu0 %vm6038_vm6, %v2152_v25  ;;  %vm4718_vm10 = vmand %vm1384_vm0, %vm1448_vm5  ;;  %v2708_v2 = vsel %vm1272_vm3, 1.0, %v5860_v11  ;;  %vm467_vm3 = vcmp.eq.s32.totalorder %v6051_v49, %v3877_v47  ;;  %vm465_vm0 = vcmp.eq.s32.totalorder %v6054_v63, %v3877_v47  ;;  %vm883_vm9 = vcmp.eq.s32.totalorder %v6056_v17, 1  ;;  %v6075_v22 = vld [vmem:[#allocation37_spill] sm:$0xff]  ;;  %v6087_v63 = vld [vmem:[#allocation80_spill] sm:$0xff] }
 0x29e   : > { %2020 = vperm.xlu1 %2946, %v3141_v15   ;;  %v6042_v15 = vld [vmem:[#allocation50_spill] sm:$0xff]  ;;  %vm4739_vm5 = vmand %vm1576_vm13, %vm1640_vm15  ;;  %v2724_v19 = vsel %vm4718_vm10, 1.0, %v5860_v11  ;;  %vm819_vm15 = vcmp.eq.s32.totalorder %v6055_v31, %v3877_v47  ;;  %v1320_v37 = vadd.f32 %v2708_v2, %v1128_v10  ;;  %v4774_v18 = vsel %vm354_vm2, 1.0, %v5860_v11  ;;  %v2121_v23 = vld [vmem:[%s4308_s10 + $0x10] sm:$0xff] }
 0x29f   : > { %v4710_v39 = vpop.permute.xlu1 %1627  ;;  %vm691_vm14 = vcmp.eq.s32.totalorder %v6042_v15, 1  ;;  %vm6050_vm11 = vmmov %vm6038_vm6  ;;  %vm610_vm13 = vcmp.eq.s32.totalorder %v6060_v40, %v3877_v47  ;;  %v2740_v45 = vsel %vm4739_vm5, 1.0, %v5860_v11  ;;  %v4783_v58 = vadd.f32 %v2646_v41, %v2630_v21  ;;  %v6078_v2 = vld [vmem:[#allocation42_spill] sm:$0xff]  ;;  %v6082_v56 = vld [vmem:[#allocation61_spill] sm:$0xff] }
 0x2a0   : > { %vm4749_vm6 = vmand %vm611_vm1, %vm691_vm14  ;;  %vm690_vm1 = vcmp.eq.s32.totalorder %v6061_v20, 1  ;;  %v2655_v60 = vsel %vm467_vm3, 1.0, %v5860_v11  ;;  %vm1075_vm2 = vcmp.eq.s32.totalorder %v6063_v46, 1  ;;  %v1512_v16 = vadd.f32 %v2724_v19, %v1320_v37  ;;  %v6083_v41 = vld [vmem:[#allocation76_spill] sm:$0xff]  ;;  %v6091_v37 = vld [vmem:[#allocation109_spill] sm:$0xff]  ;;  %v1945_v20 = vpop.permute.xlu0 %1944 }
 0x2a1   : > { %v2153_v12 = vld [vmem:[#allocation2 + $0x8] sm:$0xff]  ;;  %vm4765_vm14 = vmand %vm1768_vm8, %vm1832_vm12  ;;  %v2653_v36 = vsel %vm465_vm0, 1.0, %v5860_v11  ;;  %v2671_v14 = vsel %vm4749_vm6, 1.0, %v5860_v11  ;;  %vm1011_vm8 = vcmp.eq.s32.totalorder %v6067_v52, %v3877_v47  ;;  %vm1203_vm6 = vcmp.eq.s32.totalorder %v6068_v48, %v3877_v47  ;;  %v6093_v40 = vld [vmem:[#allocation66_spill] sm:$0xff] }
 0x2a2   : > { %2845 = vmatmul.mubr.msk.f32.vlgmr.msra.gmra.mrb[0].mxu0 %vm6050_vm11, %v2153_v12  ;;  %vm6059_vm10 = vmmov %vm6050_vm11  ;;  %v2756_v3 = vsel %vm4765_vm14, 1.0, %v5860_v11  ;;  %vm1267_vm0 = vcmp.eq.s32.totalorder %v6069_v55, 1  ;;  %v1704_v43 = vadd.f32 %v2740_v45, %v1512_v16  ;;  %v515_v25 = vadd.f32 %v2655_v60, %v2639_v4  ;;  %v6081_v4 = vld [vmem:[#allocation156_spill] sm:$0xff]  ;;  %v2129_v46 = vld [vmem:[%s4308_s10 + $0x50] sm:$0xff] }
 0x2a3   : > { %2856 = vmatprep.mubr.msk.f32.mxu1 %vm6059_vm10, %v2160_v7  ;;  %vm6062_vm12 = vmmov %vm6059_vm10  ;;  %vm609_vm5 = vcmp.eq.s32.totalorder %v6075_v22, %v3877_v47  ;;  %v513_v19 = vadd.f32 %v2653_v36, %v4726_v59  ;;  %v6099_v36 = vld [vmem:[#allocation94_spill] sm:$0xff]  ;;  %v6102_v48 = vld [vmem:[#allocation73_spill] sm:$0xff] }
 0x2a4   : > { %v1918_v34 = vpop.permute.xlu1 %1917  ;;  %2857 = vmatmul.mubr.msk.f32.vlgmr.msra.gmra.mrb[0].mxu1 %vm6062_vm12, %v2161_v35  ;;  %vm899_vm11 = vmand %vm819_vm15, %vm883_vm9  ;;  %vm689_vm15 = vcmp.eq.s32.totalorder %v6070_v42, 1  ;;  %v1896_v21 = vadd.f32 %v2756_v3, %v1704_v43  ;;  %v755_v15 = vadd.f32 %v2671_v14, %v515_v25  ;;  %v6101_v14 = vld [vmem:[#allocation133_spill] sm:$0xff]  ;;  %v6105_v55 = vld [vmem:[#allocation166_spill] sm:$0xff] }
 0x2a5   : > { %vm4807_vm3 = vmand %vm610_vm13, %vm690_vm1  ;;  %vm1960_vm14 = vcmp.eq.s32.totalorder %v1918_v34, %v3877_v47  ;;  %vm602_vm13 = vcmp.eq.s32.totalorder %v6073_v9, %v3877_v47  ;;  %v2687_v6 = vsel %vm899_vm11, 1.0, %v5860_v11  ;;  %vm1459_vm1 = vcmp.eq.s32.totalorder %v6074_v51, 1  ;;  %v6107_v43 = vld [vmem:[#allocation58_spill] sm:$0xff]  ;;  %v6111_v54 = vld [vmem:[#allocation105_spill] sm:$0xff] }
 0x2a6   : > { %vm4819_vm9 = vmand %vm1011_vm8, %vm1075_vm2  ;;  %vm1968_vm11 = vcmp.eq.s32.totalorder %v1942_v33, %v3877_v47  ;;  %vm682_vm8 = vcmp.eq.s32.totalorder %v6078_v2, 1  ;;  %v947_v49 = vadd.f32 %v2687_v6, %v755_v15  ;;  %v2670_v35 = vsel %vm4807_vm3, 1.0, %v5860_v11  ;;  %v6108_v33 = vld [vmem:[#allocation163_spill] sm:$0xff]  ;;  %v6110_v42 = vld [vmem:[#allocation90_spill] sm:$0xff] }
 0x2a7   : > { %vm4835_vm2 = vmand %vm1203_vm6, %vm1267_vm0  ;;  %v2703_v12 = vsel %vm4819_vm9, 1.0, %v5860_v11  ;;  %vm1395_vm6 = vcmp.eq.s32.totalorder %v6081_v4, %v3877_v47  ;;  %vm6086_vm9 = vcmp.eq.s32.totalorder %v6064_v24, %v3877_v47  ;;  %vm6088_vm0 = vcmask 523264   ;;  %v6100_v24 = vld [vmem:[#allocation118_spill] sm:$0xff]  ;;  %v6138_v16 = vld [vmem:[#allocation119_spill] sm:$0xff] }
 0x2a8   : > { %v1982_v61 = vpop.permute.xlu1 %1981  ;;  %v2654_v7 = vsel %vm6086_vm9, 1.0, %v5860_v11  ;;  %v2719_v31 = vsel %vm4835_vm2, 1.0, %v5860_v11  ;;  %vm1073_vm2 = vcmp.eq.s32.totalorder %v6091_v37, 1  ;;  %v1139_v32 = vadd.f32 %v2703_v12, %v947_v49  ;;  %v6118_v28 = vld [vmem:[#allocation154_spill] sm:$0xff]  ;;  %v6124_v49 = vld [vmem:[#allocation97_spill] sm:$0xff] }
 0x2a9   : > { %vm2024_vm10 = vcmp.eq.s32.totalorder %v1982_v61, 1  ;;  %v2767_v6 = vsel %vm4371_vm7, 1.0, %v5860_v11  ;;  %v6119_v50 = vld [vmem:[#allocation142_spill] sm:$0xff] }
 0x2aa   : > { %vm2040_vm12 = vmand %vm1960_vm14, %vm2024_vm10  ;;  %vm881_vm10 = vcmp.eq.s32.totalorder %v6083_v41, 1  ;;  %v1331_v3 = vadd.f32 %v2719_v31, %v1139_v32  ;;  %vm1266_vm7 = vcmp.eq.s32.totalorder %v6119_v50, 1  ;;  %v6123_v41 = vld [vmem:[#allocation82_spill] sm:$0xff]  ;;  %v6128_v32 = vld [vmem:[#allocation148_spill] sm:$0xff] }
 0x2ab   : > { %v2772_v8 = vsel %vm2040_vm12, 1.0, %v5860_v11  ;;  %vm4844_vm14 = vmand %vm609_vm5, %vm689_vm15  ;;  %vm882_vm12 = vcmp.eq.s32.totalorder %v6087_v63, 1 }
 0x2ac   : > { %v2088_v5 = vadd.f32 %v2772_v8, %v1896_v21  ;;  %v2006_v10 = vpop.permute.xlu1 %2005  ;;  %vm4859_vm5 = vmand %vm1395_vm6, %vm1459_vm1  ;;  %v2669_v17 = vsel %vm4844_vm14, 1.0, %v5860_v11  ;;  %vm1009_vm14 = vcmp.eq.s32.totalorder %v6099_v36, %v3877_v47  ;;  %v514_v21 = vadd.f32 %v2654_v7, %v4774_v18  ;;  %v6139_v36 = vld [vmem:[#allocation141_spill] sm:$0xff] }
 0x2ad   : > { %vm2032_vm15 = vcmp.eq.s32.totalorder %v2006_v10, 1  ;;  %vm4880_vm6 = vmand %vm602_vm13, %vm682_vm8  ;;  %vm818_vm13 = vcmp.eq.s32.totalorder %v6093_v40, %v3877_v47  ;;  %v2735_v45 = vsel %vm4859_vm5, 1.0, %v5860_v11  ;;  %v753_v52 = vadd.f32 %v2669_v17, %v513_v19  ;;  %v6125_v19 = vld [vmem:[#allocation127_spill] sm:$0xff] }
 0x2ae   : > { %2105 = vst.msk [vmem:[#allocation2 + $0x10] sm:$0xff] %vm6088_vm0, %v2088_v5  ;;  %vm2048_vm1 = vmand %vm1968_vm11, %vm2032_vm15  ;;  %vm6092_vm0 = vcmask 64512   ;;  %vm6094_vm11 = vcmp.eq.s32.totalorder %v6082_v56, %v3877_v47  ;;  %vm1265_vm15 = vcmp.eq.s32.totalorder %v6101_v14, 1  ;;  %v1523_v25 = vadd.f32 %v2735_v45, %v1331_v3 }
 0x2af   : > { %2138 = vst.msk [vmem:[#allocation2 + $0x10] sm:$0xff] %vm6092_vm0, %v2121_v23  ;;  %v2780_v34 = vsel %vm2048_vm1, 1.0, %v5860_v11  ;;  %vm4900_vm8 = vmand %vm6094_vm11, %vm881_vm10  ;;  %vm6106_vm1 = vcmask 523264   ;;  %vm1457_vm11 = vcmp.eq.s32.totalorder %v6108_v33, 1  ;;  %vm1010_vm5 = vcmp.eq.s32.totalorder %v6110_v42, %v3877_v47  ;;  %v2122_v33 = vld [vmem:[%s4308_s10 + $0x18] sm:$0xff] }
 0x2b0   : > { %v2096_v60 = vadd.f32 %v2780_v34, %v4666_v1  ;;  %vm4911_vm3 = vmand %vm818_vm13, %vm882_vm12  ;;  %vm1587_vm12 = vcmp.eq.s32.totalorder %v6105_v55, %v3877_v47  ;;  %vm810_vm13 = vcmp.eq.s32.totalorder %v6107_v43, %v3877_v47  ;;  %v2685_v61 = vsel %vm4900_vm8, 1.0, %v5860_v11  ;;  %v6129_v34 = vld [vmem:[#allocation160_spill] sm:$0xff]  ;;  %v6144_v1 = vld [vmem:[#allocation153_spill] sm:$0xff] }
 0x2b1   : > { %v1631_v38 = vpop.permute.xlu1 %1630  ;;  %vm4923_vm9 = vmand %vm1009_vm14, %vm1073_vm2  ;;  %vm6109_vm2 = vcmask 64512   ;;  %vm1074_vm10 = vcmp.eq.s32.totalorder %v6111_v54, 1  ;;  %vm6115_vm8 = vcmp.eq.s32.totalorder %v6102_v48, 1  ;;  %v2662_v27 = vsel %vm4880_vm6, 1.0, %v5860_v11  ;;  %v6145_v43 = vld [vmem:[#allocation172_spill] sm:$0xff]  ;;  %v2131_v48 = vld [vmem:[%s4308_s10 + $0x60] sm:$0xff] }
 0x2b2   : > { %2113 = vst.msk [vmem:[#allocation2 + $0x50] sm:$0xff] %vm6106_vm1, %v2096_v60  ;;  %vm1651_vm0 = vcmp.eq.s32.totalorder %v1631_v38, 1  ;;  %vm6112_vm1 = vcmp.eq.s32.totalorder %v6100_v24, %v3877_v47  ;;  %v2701_v15 = vsel %vm4923_vm9, 1.0, %v5860_v11  ;;  %v945_v2 = vadd.f32 %v2685_v61, %v753_v52  ;;  %vm1090_vm6 = vmand %vm1010_vm5, %vm1074_vm10  ;;  %v6134_v60 = vld [vmem:[#allocation134_spill] sm:$0xff] }
 0x2b3   : > { %2146 = vst.msk [vmem:[#allocation2 + $0x50] sm:$0xff] %vm6109_vm2, %v2129_v46  ;;  %vm1667_vm14 = vmand %vm1587_vm12, %vm1651_vm0  ;;  %v2686_v18 = vsel %vm4911_vm3, 1.0, %v5860_v11  ;;  %v754_v23 = vadd.f32 %v2670_v35, %v514_v21  ;;  %vm1841_vm3 = vcmp.eq.s32.totalorder %v4687_v62, 1  ;;  %vm6122_vm9 = vcmask 523264   ;;  %v6135_v62 = vld [vmem:[#allocation170_spill] sm:$0xff] }
 0x2b4   : > { %vm4945_vm4 = vmand %vm6112_vm1, %vm1265_vm15  ;;  %v2751_v51 = vsel %vm1667_vm14, 1.0, %v5860_v11  ;;  %vm1393_vm15 = vcmp.eq.s32.totalorder %v6118_v28, %v3877_v47  ;;  %v1137_v29 = vadd.f32 %v2701_v15, %v945_v2  ;;  %vm1202_vm2 = vcmp.eq.s32.totalorder %v6125_v19, %v3877_v47  ;;  %v6149_v15 = vld [vmem:[#allocation168_spill] sm:$0xff] }
 0x2b5   : > { %vm4956_vm12 = vmand %vm810_vm13, %vm6115_vm8  ;;  %v1715_v8 = vadd.f32 %v2751_v51, %v1523_v25  ;;  %v2717_v10 = vsel %vm4945_vm4, 1.0, %v5860_v11  ;;  %vm1002_vm13 = vcmp.eq.s32.totalorder %v6123_v41, %v3877_v47  ;;  %v946_v63 = vadd.f32 %v2686_v18, %v754_v23  ;;  %v6146_v51 = vld [vmem:[#allocation171_spill] sm:$0xff] }
 0x2b6   : > { %vm4974_vm0 = vmand %vm1393_vm15, %vm1457_vm11  ;;  %v1921_v4 = vpop.permute.xlu1 %1920  ;;  %v2154_v5 = vld [vmem:[#allocation2 + $0x10] sm:$0xff]  ;;  %vm1066_vm11 = vcmp.eq.s32.totalorder %v6124_v49, 1  ;;  %v2678_v7 = vsel %vm4956_vm12, 1.0, %v5860_v11  ;;  %vm1777_vm10 = vcmp.eq.s32.totalorder %v4670_v44, %v3877_v47  ;;  %v2702_v17 = vsel %vm1090_vm6, 1.0, %v5860_v11  ;;  %v6157_v44 = vld [vmem:[#allocation6_spill] sm:$0xff] }
 0x2b7   : > { %2847 = vmatprep.mubr.msk.f32.mxu0 %vm6122_vm9, %v2154_v5  ;;  %v4988_v56 = vadd.f32 %v2767_v6, %v1715_v8  ;;  %vm5000_vm4 = vmand %vm1202_vm2, %vm1266_vm7  ;;  %v2733_v59 = vsel %vm4974_vm0, 1.0, %v5860_v11  ;;  %v1329_v37 = vadd.f32 %v2717_v10, %v1137_v29  ;;  %vm1394_vm5 = vcmp.eq.s32.totalorder %v6128_v32, %v3877_v47  ;;  %v1988_v32 = vpop.permute.xlu0 %1987 }
 0x2b8   : > { %vm1458_vm14 = vcmp.eq.s32.totalorder %v6129_v34, 1  ;;  %vm5015_vm1 = vmand %vm1777_vm10, %vm1841_vm3  ;;  %vm1258_vm12 = vcmp.eq.s32.totalorder %v6134_v60, 1  ;;  %vm6136_vm15 = vnez %v6135_v62  ;;  %vm1961_vm7 = vcmp.eq.s32.totalorder %v1921_v4, %v3877_v47  ;;  %v6158_v60 = vld [vmem:[#allocation17_spill] sm:$0xff]  ;;  %v6159_v62 = vld [vmem:[#allocation32_spill] sm:$0xff] }
 0x2b9   : > { %vm5024_vm8 = vmand %vm1002_vm13, %vm1066_vm11  ;;  %v2749_v46 = vsel %vm6136_vm15, 1.0, %v5860_v11  ;;  %vm1194_vm3 = vcmp.eq.s32.totalorder %v6138_v16, %v3877_v47  ;;  %v1521_v24 = vadd.f32 %v2733_v59, %v1329_v37  ;;  %vm1650_vm13 = vcmp.eq.s32.totalorder %v4710_v39, 1  ;;  %v6160_v16 = vld [vmem:[#allocation55_spill] sm:$0xff] }
 0x2ba   : > { %v1985_v40 = vpop.permute.xlu1 %1984  ;;  %v2162_v45 = vld [vmem:[#allocation2 + $0x50] sm:$0xff]  ;;  %vm6137_vm6 = vmmov %vm6122_vm9  ;;  %vm1386_vm9 = vcmp.eq.s32.totalorder %v6139_v36, %v3877_v47  ;;  %v2718_v14 = vsel %vm5000_vm4, 1.0, %v5860_v11  ;;  %v2765_v38 = vsel %vm5015_vm1, 1.0, %v5860_v11  ;;  %vm1969_vm10 = vcmp.eq.s32.totalorder %v1945_v20, %v3877_v47  ;;  %v6161_v36 = vld [vmem:[#allocation70_spill] sm:$0xff] }
 0x2bb   : > { %vm2025_vm0 = vcmp.eq.s32.totalorder %v1985_v40, 1  ;;  %2859 = vmatprep.mubr.msk.f32.mxu1 %vm6137_vm6, %v2162_v45  ;;  %vm5047_vm2 = vmand %vm1394_vm5, %vm1458_vm14  ;;  %vm1450_vm15 = vcmp.eq.s32.totalorder %v6144_v1, 1  ;;  %v1713_v55 = vadd.f32 %v2749_v46, %v1521_v24  ;;  %vm1586_vm5 = vcmp.eq.s32.totalorder %v6145_v43, %v3877_v47  ;;  %v2123_v40 = vld [vmem:[%s4308_s10 + $0x20] sm:$0xff]  ;;  %v6154_v45 = vld [vmem:[#allocation44_spill] sm:$0xff] }
 0x2bc   : > { %vm2041_vm11 = vmand %vm1961_vm7, %vm2025_vm0  ;;  %v746_v42 = vadd.f32 %v2662_v27, %v4783_v58  ;;  %v1138_v54 = vadd.f32 %v2702_v17, %v946_v63  ;;  %v2694_v9 = vsel %vm5024_vm8, 1.0, %v5860_v11  ;;  %v2734_v6 = vsel %vm5047_vm2, 1.0, %v5860_v11  ;;  %v2130_v27 = vld [vmem:[%s4308_s10 + $0x58] sm:$0xff]  ;;  %v6164_v43 = vld [vmem:[#allocation112_spill] sm:$0xff] }
 0x2bd   : > { %v2773_v52 = vsel %vm2041_vm11, 1.0, %v5860_v11  ;;  %vm5058_vm4 = vmand %vm1194_vm3, %vm1258_vm12  ;;  %vm1642_vm12 = vcmp.eq.s32.totalorder %v6146_v51, 1  ;;  %vm1578_vm3 = vcmp.eq.s32.totalorder %v6149_v15, %v3877_v47 }
 0x2be   : > { %v2089_v61 = vadd.f32 %v2773_v52, %v4419_v57  ;;  %v2009_v25 = vpop.permute.xlu1 %2008  ;;  %vm1666_vm14 = vmand %vm1586_vm5, %vm1650_vm13  ;;  %v1905_v57 = vadd.f32 %v2765_v38, %v1713_v55  ;;  %v938_v39 = vadd.f32 %v2678_v7, %v746_v42  ;;  %v1330_v58 = vadd.f32 %v2718_v14, %v1138_v54  ;;  %v6162_v14 = vld [vmem:[#allocation104_spill] sm:$0xff]  ;;  %v6163_v55 = vld [vmem:[#allocation89_spill] sm:$0xff] }
 0x2bf   : > { %vm2033_vm1 = vcmp.eq.s32.totalorder %v2009_v25, 1  ;;  %vm6147_vm7 = vmmov %vm6137_vm6  ;;  %vm6148_vm6 = vcmask 64512   ;;  %v2710_v22 = vsel %vm5058_vm4, 1.0, %v5860_v11  ;;  %v2750_v28 = vsel %vm1666_vm14, 1.0, %v5860_v11 }
 0x2c0   : > { %2106 = vst.msk [vmem:[#allocation2 + $0x18] sm:$0xff] %vm6147_vm7, %v2089_v61  ;;  %vm2049_vm0 = vmand %vm1969_vm10, %vm2033_vm1  ;;  %v1130_v2 = vadd.f32 %v2694_v9, %v938_v39  ;;  %v1522_v18 = vadd.f32 %v2734_v6, %v1330_v58  ;;  %vm1842_vm13 = vcmp.eq.s32.totalorder %v4236_v53, 1  ;;  %v6165_v61 = vld [vmem:[#allocation128_spill] sm:$0xff]  ;;  %v6167_v9 = vld [vmem:[#allocation161_spill] sm:$0xff] }
 0x2c1   : > { %vm1466_vm8 = vmand %vm1386_vm9, %vm1450_vm15  ;;  %2139 = vst.msk [vmem:[#allocation2 + $0x18] sm:$0xff] %vm6148_vm6, %v2122_v33  ;;  %v2781_v21 = vsel %vm2049_vm0, 1.0, %v5860_v11  ;;  %vm1770_vm15 = vcmp.eq.s32.totalorder %v4190_v30, %v3877_v47 }
 0x2c2   : > { %v2097_v8 = vadd.f32 %v2781_v21, %v1905_v57  ;;  %vm1658_vm9 = vmand %vm1578_vm3, %vm1642_vm12  ;;  %v2726_v12 = vsel %vm1466_vm8, 1.0, %v5860_v11  ;;  %v1322_v4 = vadd.f32 %v2710_v22, %v1130_v2  ;;  %v1714_v5 = vadd.f32 %v2750_v28, %v1522_v18  ;;  %v6170_v57 = vld [vmem:[#allocation149_spill] sm:$0xff] }
 0x2c3   : > { %v1756_v50 = vpop.permute.xlu1 %1755  ;;  %vm6150_vm11 = vmmov %vm6147_vm7  ;;  %v2742_v23 = vsel %vm1658_vm9, 1.0, %v5860_v11  ;;  %v6171_v2 = vld [vmem:[#allocation173_spill] sm:$0xff] }
 0x2c4   : > { %2114 = vst.msk [vmem:[#allocation2 + $0x58] sm:$0xff] %vm6150_vm11, %v2097_v8  ;;  %vm1778_vm2 = vcmp.eq.s32.totalorder %v1756_v50, %v3877_v47  ;;  %vm6151_vm10 = vmmov %vm6148_vm6  ;;  %v1514_v41 = vadd.f32 %v2726_v12, %v1322_v4  ;;  %vm683_vm6 = vcmp.eq.s32.totalorder %v6154_v45, 1  ;;  %vm459_vm11 = vcmp.eq.s32.totalorder %v6158_v60, %v3877_v47  ;;  %v1951_v12 = vpop.permute.xlu0 %1950 }
 0x2c5   : > { %2147 = vst.msk [vmem:[#allocation2 + $0x58] sm:$0xff] %vm6151_vm10, %v2130_v27  ;;  %vm1858_vm4 = vmand %vm1778_vm2, %vm1842_vm13  ;;  %vm347_vm13 = vcmp.eq.s32.totalorder %v6157_v44, %v3877_v47  ;;  %vm603_vm2 = vcmp.eq.s32.totalorder %v6159_v62, %v3877_v47  ;;  %v2647_v24 = vsel %vm459_vm11, 1.0, %v5860_v11  ;;  %vm6168_vm11 = vcmask 64512   ;;  %v6186_v44 = vld [vmem:[#allocation18_spill] sm:$0xff] }
 0x2c6   : > { %v2766_v10 = vsel %vm1858_vm4, 1.0, %v5860_v11  ;;  %v1706_v19 = vadd.f32 %v2742_v23, %v1514_v41  ;;  %vm6152_vm1 = vmmov %vm6147_vm7  ;;  %vm2026_vm7 = vcmp.eq.s32.totalorder %v1988_v32, 1  ;;  %vm811_vm4 = vcmp.eq.s32.totalorder %v6160_v16, %v3877_v47  ;;  %v6180_v32 = vld [vmem:[#allocation57_spill] sm:$0xff]  ;;  %v6187_v16 = vld [vmem:[#allocation31_spill] sm:$0xff] }
 0x2c7   : > { %v1906_v49 = vadd.f32 %v2766_v10, %v1714_v5  ;;  %v1796_v29 = vpop.permute.xlu1 %1795  ;;  %vm6153_vm12 = vmmov %vm6152_vm1  ;;  %v2631_v38 = vsel %vm347_vm13, 1.0, %v5860_v11  ;;  %vm1451_vm13 = vcmp.eq.s32.totalorder %v6167_v9, 1  ;;  %v6174_v10 = vld [vmem:[#allocation45_spill] sm:$0xff] }
 0x2c8   : > { %vm1834_vm5 = vcmp.eq.s32.totalorder %v1796_v29, 1  ;;  %v2155_v53 = vld [vmem:[#allocation2 + $0x18] sm:$0xff]  ;;  %vm6155_vm3 = vmmov %vm6152_vm1  ;;  %v507_v25 = vadd.f32 %v2647_v24, %v2631_v38  ;;  %v6175_v29 = vld [vmem:[#allocation33_spill] sm:$0xff] }
 0x2c9   : > { %vm1850_vm14 = vmand %vm1770_vm15, %vm1834_vm5  ;;  %2848 = vmatmul.mubr.msk.f32.gmra.mrb[2].mxu0 %vm6152_vm1, %v2155_v53  ;;  %vm875_vm15 = vcmp.eq.s32.totalorder %v6161_v36, 1  ;;  %v5162_v53 = vpop.permute.xlu0 %1953  ;;  %v6188_v36 = vld [vmem:[#allocation43_spill] sm:$0xff]  ;;  %v6231_v38 = vld [vmem:[#allocation169_spill] sm:$0xff] }
 0x2ca   : > { %v2758_v7 = vsel %vm1850_vm14, 1.0, %v5860_v11  ;;  %vm6156_vm9 = vmmov %vm6151_vm10 }
 0x2cb   : > { %v1898_v63 = vadd.f32 %v2758_v7, %v1706_v19  ;;  %v1735_v31 = vpop.permute.xlu1 %1734  ;;  %vm699_vm10 = vmand %vm603_vm2, %vm683_vm6  ;;  %vm1259_vm6 = vcmp.eq.s32.totalorder %v6165_v61, 1  ;;  %v2124_v7 = vld [vmem:[%s4308_s10 + $0x28] sm:$0xff] }
 0x2cc   : > { %v2163_v59 = vld [vmem:[#allocation2 + $0x58] sm:$0xff]  ;;  %v2663_v1 = vsel %vm699_vm10, 1.0, %v5860_v11 }
 0x2cd   : > { %2860 = vmatmul.mubr.msk.f32.gmra.mrb[2].mxu1 %vm6153_vm12, %v2163_v59  ;;  %vm1067_vm12 = vcmp.eq.s32.totalorder %v6162_v14, 1  ;;  %v747_v6 = vadd.f32 %v2663_v1, %v507_v25  ;;  %v6177_v59 = vld [vmem:[#allocation19_spill] sm:$0xff]  ;;  %v1933_v1 = vpop.permute.xlu0 %1932 }
 0x2ce   : > { %v6228_v14 = vld [vmem:[#allocation79_spill] sm:$0xff] }
 0x2cf   : > { %v1799_v17 = vpop.permute.xlu1 %1798 }
 0x2d4   : > { %v5108_v37 = vpop.permute.xlu1 %1609 }
 0x2d9   : > { %v1924_v30 = vpop.permute.xlu1 %1923 }
 0x2da   : > { %vm1962_vm0 = vcmp.eq.s32.totalorder %v1924_v30, %v3877_v47  ;;  %v6181_v30 = vld [vmem:[#allocation72_spill] sm:$0xff] }
 0x2db   : > { %vm2042_vm8 = vmand %vm1962_vm0, %vm2026_vm7  ;;  %vm1003_vm0 = vcmp.eq.s32.totalorder %v6163_v55, %v3877_v47 }
 0x2dc   : > { %v2774_v34 = vsel %vm2042_vm8, 1.0, %v5860_v11  ;;  %vm891_vm7 = vmand %vm811_vm4, %vm875_vm15  ;;  %vm1195_vm8 = vcmp.eq.s32.totalorder %v6164_v43, %v3877_v47  ;;  %vm1387_vm4 = vcmp.eq.s32.totalorder %v6170_v57, %v3877_v47  ;;  %v6197_v43 = vld [vmem:[#allocation75_spill] sm:$0xff]  ;;  %v6203_v57 = vld [vmem:[#allocation174_spill] sm:$0xff] }
 0x2dd   : > { %v2090_v35 = vadd.f32 %v2774_v34, %v1898_v63  ;;  %v1948_v20 = vpop.permute.xlu1 %1947  ;;  %v2679_v54 = vsel %vm891_vm7, 1.0, %v5860_v11  ;;  %vm1275_vm10 = vmand %vm1195_vm8, %vm1259_vm6  ;;  %vm685_vm6 = vcmp.eq.s32.totalorder %v6174_v10, 1  ;;  %v6183_v34 = vld [vmem:[#allocation9_spill] sm:$0xff] }
 0x2de   : > { %vm1970_vm5 = vcmp.eq.s32.totalorder %v1948_v20, %v3877_v47  ;;  %v939_v58 = vadd.f32 %v2679_v54, %v747_v6  ;;  %vm1467_vm15 = vmand %vm1387_vm4, %vm1451_vm13  ;;  %v2711_v21 = vsel %vm1275_vm10, 1.0, %v5860_v11  ;;  %vm1971_vm10 = vcmp.eq.s32.totalorder %v1951_v12, %v3877_v47  ;;  %v6210_v12 = vld [vmem:[#allocation52_spill] sm:$0xff] }
 0x2df   : > { %2107 = vst.msk [vmem:[#allocation2 + $0x20] sm:$0xff] %vm6155_vm3, %v2090_v35  ;;  %vm1083_vm3 = vmand %vm1003_vm0, %vm1067_vm12  ;;  %v2727_v15 = vsel %vm1467_vm15, 1.0, %v5860_v11  ;;  %vm6172_vm12 = vnez %v6171_v2  ;;  %vm813_vm15 = vcmp.eq.s32.totalorder %v6180_v32, %v3877_v47  ;;  %v6184_v35 = vld [vmem:[#allocation106_spill] sm:$0xff]  ;;  %v3000_v20 = vmov 32   ;;  %v6207_v2 = vld [vmem:[#allocation84_spill] sm:$0xff] }
 0x2e0   : > { %2140 = vst.msk [vmem:[#allocation2 + $0x20] sm:$0xff] %vm6156_vm9, %v2123_v40  ;;  %vm6166_vm9 = vcmask 523264   ;;  %v2695_v51 = vsel %vm1083_vm3, 1.0, %v5860_v11  ;;  %v2743_v18 = vsel %vm6172_vm12, 1.0, %v5860_v11  ;;  %vm348_vm12 = vcmp.eq.s32.totalorder %v6183_v34, %v3877_v47  ;;  %2948 = vset.pattern.permute.xlu1 %v3000_v20  ;;  %2947 = vset.pattern.permute.xlu0 %v3000_v20 }
 0x2e1   : > { %v2012_v46 = vpop.permute.xlu1 %2011  ;;  %vm6169_vm2 = vmmov %vm6166_vm9  ;;  %v1131_v22 = vadd.f32 %v2695_v51, %v939_v58  ;;  %v2632_v61 = vsel %vm348_vm12, 1.0, %v5860_v11  ;;  %v6202_v51 = vld [vmem:[#allocation60_spill] sm:$0xff] }
 0x2e2   : > { %vm2034_vm14 = vcmp.eq.s32.totalorder %v2012_v46, 1  ;;  %vm6173_vm7 = vmmov %vm6169_vm2  ;;  %v2132_v46 = vld [vmem:[%s4308_s10 + $0x68] sm:$0xff]  ;;  %vm812_vm12 = vcmp.eq.s32.totalorder %v6202_v51, %v3877_v47 }
 0x2e3   : > { %vm2050_vm1 = vmand %vm1970_vm5, %vm2034_vm14  ;;  %vm1835_vm5 = vcmp.eq.s32.totalorder %v1799_v17, 1  ;;  %vm1771_vm14 = vcmp.eq.s32.totalorder %v1735_v31, %v3877_v47  ;;  %v1323_v28 = vadd.f32 %v2711_v21, %v1131_v22  ;;  %v6176_v31 = vld [vmem:[#allocation8_spill] sm:$0xff] }
 0x2e4   : > { %v2782_v3 = vsel %vm2050_vm1, 1.0, %v5860_v11  ;;  %vm1851_vm1 = vmand %vm1771_vm14, %vm1835_vm5  ;;  %vm349_vm13 = vcmp.eq.s32.totalorder %v6176_v31, %v3877_v47  ;;  %vm877_vm5 = vcmp.eq.s32.totalorder %v6181_v30, 1  ;;  %v6216_v31 = vld [vmem:[#allocation155_spill] sm:$0xff]  ;;  %v6219_v30 = vld [vmem:[#allocation121_spill] sm:$0xff] }
 0x2e5   : > { %v2098_v52 = vadd.f32 %v2782_v3, %v1906_v49  ;;  %v1515_v50 = vadd.f32 %v2727_v15, %v1323_v28  ;;  %v2759_v4 = vsel %vm1851_vm1, 1.0, %v5860_v11  ;;  %vm6182_vm14 = vmmov %vm6173_vm7  ;;  %v2633_v45 = vsel %vm349_vm13, 1.0, %v5860_v11  ;;  %v6206_v28 = vld [vmem:[#allocation151_spill] sm:$0xff] }
 0x2e6   : > { %v5137_v33 = vpop.permute.xlu1 %1572 }
 0x2e7   : > { %2115 = vst.msk [vmem:[#allocation2 + $0x60] sm:$0xff] %vm6166_vm9, %v2098_v52  ;;  %v2156_v42 = vld [vmem:[#allocation2 + $0x20] sm:$0xff]  ;;  %v1707_v5 = vadd.f32 %v2743_v18, %v1515_v50  ;;  %vm605_vm9 = vcmp.eq.s32.totalorder %v6175_v29, %v3877_v47  ;;  %v6194_v52 = vld [vmem:[#allocation114_spill] sm:$0xff] }
 0x2e8   : > { %2148 = vst.msk [vmem:[#allocation2 + $0x60] sm:$0xff] %vm6168_vm11, %v2131_v48  ;;  %2850 = vmatprep.mubr.msk.f32.mxu0 %vm6169_vm2, %v2156_v42  ;;  %vm461_vm11 = vcmp.eq.s32.totalorder %v6177_v59, %v3877_v47  ;;  %vm5169_vm2 = vmand %vm605_vm9, %vm685_vm6  ;;  %vm604_vm6 = vcmp.eq.s32.totalorder %v6187_v16, %v3877_v47  ;;  %v6195_v48 = vld [vmem:[#allocation129_spill] sm:$0xff]  ;;  %v6201_v42 = vld [vmem:[#allocation162_spill] sm:$0xff] }
 0x2e9   : > { %v1899_v41 = vadd.f32 %v2759_v4, %v1707_v5  ;;  %v2649_v60 = vsel %vm461_vm11, 1.0, %v5860_v11  ;;  %v2665_v24 = vsel %vm5169_vm2, 1.0, %v5860_v11  ;;  %vm5206_vm9 = vmand %vm813_vm15, %vm877_vm5  ;;  %vm1197_vm2 = vcmp.eq.s32.totalorder %v6194_v52, %v3877_v47  ;;  %v6208_v18 = vld [vmem:[#allocation99_spill] sm:$0xff]  ;;  %v1997_v5 = vpop.permute.xlu0 %1996 }
 0x2ea   : > { %v5147_v39 = vpop.permute.xlu1 %1636  ;;  %vm6196_vm15 = vmmov %vm6182_vm14  ;;  %v509_v55 = vadd.f32 %v2649_v60, %v2633_v45  ;;  %v2681_v25 = vsel %vm5206_vm9, 1.0, %v5860_v11  ;;  %vm1004_vm9 = vcmp.eq.s32.totalorder %v6207_v2, %v3877_v47  ;;  %v6223_v45 = vld [vmem:[#allocation175_spill] sm:$0xff]  ;;  %v6225_v60 = vld [vmem:[#allocation65_spill] sm:$0xff] }
 0x2eb   : > { %v6238_v2 = vld [vmem:[#allocation165_spill] sm:$0xff] }
 0x2ec   : > { %v749_v6 = vadd.f32 %v2665_v24, %v509_v55 }
 0x2ef   : > { %v1927_v8 = vpop.permute.xlu1 %1926  ;;  %v2164_v27 = vld [vmem:[#allocation2 + $0x60] sm:$0xff] }
 0x2f0   : > { %2862 = vmatprep.mubr.msk.f32.mxu1 %vm6173_vm7, %v2164_v27  ;;  %vm1963_vm0 = vcmp.eq.s32.totalorder %v1927_v8, %v3877_v47  ;;  %vm1069_vm7 = vcmp.eq.s32.totalorder %v6184_v35, 1  ;;  %v941_v27 = vadd.f32 %v2681_v25, %v749_v6  ;;  %v6221_v35 = vld [vmem:[#allocation13_spill] sm:$0xff] }
 0x2f3   : > { %v1991_v23 = vpop.permute.xlu1 %1990 }
 0x2f4   : > { %vm2027_vm8 = vcmp.eq.s32.totalorder %v1991_v23, 1  ;;  %v6211_v23 = vld [vmem:[#allocation39_spill] sm:$0xff] }
 0x2f5   : > { %vm2043_vm3 = vmand %vm1963_vm0, %vm2027_vm8  ;;  %vm6185_vm0 = vcmask 64512   ;;  %vm460_vm8 = vcmp.eq.s32.totalorder %v6186_v44, %v3877_v47 }
 0x2f6   : > { %v2775_v49 = vsel %vm2043_vm3, 1.0, %v5860_v11  ;;  %vm684_vm3 = vcmp.eq.s32.totalorder %v6188_v36, 1  ;;  %v2648_v9 = vsel %vm460_vm8, 1.0, %v5860_v11  ;;  %vm1389_vm8 = vcmp.eq.s32.totalorder %v6206_v28, %v3877_v47  ;;  %v2126_v28 = vld [vmem:[%s4308_s10 + $0x38] sm:$0xff] }
 0x2f7   : > { %v2091_v19 = vadd.f32 %v2775_v49, %v1899_v41  ;;  %v2015_v63 = vpop.permute.xlu1 %2014  ;;  %v508_v50 = vadd.f32 %v2648_v9, %v2632_v61  ;;  %v6212_v49 = vld [vmem:[#allocation136_spill] sm:$0xff] }
 0x2f8   : > { %vm2035_vm4 = vcmp.eq.s32.totalorder %v2015_v63, 1  ;;  %v6215_v63 = vld [vmem:[#allocation143_spill] sm:$0xff] }
 0x2f9   : > { %2108 = vst.msk [vmem:[#allocation2 + $0x28] sm:$0xff] %vm6182_vm14, %v2091_v19  ;;  %vm2051_vm1 = vmand %vm1971_vm10, %vm2035_vm4  ;;  %vm1261_vm10 = vcmp.eq.s32.totalorder %v6195_v48, 1  ;;  %vm1844_vm4 = vcmp.eq.s32.totalorder %v4467_v0, 1  ;;  %vm876_vm14 = vcmp.eq.s32.totalorder %v6197_v43, 1  ;;  %v6234_v0 = vld [vmem:[#allocation113_spill] sm:$0xff] }
 0x2fa   : > { %2141 = vst.msk [vmem:[#allocation2 + $0x28] sm:$0xff] %vm6185_vm0, %v2124_v7  ;;  %v2783_v40 = vsel %vm2051_vm1, 1.0, %v5860_v11  ;;  %vm6198_vm1 = vmmov %vm6185_vm0 }
 0x2fb   : > { %v2099_v62 = vadd.f32 %v2783_v40, %v4988_v56  ;;  %v6191_v56 = vld [vmem:[#allocation91_spill] sm:$0xff]  ;;  %vm5235_vm0 = vmand %vm604_vm6, %vm684_vm3  ;;  %v6222_v40 = vld [vmem:[#allocation25_spill] sm:$0xff] }
 0x2fc   : > { %vm1005_vm13 = vcmp.eq.s32.totalorder %v6191_v56, %v3877_v47  ;;  %v1762_v3 = vpop.permute.xlu1 %1761  ;;  %vm1277_vm6 = vmand %vm1197_vm2, %vm1261_vm10  ;;  %vm1068_vm2 = vcmp.eq.s32.totalorder %v6208_v18, 1  ;;  %v2664_v10 = vsel %vm5235_vm0, 1.0, %v5860_v11 }
 0x2fd   : > { %vm5214_vm11 = vmand %vm1005_vm13, %vm1069_vm7  ;;  %2116 = vst.msk [vmem:[#allocation2 + $0x68] sm:$0xff] %vm6196_vm15, %v2099_v62  ;;  %vm1780_vm5 = vcmp.eq.s32.totalorder %v1762_v3, %v3877_v47  ;;  %vm1453_vm13 = vcmp.eq.s32.totalorder %v6201_v42, 1  ;;  %v2713_v4 = vsel %vm1277_vm6, 1.0, %v5860_v11  ;;  %vm2029_vm6 = vcmp.eq.s32.totalorder %v1997_v5, 1 }
 0x2fe   : > { %2149 = vst.msk [vmem:[#allocation2 + $0x68] sm:$0xff] %vm6198_vm1, %v2132_v46  ;;  %vm1860_vm7 = vmand %vm1780_vm5, %vm1844_vm4  ;;  %v2697_v15 = vsel %vm5214_vm11, 1.0, %v5860_v11  ;;  %vm613_vm11 = vcmp.eq.s32.totalorder %v6211_v23, %v3877_v47  ;;  %vm1260_vm5 = vcmp.eq.s32.totalorder %v6212_v49, 1  ;;  %vm1388_vm1 = vcmp.eq.s32.totalorder %v6215_v63, %v3877_v47  ;;  %v2125_v63 = vld [vmem:[%s4308_s10 + $0x30] sm:$0xff]  ;;  %v2134_v46 = vld [vmem:[%s4308_s10 + $0x78] sm:$0xff] }
 0x2ff   : > { %v2768_v54 = vsel %vm1860_vm7, 1.0, %v5860_v11  ;;  %vm5260_vm3 = vmand %vm812_vm12, %vm876_vm14  ;;  %v1133_v41 = vadd.f32 %v2697_v15, %v941_v27  ;;  %vm1452_vm7 = vcmp.eq.s32.totalorder %v6216_v31, 1  ;;  %vm1965_vm12 = vcmp.eq.s32.totalorder %v1933_v1, %v3877_v47 }
 0x300   : > { %v5256_v58 = vadd.f32 %v2768_v54, %v6203_v57  ;;  %v5258_v21 = vpop.permute.xlu1 %1801  ;;  %vm1469_vm10 = vmand %vm1389_vm8, %vm1453_vm13  ;;  %v2680_v19 = vsel %vm5260_vm3, 1.0, %v5860_v11  ;;  %vm1196_vm13 = vcmp.eq.s32.totalorder %v6219_v30, %v3877_v47  ;;  %vm357_vm8 = vcmp.eq.s32.totalorder %v6221_v35, %v3877_v47  ;;  %v6235_v54 = vld [vmem:[#allocation98_spill] sm:$0xff] }
 0x301   : > { %v2157_v8 = vld [vmem:[#allocation2 + $0x28] sm:$0xff]  ;;  %vm6209_vm4 = vmmov %vm6196_vm15  ;;  %vm693_vm15 = vcmp.eq.s32.totalorder %v6210_v12, 1  ;;  %v2729_v59 = vsel %vm1469_vm10, 1.0, %v5860_v11  ;;  %v1325_v34 = vadd.f32 %v2713_v4, %v1133_v41  ;;  %v748_v20 = vadd.f32 %v2664_v10, %v508_v50  ;;  %v6236_v57 = vld [vmem:[#allocation122_spill] sm:$0xff] }
 0x302   : > { %2851 = vmatmul.mubr.msk.f32.gmra.mrb[4].mxu0 %vm6209_vm4, %v2157_v8  ;;  %vm5286_vm14 = vmand %vm1004_vm9, %vm1068_vm2  ;;  %vm469_vm9 = vcmp.eq.s32.totalorder %v6222_v40, %v3877_v47  ;;  %vm6224_vm10 = vnez %v6223_v45  ;;  %v2641_v48 = vsel %vm357_vm8, 1.0, %v5860_v11  ;;  %vm1077_vm8 = vcmp.eq.s32.totalorder %v6234_v0, 1  ;;  %v6240_v12 = vld [vmem:[#allocation157_spill] sm:$0xff] }
 0x303   : > { %vm5294_vm0 = vmand %vm613_vm11, %vm693_vm15  ;;  %v2745_v44 = vsel %vm6224_vm10, 1.0, %v5860_v11  ;;  %v2696_v62 = vsel %vm5286_vm14, 1.0, %v5860_v11  ;;  %v1517_v16 = vadd.f32 %v2729_v59, %v1325_v34  ;;  %vm1644_vm11 = vcmp.eq.s32.totalorder %v5108_v37, 1  ;;  %v2133_v34 = vld [vmem:[%s4308_s10 + $0x70] sm:$0xff] }
 0x304   : > { %v1741_v29 = vpop.permute.xlu1 %1740  ;;  %vm6220_vm3 = vmmov %vm6209_vm4  ;;  %vm821_vm4 = vcmp.eq.s32.totalorder %v6225_v60, %v3877_v47  ;;  %v940_v24 = vadd.f32 %v2680_v19, %v748_v20  ;;  %v2657_v1 = vsel %vm469_vm9, 1.0, %v5860_v11  ;;  %vm1772_vm9 = vcmp.eq.s32.totalorder %v4405_v13, %v3877_v47  ;;  %v6237_v13 = vld [vmem:[#allocation137_spill] sm:$0xff] }
 0x305   : > { %v2165_v17 = vld [vmem:[#allocation2 + $0x68] sm:$0xff]  ;;  %vm1276_vm2 = vmand %vm1196_vm13, %vm1260_vm5  ;;  %vm885_vm5 = vcmp.eq.s32.totalorder %v6228_v14, 1  ;;  %vm1773_vm13 = vcmp.eq.s32.totalorder %v1741_v29, %v3877_v47  ;;  %v1709_v52 = vadd.f32 %v2745_v44, %v1517_v16  ;;  %v2673_v42 = vsel %vm5294_vm0, 1.0, %v5860_v11 }
 0x306   : > { %2863 = vmatmul.mubr.msk.f32.gmra.mrb[4].mxu1 %vm6220_vm3, %v2165_v17  ;;  %vm5321_vm15 = vmand %vm1388_vm1, %vm1452_vm7  ;;  %v2712_v3 = vsel %vm1276_vm2, 1.0, %v5860_v11  ;;  %vm1580_vm7 = vcmp.eq.s32.totalorder %v6231_v38, %v3877_v47  ;;  %vm1836_vm3 = vcmp.eq.s32.totalorder %v5258_v21, 1  ;;  %v1132_v55 = vadd.f32 %v2696_v62, %v940_v24 }
 0x307   : > { %vm5330_vm14 = vmand %vm1965_vm12, %vm2029_vm6  ;;  %v2728_v25 = vsel %vm5321_vm15, 1.0, %v5860_v11  ;;  %vm1013_vm2 = vcmp.eq.s32.totalorder %v6235_v54, %v3877_v47  ;;  %vm1205_vm15 = vcmp.eq.s32.totalorder %v6236_v57, %v3877_v47  ;;  %v517_v8 = vadd.f32 %v2657_v1, %v2641_v48 }
 0x308   : > { %v1805_v36 = vpop.permute.xlu1 %1804  ;;  %vm1660_vm12 = vmand %vm1580_vm7, %vm1644_vm11  ;;  %v1324_v9 = vadd.f32 %v2712_v3, %v1132_v55  ;;  %v2777_v6 = vsel %vm5330_vm14, 1.0, %v5860_v11  ;;  %vm1269_vm11 = vcmp.eq.s32.totalorder %v6237_v13, 1  ;;  %vm6239_vm14 = vcmask 523264  }
 0x309   : > { %vm1837_vm1 = vcmp.eq.s32.totalorder %v1805_v36, 1  ;;  %vm5353_vm6 = vmand %vm821_vm4, %vm885_vm5  ;;  %v2744_v22 = vsel %vm1660_vm12, 1.0, %v5860_v11  ;;  %vm1461_vm5 = vcmp.eq.s32.totalorder %v6238_v2, 1  ;;  %v757_v50 = vadd.f32 %v2673_v42, %v517_v8 }
 0x30a   : > { %vm1853_vm10 = vmand %vm1773_vm13, %vm1837_vm1  ;;  %v1516_v27 = vadd.f32 %v2728_v25, %v1324_v9  ;;  %v2689_v21 = vsel %vm5353_vm6, 1.0, %v5860_v11  ;;  %vm1397_vm1 = vcmp.eq.s32.totalorder %v6240_v12, %v3877_v47  ;;  %vm6241_vm7 = vcmask 64512  }
 0x30b   : > { %v2761_v43 = vsel %vm1853_vm10, 1.0, %v5860_v11  ;;  %vm1852_vm4 = vmand %vm1772_vm9, %vm1836_vm3  ;;  %vm1653_vm10 = vcmp.eq.s32.totalorder %v5147_v39, 1  ;;  %v949_v10 = vadd.f32 %v2689_v21, %v757_v50  ;;  %vm1589_vm9 = vcmp.eq.s32.totalorder %v5137_v33, %v3877_v47 }
 0x30c   : > { %v1901_v37 = vadd.f32 %v2761_v43, %v1709_v52  ;;  %vm1093_vm0 = vmand %vm1013_vm2, %vm1077_vm8  ;;  %v2760_v18 = vsel %vm1852_vm4, 1.0, %v5860_v11  ;;  %v1708_v4 = vadd.f32 %v2744_v22, %v1516_v27  ;;  %vm1972_vm4 = vcmp.eq.s32.totalorder %v5162_v53, %v3877_v47 }
 0x30d   : > { %v1930_v51 = vpop.permute.xlu1 %1929  ;;  %vm1285_vm13 = vmand %vm1205_vm15, %vm1269_vm11  ;;  %v2705_v23 = vsel %vm1093_vm0, 1.0, %v5860_v11 }
 0x30e   : > { %v2093_v15 = vadd.f32 %v2777_v6, %v1901_v37  ;;  %vm1477_vm3 = vmand %vm1397_vm1, %vm1461_vm5  ;;  %vm1964_vm12 = vcmp.eq.s32.totalorder %v1930_v51, %v3877_v47  ;;  %v1900_v41 = vadd.f32 %v2760_v18, %v1708_v4  ;;  %v2721_v49 = vsel %vm1285_vm13, 1.0, %v5860_v11 }
 0x30f   : > { %v1141_v19 = vadd.f32 %v2705_v23, %v949_v10  ;;  %vm1669_vm2 = vmand %vm1589_vm9, %vm1653_vm10  ;;  %v2737_v39 = vsel %vm1477_vm3, 1.0, %v5860_v11  ;;  %vm6246_vm1 = vnez %v6012_v26 }
 0x310   : > { %2110 = vst.msk [vmem:[#allocation2 + $0x38] sm:$0xff] %vm6239_vm14, %v2093_v15  ;;  %vm6242_vm11 = vmmov %vm6239_vm14  ;;  %v2753_v33 = vsel %vm1669_vm2, 1.0, %v5860_v11  ;;  %v2769_v20 = vsel %vm6246_vm1, 1.0, %v5860_v11 }
 0x311   : > { %2143 = vst.msk [vmem:[#allocation2 + $0x38] sm:$0xff] %vm6241_vm7, %v2126_v28  ;;  %v1994_v5 = vpop.permute.xlu1 %1993  ;;  %v1333_v59 = vadd.f32 %v2721_v49, %v1141_v19  ;;  %vm6243_vm5 = vmmov %vm6241_vm7 }
 0x312   : > { %vm2028_vm6 = vcmp.eq.s32.totalorder %v1994_v5, 1  ;;  %vm6244_vm14 = vmmov %vm6242_vm11 }
 0x313   : > { %vm2044_vm8 = vmand %vm1964_vm12, %vm2028_vm6  ;;  %v1525_v32 = vadd.f32 %v2737_v39, %v1333_v59 }
 0x314   : > { %v2776_v29 = vsel %vm2044_vm8, 1.0, %v5860_v11  ;;  %vm6245_vm13 = vmmov %vm6243_vm5 }
 0x315   : > { %v2092_v7 = vadd.f32 %v2776_v29, %v1900_v41  ;;  %v2018_v31 = vpop.permute.xlu1 %2017  ;;  %v1717_v40 = vadd.f32 %v2753_v33, %v1525_v32  ;;  %vm6247_vm12 = vmmov %vm6242_vm11 }
 0x316   : > { %vm2036_vm15 = vcmp.eq.s32.totalorder %v2018_v31, 1  ;;  %vm6248_vm6 = vmmov %vm6242_vm11 }
 0x317   : > { %2109 = vst.msk [vmem:[#allocation2 + $0x30] sm:$0xff] %vm6242_vm11, %v2092_v7  ;;  %vm2052_vm0 = vmand %vm1972_vm4, %vm2036_vm15  ;;  %v1909_v44 = vadd.f32 %v2769_v20, %v1717_v40  ;;  %vm2417_vm15 = vcmp.ge.s32.totalorder %v3877_v47, 24  ;;  %vm2530_vm11 = vcmask 261120  }
 0x318   : > { %2142 = vst.msk [vmem:[#allocation2 + $0x30] sm:$0xff] %vm6243_vm5, %v2125_v63  ;;  %v2784_v17 = vsel %vm2052_vm0, 1.0, %v5860_v11  ;;  %v2159_v45 = vld [vmem:[#allocation2 + $0x38] sm:$0xff]  ;;  %vm6249_vm8 = vmmov %vm6248_vm6 }
 0x319   : > { %v2100_v30 = vadd.f32 %v2784_v17, %v5256_v58  ;;  %v1957_v35 = vpop.permute.xlu1 %1956  ;;  %vm6250_vm9 = vmmov %vm6243_vm5 }
 0x31a   : > { %vm1973_vm7 = vcmp.eq.s32.totalorder %v1957_v35, %v3877_v47  ;;  %vm6251_vm2 = vmmov %vm6248_vm6 }
 0x31b   : > { %2117 = vst.msk [vmem:[#allocation2 + $0x70] sm:$0xff] %vm6244_vm14, %v2100_v30  ;;  %vm6252_vm4 = vmmov %vm6251_vm2 }
 0x31c   : > { %2150 = vst.msk [vmem:[#allocation2 + $0x70] sm:$0xff] %vm6245_vm13, %v2133_v34 }
 0x31d   : > { %v2021_v53 = vpop.permute.xlu1 %2020 }
 0x31e   : > { %vm2037_vm3 = vcmp.eq.s32.totalorder %v2021_v53, 1 }
 0x31f   : > { %vm2053_vm10 = vmand %vm1973_vm7, %vm2037_vm3  ;;  %v2158_v58 = vld [vmem:[#allocation2 + $0x30] sm:$0xff] }
 0x320   : > { %v2785_v60 = vsel %vm2053_vm10, 1.0, %v5860_v11  ;;  %2853 = vmatprep.mubr.msk.f32.mxu0 %vm6247_vm12, %v2158_v58 }
 0x321   : > { %v2101_v62 = vadd.f32 %v2785_v60, %v1909_v44  ;;  %2854 = vmatmul.mubr.msk.f32.gmra.mrb[6].mxu0 %vm6248_vm6, %v2159_v45 }
 0x323   : > { %2118 = vst.msk [vmem:[#allocation2 + $0x78] sm:$0xff] %vm6249_vm8, %v2101_v62  ;;  %v2166_v16 = vld [vmem:[#allocation2 + $0x70] sm:$0xff] }
 0x324   : > { %2151 = vst.msk [vmem:[#allocation2 + $0x78] sm:$0xff] %vm6250_vm9, %v2134_v46  ;;  %2865 = vmatprep.mubr.msk.f32.mxu1 %vm6251_vm2, %v2166_v16 }
 0x32b   : > { %v2167_v26 = vld [vmem:[#allocation2 + $0x78] sm:$0xff] }
 0x32c   : > { %2866 = vmatmul.mubr.msk.f32.gmra.mrb[6].mxu1 %vm6252_vm4, %v2167_v26 }
 0x375   : > { %v5420_v36 = vpop.f32.mrb[0].mxu0 }
 0x376   : > { %v2370_v11 = vmax.f32 %v5420_v36, 1.0  ;;  %v5423_v24 = vpop.f32.mrb[1].mxu0 }
 0x377   : > { %v2369_v14 = vmax.f32 %v5423_v24, 1.0  ;;  %v5426_v56 = vpop.f32.mrb[0].mxu1 }
 0x378   : > { %2949 = vrcp.f32 %v2370_v11  ;;  %v5428_v3 = vpop.f32.mrb[1].mxu1  ;;  %v2378_v27 = vmax.f32 %v5426_v56, 1.0 }
 0x379   : > { %2951 = vrcp.f32 %v2369_v14  ;;  %v2377_v21 = vmax.f32 %v5428_v3, 1.0 }
 0x382   : > { %v2950_v38 = vpop.eup %2949 }
 0x383   : > { %v2952_v52 = vpop.eup %2951  ;;  %2425 = vperm.xlu1 %2948, %v2950_v38  }
 0x384   : > { %2420 = vperm.xlu0 %2947, %v2952_v52  }
 0x39c   : > { %v5430_v48 = vpop.f32.mrb[2].mxu0 }
 0x39d   : > { %v2372_v1 = vmax.f32 %v5430_v48, 1.0  ;;  %v5433_v55 = vpop.f32.mrb[3].mxu0 }
 0x39e   : > { %v2371_v43 = vmax.f32 %v5433_v55, 1.0 }
 0x39f   : > { %2953 = vrcp.f32 %v2372_v1 }
 0x3a0   : > { %2955 = vrcp.f32 %v2371_v43  ;;  %v5436_v61 = vpop.f32.mrb[2].mxu1 }
 0x3a1   : > { %v5438_v0 = vpop.f32.mrb[3].mxu1  ;;  %v2380_v18 = vmax.f32 %v5436_v61, 1.0 }
 0x3a2   : > { %v2379_v50 = vmax.f32 %v5438_v0, 1.0 }
 0x3a9   : > { %v2954_v25 = vpop.eup %2953 }
 0x3aa   : > { %v2956_v37 = vpop.eup %2955  ;;  %2435 = vperm.xlu0 %2947, %v2954_v25  }
 0x3ab   : > { %2430 = vperm.xlu1 %2948, %v2956_v37  }
 0x3d5   : > { %v5440_v42 = vpop.f32.mrb[4].mxu0 }
 0x3d6   : > { %v2374_v54 = vmax.f32 %v5440_v42, 1.0  ;;  %v5443_v9 = vpop.f32.mrb[5].mxu0 }
 0x3d7   : > { %v2373_v6 = vmax.f32 %v5443_v9, 1.0 }
 0x3d8   : > { %2957 = vrcp.f32 %v2374_v54 }
 0x3d9   : > { %2959 = vrcp.f32 %v2373_v6  ;;  %v5446_v51 = vpop.f32.mrb[4].mxu1 }
 0x3da   : > { %v5448_v57 = vpop.f32.mrb[5].mxu1  ;;  %v2382_v12 = vmax.f32 %v5446_v51, 1.0 }
 0x3db   : > { %v2381_v4 = vmax.f32 %v5448_v57, 1.0 }
 0x3e2   : > { %v2958_v13 = vpop.eup %2957 }
 0x3e3   : > { %v2960_v22 = vpop.eup %2959  ;;  %2445 = vperm.xlu0 %2947, %v2958_v13  }
 0x3e4   : > { %2440 = vperm.xlu1 %2948, %v2960_v22  }
 0x3f4   : > { %v5450_v15 = vpop.f32.mrb[6].mxu0 }
 0x3f5   : > { %v2376_v28 = vmax.f32 %v5450_v15, 1.0  ;;  %v5453_v8 = vpop.f32.mrb[7].mxu0 }
 0x3f6   : > { %v2375_v2 = vmax.f32 %v5453_v8, 1.0 }
 0x3f7   : > { %2961 = vrcp.f32 %v2376_v28 }
 0x3f8   : > { %2963 = vrcp.f32 %v2375_v2 }
 0x3f9   : > { %2965 = vrcp.f32 %v2378_v27 }
 0x3fa   : > { %2967 = vrcp.f32 %v2377_v21 }
 0x3fb   : > { %2969 = vrcp.f32 %v2380_v18 }
 0x3fc   : > { %2971 = vrcp.f32 %v2379_v50 }
 0x3fd   : > { %2973 = vrcp.f32 %v2382_v12 }
 0x3fe   : > { %2975 = vrcp.f32 %v2381_v4 }
 0x3ff   : > { %v5462_v5 = vpop.f32.mrb[6].mxu1 }
 0x400   : > { %v5465_v23 = vpop.f32.mrb[7].mxu1  ;;  %v2384_v41 = vmax.f32 %v5462_v5, 1.0 }
 0x401   : > { %v2962_v10 = vpop.eup %2961  ;;  %v2383_v19 = vmax.f32 %v5465_v23, 1.0 }
 0x402   : > { %v2964_v49 = vpop.eup %2963  ;;  %v2426_v29 = vpop.permute.xlu1 %2425  ;;  %2455 = vperm.xlu0 %2947, %v2962_v10   ;;  %2977 = vrcp.f32 %v2384_v41 }
 0x403   : > { %v2966_v7 = vpop.eup %2965  ;;  %v2499_v63 = vsel %vm2417_vm15, %v2426_v29, 1.0  ;;  %v2421_v31 = vpop.permute.xlu0 %2420  ;;  %2450 = vperm.xlu1 %2948, %v2964_v49   ;;  %2979 = vrcp.f32 %v2383_v19 }
 0x404   : > { %v2968_v39 = vpop.eup %2967  ;;  %v2515_v59 = vmul.f32 %v5420_v36, %v2499_v63  ;;  %v2498_v33 = vsel %vm2417_vm15, %v2421_v31, 1.0 }
 0x405   : > { %v2514_v17 = vmul.f32 %v2498_v33, %v5423_v24  ;;  %v2970_v32 = vpop.eup %2969 }
 0x406   : > { %2532 = vst.msk [vmem:[%s5473_s14 + $0x8] sm:$0xff] %vm2530_vm11, %v2515_v59  ;;  %2465 = vperm.xlu0 %2947, %v2966_v7   ;;  %v2972_v30 = vpop.eup %2971 }
 0x407   : > { %2531 = vst.msk [vmem:[%s5473_s14] sm:$0xff] %vm2530_vm11, %v2514_v17  ;;  %2460 = vperm.xlu1 %2948, %v2968_v39   ;;  %v2974_v34 = vpop.eup %2973 }
 0x408   : > { %v2976_v35 = vpop.eup %2975 }
 0x40a   : > { %2475 = vperm.xlu0 %2947, %v2970_v32  }
 0x40b   : > { %2470 = vperm.xlu1 %2948, %v2972_v30  }
 0x40c   : > { %v2978_v40 = vpop.eup %2977 }
 0x40d   : > { %v2980_v53 = vpop.eup %2979 }
 0x40e   : > { %2485 = vperm.xlu0 %2947, %v2974_v34  }
 0x40f   : > { %2480 = vperm.xlu1 %2948, %v2976_v35  }
 0x412   : > { %2495 = vperm.xlu0 %2947, %v2978_v40  }
 0x413   : > { %2490 = vperm.xlu1 %2948, %v2980_v53  }
 0x429   : > { %v2436_v20 = vpop.permute.xlu0 %2435 }
 0x42a   : > { %v2501_v45 = vsel %vm2417_vm15, %v2436_v20, 1.0  ;;  %v2431_v44 = vpop.permute.xlu1 %2430 }
 0x42b   : > { %v2517_v58 = vmul.f32 %v5430_v48, %v2501_v45  ;;  %v2500_v60 = vsel %vm2417_vm15, %v2431_v44, 1.0 }
 0x42c   : > { %v2516_v62 = vmul.f32 %v2500_v60, %v5433_v55 }
 0x42d   : > { %2534 = vst.msk [vmem:[%s5473_s14 + $0x18] sm:$0xff] %vm2530_vm11, %v2517_v58 }
 0x42e   : > { %2533 = vst.msk [vmem:[%s5473_s14 + $0x10] sm:$0xff] %vm2530_vm11, %v2516_v62 }
 0x462   : > { %v2446_v46 = vpop.permute.xlu0 %2445 }
 0x463   : > { %v2503_v16 = vsel %vm2417_vm15, %v2446_v46, 1.0  ;;  %v2441_v26 = vpop.permute.xlu1 %2440 }
 0x464   : > { %v2519_v36 = vmul.f32 %v5440_v42, %v2503_v16  ;;  %v2502_v11 = vsel %vm2417_vm15, %v2441_v26, 1.0 }
 0x465   : > { %v2518_v24 = vmul.f32 %v2502_v11, %v5443_v9 }
 0x466   : > { %2536 = vst.msk [vmem:[%s5473_s14 + $0x28] sm:$0xff] %vm2530_vm11, %v2519_v36 }
 0x467   : > { %2535 = vst.msk [vmem:[%s5473_s14 + $0x20] sm:$0xff] %vm2530_vm11, %v2518_v24 }
 0x481   : > { %v2456_v14 = vpop.permute.xlu0 %2455 }
 0x482   : > { %v2505_v38 = vsel %vm2417_vm15, %v2456_v14, 1.0  ;;  %v2451_v52 = vpop.permute.xlu1 %2450 }
 0x483   : > { %v2521_v48 = vmul.f32 %v5450_v15, %v2505_v38  ;;  %v2504_v1 = vsel %vm2417_vm15, %v2451_v52, 1.0 }
 0x484   : > { %v2520_v55 = vmul.f32 %v2504_v1, %v5453_v8 }
 0x485   : > { %2538 = vst.msk [vmem:[%s5473_s14 + $0x38] sm:$0xff] %vm2530_vm11, %v2521_v48  ;;  %v2466_v43 = vpop.permute.xlu0 %2465 }
 0x486   : > { %2537 = vst.msk [vmem:[%s5473_s14 + $0x30] sm:$0xff] %vm2530_vm11, %v2520_v55  ;;  %v2507_v25 = vsel %vm2417_vm15, %v2466_v43, 1.0  ;;  %v2461_v37 = vpop.permute.xlu1 %2460 }
 0x487   : > { %v2523_v42 = vmul.f32 %v5426_v56, %v2507_v25  ;;  %v2506_v54 = vsel %vm2417_vm15, %v2461_v37, 1.0 }
 0x488   : > { %v2522_v9 = vmul.f32 %v2506_v54, %v5428_v3 }
 0x489   : > { %2540 = vst.msk [vmem:[%s5473_s14 + $0x48] sm:$0xff] %vm2530_vm11, %v2523_v42  ;;  %v2476_v6 = vpop.permute.xlu0 %2475 }
 0x48a   : > { %2539 = vst.msk [vmem:[%s5473_s14 + $0x40] sm:$0xff] %vm2530_vm11, %v2522_v9  ;;  %v2509_v13 = vsel %vm2417_vm15, %v2476_v6, 1.0  ;;  %v2471_v22 = vpop.permute.xlu1 %2470 }
 0x48b   : > { %v2525_v15 = vmul.f32 %v5436_v61, %v2509_v13  ;;  %v2508_v56 = vsel %vm2417_vm15, %v2471_v22, 1.0 }
 0x48c   : > { %v2524_v28 = vmul.f32 %v2508_v56, %v5438_v0 }
 0x48d   : > { %2542 = vst.msk [vmem:[%s5473_s14 + $0x58] sm:$0xff] %vm2530_vm11, %v2525_v15  ;;  %v2486_v3 = vpop.permute.xlu0 %2485 }
 0x48e   : > { %2541 = vst.msk [vmem:[%s5473_s14 + $0x50] sm:$0xff] %vm2530_vm11, %v2524_v28  ;;  %v2511_v8 = vsel %vm2417_vm15, %v2486_v3, 1.0  ;;  %v2481_v27 = vpop.permute.xlu1 %2480 }
 0x48f   : > { %v2527_v2 = vmul.f32 %v5446_v51, %v2511_v8  ;;  %v2510_v61 = vsel %vm2417_vm15, %v2481_v27, 1.0 }
 0x490   : > { %v2526_v21 = vmul.f32 %v2510_v61, %v5448_v57 }
 0x491   : > { %2544 = vst.msk [vmem:[%s5473_s14 + $0x68] sm:$0xff] %vm2530_vm11, %v2527_v2  ;;  %v2496_v0 = vpop.permute.xlu0 %2495 }
 0x492   : > { %2543 = vst.msk [vmem:[%s5473_s14 + $0x60] sm:$0xff] %vm2530_vm11, %v2526_v21  ;;  %v2513_v18 = vsel %vm2417_vm15, %v2496_v0, 1.0  ;;  %v2491_v50 = vpop.permute.xlu1 %2490 }
 0x493   : > { %v2529_v12 = vmul.f32 %v5462_v5, %v2513_v18  ;;  %v2512_v4 = vsel %vm2417_vm15, %v2491_v50, 1.0 }
 0x494   : > { %v2528_v51 = vmul.f32 %v2512_v4, %v5465_v23 }
 0x495   : > { %2546 = vst.msk [vmem:[%s5473_s14 + $0x78] sm:$0xff] %vm2530_vm11, %v2529_v12 }
 0x496   : > { %2545 = vst.msk [vmem:[%s5473_s14 + $0x70] sm:$0xff] %vm2530_vm11, %v2528_v51 }
 0x497 PF: > { %s13_s12 = sadd.s32 1, %s2987_s12  }
 0x498   : > { %p10_p4 = scmp.ge.s32.totalorder %s13_s12, 4  }
 0x49a   :  { %12 = sbr.rel (!%p10_p4) target bundleno = 1 (0x1), region = 65 }

</bundles_post_ra>
